<compile_context>
chip_gen: v7x
topology: tpu7x:2x2x1
jax: 0.10.0
libtpu: 0.0.40
codegen_flags: <defaults>
</compile_context>

<pallas_src>
import jax
import jax.numpy as jnp
from jax.experimental import pallas as pl
from jax.experimental.pallas import tpu as pltpu


# ----------------------------- Pallas kernels ------------------------------

def _conv_pool_relu_kernel(a_ref, w_ref, b_ref, o_ref):
    """4-phase conv matmul + 2x2 max-pool + bias + ReLU.

    a: (4, K, M) bf16  -- im2col patches of the 4 pooling phases
    w: (N, K)    bf16
    b: (N, 1)    f32
    o: (N, M)    f32   -- pooled + ReLU'd conv output, M on the lane axis
    """
    w = w_ref[...]
    acc = jnp.dot(w, a_ref[0], preferred_element_type=jnp.float32)
    acc = jnp.maximum(acc, jnp.dot(w, a_ref[1], preferred_element_type=jnp.float32))
    acc = jnp.maximum(acc, jnp.dot(w, a_ref[2], preferred_element_type=jnp.float32))
    acc = jnp.maximum(acc, jnp.dot(w, a_ref[3], preferred_element_type=jnp.float32))
    o_ref[...] = jnp.maximum(acc + b_ref[...], 0.0)


def _conv_relu_kernel(a_ref, w_ref, b_ref, o_ref):
    """Conv matmul + bias + ReLU.  a:(K,M) bf16, w:(N,K) bf16 -> o:(N,M) f32."""
    acc = jnp.dot(w_ref[...], a_ref[...], preferred_element_type=jnp.float32)
    o_ref[...] = jnp.maximum(acc + b_ref[...], 0.0)


def _conv_relu_pred_kernel(a_ref, w_ref, b_ref, wp_ref, bp_ref, o_ref):
    """Last decoder conv + ReLU fused with the 1x1 prediction conv + sigmoid.

    a:(K,M) bf16, w:(3,K) bf16, b:(3,1) f32, wp:(3,1) f32, bp:(1,1) f32
    o:(1,M) f32 = sigmoid(sum_c wp[c] * relu(conv)[c] + bp)
    """
    y = jnp.dot(w_ref[...], a_ref[...], preferred_element_type=jnp.float32)
    y = jnp.maximum(y + b_ref[...], 0.0)                              # (3, M)
    z = jnp.sum(wp_ref[...] * y, axis=0, keepdims=True) + bp_ref[...]  # (1, M)
    o_ref[...] = jax.nn.sigmoid(z)


# --------------------------- pallas_call wrappers ---------------------------

def _tile_m(M):
    # Tile the lane (M) axis across grid steps (marked "parallel" -> shards
    # across v7x's 2 TensorCores, keeps VMEM bounded at larger image sizes).
    # At the 16x16 test shapes every M <= 128, so this stays a single block.
    if M > 512 and M % 256 == 0:
        return 256
    return M


def conv_pool_relu(phases, w2d, b2):
    _, K, M = phases.shape
    N = w2d.shape[0]
    tm = _tile_m(M)
    return pl.pallas_call(
        _conv_pool_relu_kernel,
        out_shape=jax.ShapeDtypeStruct((N, M), jnp.float32),
        grid=(M // tm,),
        in_specs=[
            pl.BlockSpec((4, K, tm), lambda m: (0, 0, m)),
            pl.BlockSpec((N, K), lambda m: (0, 0)),
            pl.BlockSpec((N, 1), lambda m: (0, 0)),
        ],
        out_specs=pl.BlockSpec((N, tm), lambda m: (0, m)),
        compiler_params=pltpu.CompilerParams(dimension_semantics=("parallel",)),
    )(phases, w2d, b2)


def conv_relu(a, w2d, b2):
    K, M = a.shape
    N = w2d.shape[0]
    tm = _tile_m(M)
    return pl.pallas_call(
        _conv_relu_kernel,
        out_shape=jax.ShapeDtypeStruct((N, M), jnp.float32),
        grid=(M // tm,),
        in_specs=[
            pl.BlockSpec((K, tm), lambda m: (0, m)),
            pl.BlockSpec((N, K), lambda m: (0, 0)),
            pl.BlockSpec((N, 1), lambda m: (0, 0)),
        ],
        out_specs=pl.BlockSpec((N, tm), lambda m: (0, m)),
        compiler_params=pltpu.CompilerParams(dimension_semantics=("parallel",)),
    )(a, w2d, b2)


def conv_relu_pred(a, w2d, b2, wp, bp):
    K, M = a.shape
    N = w2d.shape[0]
    tm = _tile_m(M)
    return pl.pallas_call(
        _conv_relu_pred_kernel,
        out_shape=jax.ShapeDtypeStruct((1, M), jnp.float32),
        grid=(M // tm,),
        in_specs=[
            pl.BlockSpec((K, tm), lambda m: (0, m)),
            pl.BlockSpec((N, K), lambda m: (0, 0)),
            pl.BlockSpec((N, 1), lambda m: (0, 0)),
            pl.BlockSpec((N, 1), lambda m: (0, 0)),
            pl.BlockSpec((1, 1), lambda m: (0, 0)),
        ],
        out_specs=pl.BlockSpec((1, tm), lambda m: (0, m)),
        compiler_params=pltpu.CompilerParams(dimension_semantics=("parallel",)),
    )(a, w2d, b2, wp, bp)


# ------------------------------ XLA glue (im2col etc.) ----------------------

def _im2col_cbhw(x, kh, kw, pad):
    """x: (C, B, H, W) -> stride-1 patches (C*kh*kw, B, Ho, Wo).

    K is ordered (cin, i, j) to match weight.reshape(Cout, Cin*kh*kw); the
    channels-major layout keeps this a pad + slice + stack (no transposes).
    """
    C, B, H, W = x.shape
    xp = jnp.pad(x, ((0, 0), (0, 0), (pad, pad), (pad, pad)))
    Ho = H + 2 * pad - kh + 1
    Wo = W + 2 * pad - kw + 1
    cols = [xp[:, :, i:i + Ho, j:j + Wo] for i in range(kh) for j in range(kw)]
    patches = jnp.stack(cols, axis=1)                 # (C, kh*kw, B, Ho, Wo)
    return patches.reshape(C * kh * kw, B, Ho, Wo)


def encoder_stage(x, w, b):
    """Conv2d(k=5, s=1, p=2) + ReLU + MaxPool2d(2,2).  x: (Cin, B, H, W) f32."""
    Cin, B, H, W = x.shape
    Cout, _, kh, kw = w.shape
    assert H % 2 == 0 and W % 2 == 0, "MaxPool2d(2,2) needs even H, W"
    patches = _im2col_cbhw(x.astype(jnp.bfloat16), kh, kw, kh // 2)  # (K,B,H,W)
    K = patches.shape[0]
    Hp, Wp = H // 2, W // 2
    # 4 pooling phases: conv-output positions (2r+dr, 2c+dc)
    phases = jnp.stack([patches[:, :, dr::2, dc::2]
                        for dr in (0, 1) for dc in (0, 1)], axis=0)
    phases = phases.reshape(4, K, B * Hp * Wp)
    w2d = w.reshape(Cout, K).astype(jnp.bfloat16)
    b2 = b.reshape(Cout, 1).astype(jnp.float32)
    out = conv_pool_relu(phases, w2d, b2)             # (Cout, B*Hp*Wp)
    return out.reshape(Cout, B, Hp, Wp)


# The decoder is specialized to ConvTranspose2d(k=3, stride=2, padding=2,
# output_padding=1, dilation=2) exactly as in the PyTorch module: only the
# (even, even) output phase receives input taps (o = 2*i - 2 + 2*k is always
# even); every other output position is exactly bias.
_DEC_K = 3


def _decoder_low_res_matmul_inputs(x, w_t, b):
    """Build the (K,M) patches / (Cout,K) weight for the even-even phase,
    which equals a 3x3 stride-1 pad-1 conv with the flipped kernel."""
    Cin, B, H, W = x.shape
    assert w_t.shape[2] == _DEC_K and w_t.shape[3] == _DEC_K
    Cout = w_t.shape[1]
    w_eq = jnp.flip(w_t, axis=(2, 3)).transpose(1, 0, 2, 3)   # (Cout, Cin, 3, 3)
    patches = _im2col_cbhw(x.astype(jnp.bfloat16), _DEC_K, _DEC_K, 1)
    K = patches.shape[0]
    a = patches.reshape(K, B * H * W)
    w2d = w_eq.reshape(Cout, K).astype(jnp.bfloat16)
    b2 = b.reshape(Cout, 1).astype(jnp.float32)
    return a, w2d, b2, Cout, B, H, W


def decoder_stage(x, w_t, b):
    """ConvTranspose2d(Cin,Cout,3,s=2,p=2,op=1,d=2) + ReLU, phase-decomposed."""
    a, w2d, b2, Cout, B, H, W = _decoder_low_res_matmul_inputs(x, w_t, b)
    y = conv_relu(a, w2d, b2).reshape(Cout, B, H, W)          # even-even phase
    fill = jnp.maximum(b, 0.0).astype(y.dtype)                # all other phases
    out = jnp.broadcast_to(fill[:, None, None, None], (Cout, B, 2 * H, 2 * W))
    return out.at[:, :, 0::2, 0::2].set(y)


def decoder_pred_stage(x, w_t, b, w_pred, b_pred):
    """Last decoder stage fused with the 1x1 prediction conv + sigmoid.
    Returns the final map in NCHW: (B, 1, 2H, 2W)."""
    a, w2d, b2, Cout, B, H, W = _decoder_low_res_matmul_inputs(x, w_t, b)
    wp = w_pred.reshape(1, Cout).T.astype(jnp.float32)        # (Cout, 1)
    bp = b_pred.reshape(1, 1).astype(jnp.float32)
    pred = conv_relu_pred(a, w2d, b2, wp, bp)                 # (1, B*H*W)
    pred = pred.reshape(1, B, H, W).transpose(1, 0, 2, 3)     # (B, 1, H, W)
    # On the bias-only phases the decoder output is relu(b) (a per-channel
    # constant), so the prediction there is one scalar.
    const = jax.nn.sigmoid(
        jnp.sum(w_pred.reshape(-1) * jnp.maximum(b, 0.0)) + b_pred.reshape(()))
    out = jnp.broadcast_to(const.astype(pred.dtype), (B, 1, 2 * H, 2 * W))
    return out.at[:, :, 0::2, 0::2].set(pred)


# ------------------------------ model ------------------------------

def init_params(key):
    def conv_p(k, cout, cin, kh, kw):
        k1, k2 = jax.random.split(k)
        bound = 1.0 / (cin * kh * kw) ** 0.5
        w = jax.random.uniform(k1, (cout, cin, kh, kw), jnp.float32, -bound, bound)
        b = jax.random.uniform(k2, (cout,), jnp.float32, -bound, bound)
        return w, b

    def convt_p(k, cin, cout, kh, kw):
        k1, k2 = jax.random.split(k)
        bound = 1.0 / (cin * kh * kw) ** 0.5
        w = jax.random.uniform(k1, (cin, cout, kh, kw), jnp.float32, -bound, bound)
        b = jax.random.uniform(k2, (cout,), jnp.float32, -bound, bound)
        return w, b

    ks = jax.random.split(key, 7)
    return {
        "enc1": conv_p(ks[0], 16, 3, 5, 5),
        "enc2": conv_p(ks[1], 32, 16, 5, 5),
        "enc3": conv_p(ks[2], 64, 32, 5, 5),
        "dec1": convt_p(ks[3], 64, 32, 3, 3),
        "dec2": convt_p(ks[4], 32, 16, 3, 3),
        "dec3": convt_p(ks[5], 16, 3, 3, 3),
        "pred": conv_p(ks[6], 1, 3, 1, 1),
    }


def attention_forward(params, x_nchw):
    x = x_nchw.transpose(1, 0, 2, 3)                          # NCHW -> CBHW
    for name in ("enc1", "enc2", "enc3"):
        w, b = params[name]
        x = encoder_stage(x, w, b)
    for name in ("dec1", "dec2"):
        w, b = params[name]
        x = decoder_stage(x, w, b)
    w, b = params["dec3"]
    wp, bp = params["pred"]
    return decoder_pred_stage(x, w, b, wp, bp)                # NCHW out


# --------------------- pure-JAX reference (f32, lax conv) -------------------

def reference_forward(params, x):
    hi = jax.lax.Precision.HIGHEST

    def conv(x, w, b, pad):
        y = jax.lax.conv_general_dilated(
            x, w, window_strides=(1, 1), padding=[(pad, pad), (pad, pad)],
            dimension_numbers=("NCHW", "OIHW", "NCHW"), precision=hi)
        return y + b[None, :, None, None]

    def convT(x, w, b, stride=2, pad=2, out_pad=1, dil=2):
        k = w.shape[2]
        w_eq = jnp.flip(w, (2, 3)).transpose(1, 0, 2, 3)
        lo = dil * (k - 1) - pad
        y = jax.lax.conv_general_dilated(
            x, w_eq, window_strides=(1, 1),
            padding=[(lo, lo + out_pad), (lo, lo + out_pad)],
            lhs_dilation=(stride, stride), rhs_dilation=(dil, dil),
            dimension_numbers=("NCHW", "OIHW", "NCHW"), precision=hi)
        return y + b[None, :, None, None]

    def pool(x):
        return jax.lax.reduce_window(x, -jnp.inf, jax.lax.max,
                                     (1, 1, 2, 2), (1, 1, 2, 2), "VALID")

    relu = lambda v: jnp.maximum(v, 0.0)
    w, b = params["enc1"]; x = pool(relu(conv(x, w, b, 2)))
    w, b = params["enc2"]; x = pool(relu(conv(x, w, b, 2)))
    w, b = params["enc3"]; x = pool(relu(conv(x, w, b, 2)))
    w, b = params["dec1"]; x = relu(convT(x, w, b))
    w, b = params["dec2"]; x = relu(convT(x, w, b))
    w, b = params["dec3"]; x = relu(convT(x, w, b))
    w, b = params["pred"]; x = jax.nn.sigmoid(conv(x, w, b, 0))
    return x


if __name__ == "__main__":
    key = jax.random.PRNGKey(0)
    pkey, xkey = jax.random.split(key)
    params = init_params(pkey)
    x = jax.random.normal(xkey, (2, 3, 16, 16), jnp.float32)  # NCHW

    fwd = jax.jit(attention_forward)
    out = jax.block_until_ready(fwd(params, x))

    assert out.shape == (2, 1, 16, 16), out.shape
    assert bool(jnp.all(jnp.isfinite(out)))
    assert bool(jnp.all((out >= 0.0) & (out <= 1.0)))         # sigmoid range

    # numerics vs an f32 lax-conv reference of the PyTorch module
    ref = jax.jit(reference_forward)(params, x)
    err = float(jnp.max(jnp.abs(out - ref)))
    assert err < 0.06, f"max abs diff vs reference too large: {err}"

    print("KERNEL_OK")
</pallas_src>

<mosaic_0001>
module attributes {stable_mosaic.version = 11 : i64} {
  func.func @_conv_pool_relu_kernel(%arg0: i32, %arg1: memref<4x75x128xbf16, #tpu.memory_space<vmem>>, %arg2: memref<16x75xbf16, #tpu.memory_space<vmem>>, %arg3: memref<16x1xf32, #tpu.memory_space<vmem>>, %arg4: memref<16x128xf32, #tpu.memory_space<vmem>>) attributes {dimension_semantics = [#tpu.dimension_semantics<parallel>], iteration_bounds = array<i64: 1>, scalar_prefetch = 0 : i64, scratch_operands = 0 : i64, tpu.core_type = #tpu.core_type<tc>, window_params = [{transform_indices = @transform_0, window_bounds = array<i64: 4, 75, 128>}, {pipeline_mode = #tpu.pipeline_mode<synchronous>, transform_indices = @transform_1, window_bounds = array<i64: 16, 75>}, {pipeline_mode = #tpu.pipeline_mode<synchronous>, transform_indices = @transform_2, window_bounds = array<i64: 16, 1>}, {transform_indices = @transform_3, window_bounds = array<i64: 16, 128>}]} {
    %c0 = arith.constant 0 : index
    %c0_0 = arith.constant 0 : index
    %0 = vector.load %arg2[%c0, %c0_0] : memref<16x75xbf16, #tpu.memory_space<vmem>>, vector<16x75xbf16>
    %c0_1 = arith.constant 0 : index
    %c0_2 = arith.constant 0 : index
    %c0_3 = arith.constant 0 : index
    %1 = vector.load %arg1[%c0_1, %c0_2, %c0_3] : memref<4x75x128xbf16, #tpu.memory_space<vmem>>, vector<1x75x128xbf16>
    %2 = vector.shape_cast %1 : vector<1x75x128xbf16> to vector<75x128xbf16>
    %cst = arith.constant dense<0.000000e+00> : vector<16x128xf32>
    %3 = tpu.matmul %0, %2, %cst {dimension_numbers = #tpu.dot_dimension_numbers<[1], [0], [0], [1], [0, 0, 1, 1], [], []>} : vector<16x75xbf16>, vector<75x128xbf16>, vector<16x128xf32> -> vector<16x128xf32>
    %c1 = arith.constant 1 : index
    %c0_4 = arith.constant 0 : index
    %c0_5 = arith.constant 0 : index
    %4 = vector.load %arg1[%c1, %c0_4, %c0_5] : memref<4x75x128xbf16, #tpu.memory_space<vmem>>, vector<1x75x128xbf16>
    %5 = vector.shape_cast %4 : vector<1x75x128xbf16> to vector<75x128xbf16>
    %cst_6 = arith.constant dense<0.000000e+00> : vector<16x128xf32>
    %6 = tpu.matmul %0, %5, %cst_6 {dimension_numbers = #tpu.dot_dimension_numbers<[1], [0], [0], [1], [0, 0, 1, 1], [], []>} : vector<16x75xbf16>, vector<75x128xbf16>, vector<16x128xf32> -> vector<16x128xf32>
    %7 = arith.maximumf %3, %6 : vector<16x128xf32>
    %c2 = arith.constant 2 : index
    %c0_7 = arith.constant 0 : index
    %c0_8 = arith.constant 0 : index
    %8 = vector.load %arg1[%c2, %c0_7, %c0_8] : memref<4x75x128xbf16, #tpu.memory_space<vmem>>, vector<1x75x128xbf16>
    %9 = vector.shape_cast %8 : vector<1x75x128xbf16> to vector<75x128xbf16>
    %cst_9 = arith.constant dense<0.000000e+00> : vector<16x128xf32>
    %10 = tpu.matmul %0, %9, %cst_9 {dimension_numbers = #tpu.dot_dimension_numbers<[1], [0], [0], [1], [0, 0, 1, 1], [], []>} : vector<16x75xbf16>, vector<75x128xbf16>, vector<16x128xf32> -> vector<16x128xf32>
    %11 = arith.maximumf %7, %10 : vector<16x128xf32>
    %c3 = arith.constant 3 : index
    %c0_10 = arith.constant 0 : index
    %c0_11 = arith.constant 0 : index
    %12 = vector.load %arg1[%c3, %c0_10, %c0_11] : memref<4x75x128xbf16, #tpu.memory_space<vmem>>, vector<1x75x128xbf16>
    %13 = vector.shape_cast %12 : vector<1x75x128xbf16> to vector<75x128xbf16>
    %cst_12 = arith.constant dense<0.000000e+00> : vector<16x128xf32>
    %14 = tpu.matmul %0, %13, %cst_12 {dimension_numbers = #tpu.dot_dimension_numbers<[1], [0], [0], [1], [0, 0, 1, 1], [], []>} : vector<16x75xbf16>, vector<75x128xbf16>, vector<16x128xf32> -> vector<16x128xf32>
    %15 = arith.maximumf %11, %14 : vector<16x128xf32>
    %c0_13 = arith.constant 0 : index
    %c0_14 = arith.constant 0 : index
    %16 = vector.load %arg3[%c0_13, %c0_14] : memref<16x1xf32, #tpu.memory_space<vmem>>, vector<16x1xf32>
    %17 = vector.broadcast %16 : vector<16x1xf32> to vector<16x128xf32>
    %18 = arith.addf %15, %17 : vector<16x128xf32>
    %cst_15 = arith.constant 0.000000e+00 : f32
    %19 = vector.broadcast %cst_15 : f32 to vector<16x128xf32>
    %20 = arith.maximumf %18, %19 : vector<16x128xf32>
    %c0_16 = arith.constant 0 : index
    %c0_17 = arith.constant 0 : index
    %21 = vector.load %arg4[%c0_16, %c0_17] : memref<16x128xf32, #tpu.memory_space<vmem>>, vector<16x128xf32>
    tpu.vector_store %arg4[%c0_16, %c0_17], %20 {strides = array<i32>} : memref<16x128xf32, #tpu.memory_space<vmem>>, vector<16x128xf32>,
    return
  }
  func.func @transform_0(%arg0: i32) -> (i32, i32, i32) {
    %c0_i32 = arith.constant 0 : i32
    %c0_i32_0 = arith.constant 0 : i32
    %c0_i32_1 = arith.constant 0 : i32
    return %c0_i32, %c0_i32_0, %arg0 : i32, i32, i32
  }
  func.func @transform_1(%arg0: i32) -> (i32, i32) {
    %c0_i32 = arith.constant 0 : i32
    %c0_i32_0 = arith.constant 0 : i32
    %c0_i32_1 = arith.constant 0 : i32
    return %c0_i32, %c0_i32_0 : i32, i32
  }
  func.func @transform_2(%arg0: i32) -> (i32, i32) {
    %c0_i32 = arith.constant 0 : i32
    %c0_i32_0 = arith.constant 0 : i32
    %c0_i32_1 = arith.constant 0 : i32
    return %c0_i32, %c0_i32_0 : i32, i32
  }
  func.func @transform_3(%arg0: i32) -> (i32, i32) {
    %c0_i32 = arith.constant 0 : i32
    %c0_i32_0 = arith.constant 0 : i32
    return %c0_i32, %arg0 : i32, i32
  }
}

module attributes {stable_mosaic.version = 11 : i64} {
  func.func @_conv_pool_relu_kernel(%arg0: i32, %arg1: memref<4x400x32xbf16, #tpu.memory_space<vmem>>, %arg2: memref<32x400xbf16, #tpu.memory_space<vmem>>, %arg3: memref<32x1xf32, #tpu.memory_space<vmem>>, %arg4: memref<32x32xf32, #tpu.memory_space<vmem>>) attributes {dimension_semantics = [#tpu.dimension_semantics<parallel>], iteration_bounds = array<i64: 1>, scalar_prefetch = 0 : i64, scratch_operands = 0 : i64, tpu.core_type = #tpu.core_type<tc>, window_params = [{transform_indices = @transform_0, window_bounds = array<i64: 4, 400, 32>}, {pipeline_mode = #tpu.pipeline_mode<synchronous>, transform_indices = @transform_1, window_bounds = array<i64: 32, 400>}, {pipeline_mode = #tpu.pipeline_mode<synchronous>, transform_indices = @transform_2, window_bounds = array<i64: 32, 1>}, {transform_indices = @transform_3, window_bounds = array<i64: 32, 32>}]} {
    %c0 = arith.constant 0 : index
    %c0_0 = arith.constant 0 : index
    %0 = vector.load %arg2[%c0, %c0_0] : memref<32x400xbf16, #tpu.memory_space<vmem>>, vector<32x400xbf16>
    %c0_1 = arith.constant 0 : index
    %c0_2 = arith.constant 0 : index
    %c0_3 = arith.constant 0 : index
    %1 = vector.load %arg1[%c0_1, %c0_2, %c0_3] : memref<4x400x32xbf16, #tpu.memory_space<vmem>>, vector<1x400x32xbf16>
    %2 = vector.shape_cast %1 : vector<1x400x32xbf16> to vector<400x32xbf16>
    %cst = arith.constant dense<0.000000e+00> : vector<32x32xf32>
    %3 = tpu.matmul %0, %2, %cst {dimension_numbers = #tpu.dot_dimension_numbers<[1], [0], [0], [1], [0, 0, 1, 1], [], []>} : vector<32x400xbf16>, vector<400x32xbf16>, vector<32x32xf32> -> vector<32x32xf32>
    %c1 = arith.constant 1 : index
    %c0_4 = arith.constant 0 : index
    %c0_5 = arith.constant 0 : index
    %4 = vector.load %arg1[%c1, %c0_4, %c0_5] : memref<4x400x32xbf16, #tpu.memory_space<vmem>>, vector<1x400x32xbf16>
    %5 = vector.shape_cast %4 : vector<1x400x32xbf16> to vector<400x32xbf16>
    %cst_6 = arith.constant dense<0.000000e+00> : vector<32x32xf32>
    %6 = tpu.matmul %0, %5, %cst_6 {dimension_numbers = #tpu.dot_dimension_numbers<[1], [0], [0], [1], [0, 0, 1, 1], [], []>} : vector<32x400xbf16>, vector<400x32xbf16>, vector<32x32xf32> -> vector<32x32xf32>
    %7 = arith.maximumf %3, %6 : vector<32x32xf32>
    %c2 = arith.constant 2 : index
    %c0_7 = arith.constant 0 : index
    %c0_8 = arith.constant 0 : index
    %8 = vector.load %arg1[%c2, %c0_7, %c0_8] : memref<4x400x32xbf16, #tpu.memory_space<vmem>>, vector<1x400x32xbf16>
    %9 = vector.shape_cast %8 : vector<1x400x32xbf16> to vector<400x32xbf16>
    %cst_9 = arith.constant dense<0.000000e+00> : vector<32x32xf32>
    %10 = tpu.matmul %0, %9, %cst_9 {dimension_numbers = #tpu.dot_dimension_numbers<[1], [0], [0], [1], [0, 0, 1, 1], [], []>} : vector<32x400xbf16>, vector<400x32xbf16>, vector<32x32xf32> -> vector<32x32xf32>
    %11 = arith.maximumf %7, %10 : vector<32x32xf32>
    %c3 = arith.constant 3 : index
    %c0_10 = arith.constant 0 : index
    %c0_11 = arith.constant 0 : index
    %12 = vector.load %arg1[%c3, %c0_10, %c0_11] : memref<4x400x32xbf16, #tpu.memory_space<vmem>>, vector<1x400x32xbf16>
    %13 = vector.shape_cast %12 : vector<1x400x32xbf16> to vector<400x32xbf16>
    %cst_12 = arith.constant dense<0.000000e+00> : vector<32x32xf32>
    %14 = tpu.matmul %0, %13, %cst_12 {dimension_numbers = #tpu.dot_dimension_numbers<[1], [0], [0], [1], [0, 0, 1, 1], [], []>} : vector<32x400xbf16>, vector<400x32xbf16>, vector<32x32xf32> -> vector<32x32xf32>
    %15 = arith.maximumf %11, %14 : vector<32x32xf32>
    %c0_13 = arith.constant 0 : index
    %c0_14 = arith.constant 0 : index
    %16 = vector.load %arg3[%c0_13, %c0_14] : memref<32x1xf32, #tpu.memory_space<vmem>>, vector<32x1xf32>
    %17 = vector.broadcast %16 : vector<32x1xf32> to vector<32x32xf32>
    %18 = arith.addf %15, %17 : vector<32x32xf32>
    %cst_15 = arith.constant 0.000000e+00 : f32
    %19 = vector.broadcast %cst_15 : f32 to vector<32x32xf32>
    %20 = arith.maximumf %18, %19 : vector<32x32xf32>
    %c0_16 = arith.constant 0 : index
    %c0_17 = arith.constant 0 : index
    %21 = vector.load %arg4[%c0_16, %c0_17] : memref<32x32xf32, #tpu.memory_space<vmem>>, vector<32x32xf32>
    tpu.vector_store %arg4[%c0_16, %c0_17], %20 {strides = array<i32>} : memref<32x32xf32, #tpu.memory_space<vmem>>, vector<32x32xf32>,
    return
  }
  func.func @transform_0(%arg0: i32) -> (i32, i32, i32) {
    %c0_i32 = arith.constant 0 : i32
    %c0_i32_0 = arith.constant 0 : i32
    %c0_i32_1 = arith.constant 0 : i32
    return %c0_i32, %c0_i32_0, %arg0 : i32, i32, i32
  }
  func.func @transform_1(%arg0: i32) -> (i32, i32) {
    %c0_i32 = arith.constant 0 : i32
    %c0_i32_0 = arith.constant 0 : i32
    %c0_i32_1 = arith.constant 0 : i32
    return %c0_i32, %c0_i32_0 : i32, i32
  }
  func.func @transform_2(%arg0: i32) -> (i32, i32) {
    %c0_i32 = arith.constant 0 : i32
    %c0_i32_0 = arith.constant 0 : i32
    %c0_i32_1 = arith.constant 0 : i32
    return %c0_i32, %c0_i32_0 : i32, i32
  }
  func.func @transform_3(%arg0: i32) -> (i32, i32) {
    %c0_i32 = arith.constant 0 : i32
    %c0_i32_0 = arith.constant 0 : i32
    return %c0_i32, %arg0 : i32, i32
  }
}

module attributes {stable_mosaic.version = 11 : i64} {
  func.func @_conv_pool_relu_kernel(%arg0: i32, %arg1: memref<4x800x8xbf16, #tpu.memory_space<vmem>>, %arg2: memref<64x800xbf16, #tpu.memory_space<vmem>>, %arg3: memref<64x1xf32, #tpu.memory_space<vmem>>, %arg4: memref<64x8xf32, #tpu.memory_space<vmem>>) attributes {dimension_semantics = [#tpu.dimension_semantics<parallel>], iteration_bounds = array<i64: 1>, scalar_prefetch = 0 : i64, scratch_operands = 0 : i64, tpu.core_type = #tpu.core_type<tc>, window_params = [{transform_indices = @transform_0, window_bounds = array<i64: 4, 800, 8>}, {pipeline_mode = #tpu.pipeline_mode<synchronous>, transform_indices = @transform_1, window_bounds = array<i64: 64, 800>}, {pipeline_mode = #tpu.pipeline_mode<synchronous>, transform_indices = @transform_2, window_bounds = array<i64: 64, 1>}, {transform_indices = @transform_3, window_bounds = array<i64: 64, 8>}]} {
    %c0 = arith.constant 0 : index
    %c0_0 = arith.constant 0 : index
    %0 = vector.load %arg2[%c0, %c0_0] : memref<64x800xbf16, #tpu.memory_space<vmem>>, vector<64x800xbf16>
    %c0_1 = arith.constant 0 : index
    %c0_2 = arith.constant 0 : index
    %c0_3 = arith.constant 0 : index
    %1 = vector.load %arg1[%c0_1, %c0_2, %c0_3] : memref<4x800x8xbf16, #tpu.memory_space<vmem>>, vector<1x800x8xbf16>
    %2 = vector.shape_cast %1 : vector<1x800x8xbf16> to vector<800x8xbf16>
    %cst = arith.constant dense<0.000000e+00> : vector<64x8xf32>
    %3 = tpu.matmul %0, %2, %cst {dimension_numbers = #tpu.dot_dimension_numbers<[1], [0], [0], [1], [0, 0, 1, 1], [], []>} : vector<64x800xbf16>, vector<800x8xbf16>, vector<64x8xf32> -> vector<64x8xf32>
    %c1 = arith.constant 1 : index
    %c0_4 = arith.constant 0 : index
    %c0_5 = arith.constant 0 : index
    %4 = vector.load %arg1[%c1, %c0_4, %c0_5] : memref<4x800x8xbf16, #tpu.memory_space<vmem>>, vector<1x800x8xbf16>
    %5 = vector.shape_cast %4 : vector<1x800x8xbf16> to vector<800x8xbf16>
    %cst_6 = arith.constant dense<0.000000e+00> : vector<64x8xf32>
    %6 = tpu.matmul %0, %5, %cst_6 {dimension_numbers = #tpu.dot_dimension_numbers<[1], [0], [0], [1], [0, 0, 1, 1], [], []>} : vector<64x800xbf16>, vector<800x8xbf16>, vector<64x8xf32> -> vector<64x8xf32>
    %7 = arith.maximumf %3, %6 : vector<64x8xf32>
    %c2 = arith.constant 2 : index
    %c0_7 = arith.constant 0 : index
    %c0_8 = arith.constant 0 : index
    %8 = vector.load %arg1[%c2, %c0_7, %c0_8] : memref<4x800x8xbf16, #tpu.memory_space<vmem>>, vector<1x800x8xbf16>
    %9 = vector.shape_cast %8 : vector<1x800x8xbf16> to vector<800x8xbf16>
    %cst_9 = arith.constant dense<0.000000e+00> : vector<64x8xf32>
    %10 = tpu.matmul %0, %9, %cst_9 {dimension_numbers = #tpu.dot_dimension_numbers<[1], [0], [0], [1], [0, 0, 1, 1], [], []>} : vector<64x800xbf16>, vector<800x8xbf16>, vector<64x8xf32> -> vector<64x8xf32>
    %11 = arith.maximumf %7, %10 : vector<64x8xf32>
    %c3 = arith.constant 3 : index
    %c0_10 = arith.constant 0 : index
    %c0_11 = arith.constant 0 : index
    %12 = vector.load %arg1[%c3, %c0_10, %c0_11] : memref<4x800x8xbf16, #tpu.memory_space<vmem>>, vector<1x800x8xbf16>
    %13 = vector.shape_cast %12 : vector<1x800x8xbf16> to vector<800x8xbf16>
    %cst_12 = arith.constant dense<0.000000e+00> : vector<64x8xf32>
    %14 = tpu.matmul %0, %13, %cst_12 {dimension_numbers = #tpu.dot_dimension_numbers<[1], [0], [0], [1], [0, 0, 1, 1], [], []>} : vector<64x800xbf16>, vector<800x8xbf16>, vector<64x8xf32> -> vector<64x8xf32>
    %15 = arith.maximumf %11, %14 : vector<64x8xf32>
    %c0_13 = arith.constant 0 : index
    %c0_14 = arith.constant 0 : index
    %16 = vector.load %arg3[%c0_13, %c0_14] : memref<64x1xf32, #tpu.memory_space<vmem>>, vector<64x1xf32>
    %17 = vector.broadcast %16 : vector<64x1xf32> to vector<64x8xf32>
    %18 = arith.addf %15, %17 : vector<64x8xf32>
    %cst_15 = arith.constant 0.000000e+00 : f32
    %19 = vector.broadcast %cst_15 : f32 to vector<64x8xf32>
    %20 = arith.maximumf %18, %19 : vector<64x8xf32>
    %c0_16 = arith.constant 0 : index
    %c0_17 = arith.constant 0 : index
    %21 = vector.load %arg4[%c0_16, %c0_17] : memref<64x8xf32, #tpu.memory_space<vmem>>, vector<64x8xf32>
    tpu.vector_store %arg4[%c0_16, %c0_17], %20 {strides = array<i32>} : memref<64x8xf32, #tpu.memory_space<vmem>>, vector<64x8xf32>,
    return
  }
  func.func @transform_0(%arg0: i32) -> (i32, i32, i32) {
    %c0_i32 = arith.constant 0 : i32
    %c0_i32_0 = arith.constant 0 : i32
    %c0_i32_1 = arith.constant 0 : i32
    return %c0_i32, %c0_i32_0, %arg0 : i32, i32, i32
  }
  func.func @transform_1(%arg0: i32) -> (i32, i32) {
    %c0_i32 = arith.constant 0 : i32
    %c0_i32_0 = arith.constant 0 : i32
    %c0_i32_1 = arith.constant 0 : i32
    return %c0_i32, %c0_i32_0 : i32, i32
  }
  func.func @transform_2(%arg0: i32) -> (i32, i32) {
    %c0_i32 = arith.constant 0 : i32
    %c0_i32_0 = arith.constant 0 : i32
    %c0_i32_1 = arith.constant 0 : i32
    return %c0_i32, %c0_i32_0 : i32, i32
  }
  func.func @transform_3(%arg0: i32) -> (i32, i32) {
    %c0_i32 = arith.constant 0 : i32
    %c0_i32_0 = arith.constant 0 : i32
    return %c0_i32, %arg0 : i32, i32
  }
}

module attributes {stable_mosaic.version = 11 : i64} {
  func.func @_conv_relu_kernel(%arg0: i32, %arg1: memref<576x8xbf16, #tpu.memory_space<vmem>>, %arg2: memref<32x576xbf16, #tpu.memory_space<vmem>>, %arg3: memref<32x1xf32, #tpu.memory_space<vmem>>, %arg4: memref<32x8xf32, #tpu.memory_space<vmem>>) attributes {dimension_semantics = [#tpu.dimension_semantics<parallel>], iteration_bounds = array<i64: 1>, scalar_prefetch = 0 : i64, scratch_operands = 0 : i64, tpu.core_type = #tpu.core_type<tc>, window_params = [{transform_indices = @transform_0, window_bounds = array<i64: 576, 8>}, {pipeline_mode = #tpu.pipeline_mode<synchronous>, transform_indices = @transform_1, window_bounds = array<i64: 32, 576>}, {pipeline_mode = #tpu.pipeline_mode<synchronous>, transform_indices = @transform_2, window_bounds = array<i64: 32, 1>}, {transform_indices = @transform_3, window_bounds = array<i64: 32, 8>}]} {
    %c0 = arith.constant 0 : index
    %c0_0 = arith.constant 0 : index
    %0 = vector.load %arg2[%c0, %c0_0] : memref<32x576xbf16, #tpu.memory_space<vmem>>, vector<32x576xbf16>
    %c0_1 = arith.constant 0 : index
    %c0_2 = arith.constant 0 : index
    %1 = vector.load %arg1[%c0_1, %c0_2] : memref<576x8xbf16, #tpu.memory_space<vmem>>, vector<576x8xbf16>
    %cst = arith.constant dense<0.000000e+00> : vector<32x8xf32>
    %2 = tpu.matmul %0, %1, %cst {dimension_numbers = #tpu.dot_dimension_numbers<[1], [0], [0], [1], [0, 0, 1, 1], [], []>} : vector<32x576xbf16>, vector<576x8xbf16>, vector<32x8xf32> -> vector<32x8xf32>
    %c0_3 = arith.constant 0 : index
    %c0_4 = arith.constant 0 : index
    %3 = vector.load %arg3[%c0_3, %c0_4] : memref<32x1xf32, #tpu.memory_space<vmem>>, vector<32x1xf32>
    %4 = vector.broadcast %3 : vector<32x1xf32> to vector<32x8xf32>
    %5 = arith.addf %2, %4 : vector<32x8xf32>
    %cst_5 = arith.constant 0.000000e+00 : f32
    %6 = vector.broadcast %cst_5 : f32 to vector<32x8xf32>
    %7 = arith.maximumf %5, %6 : vector<32x8xf32>
    %c0_6 = arith.constant 0 : index
    %c0_7 = arith.constant 0 : index
    %8 = vector.load %arg4[%c0_6, %c0_7] : memref<32x8xf32, #tpu.memory_space<vmem>>, vector<32x8xf32>
    tpu.vector_store %arg4[%c0_6, %c0_7], %7 {strides = array<i32>} : memref<32x8xf32, #tpu.memory_space<vmem>>, vector<32x8xf32>,
    return
  }
  func.func @transform_0(%arg0: i32) -> (i32, i32) {
    %c0_i32 = arith.constant 0 : i32
    %c0_i32_0 = arith.constant 0 : i32
    return %c0_i32, %arg0 : i32, i32
  }
  func.func @transform_1(%arg0: i32) -> (i32, i32) {
    %c0_i32 = arith.constant 0 : i32
    %c0_i32_0 = arith.constant 0 : i32
    %c0_i32_1 = arith.constant 0 : i32
    return %c0_i32, %c0_i32_0 : i32, i32
  }
  func.func @transform_2(%arg0: i32) -> (i32, i32) {
    %c0_i32 = arith.constant 0 : i32
    %c0_i32_0 = arith.constant 0 : i32
    %c0_i32_1 = arith.constant 0 : i32
    return %c0_i32, %c0_i32_0 : i32, i32
  }
  func.func @transform_3(%arg0: i32) -> (i32, i32) {
    %c0_i32 = arith.constant 0 : i32
    %c0_i32_0 = arith.constant 0 : i32
    return %c0_i32, %arg0 : i32, i32
  }
}

module attributes {stable_mosaic.version = 11 : i64} {
  func.func @_conv_relu_kernel(%arg0: i32, %arg1: memref<288x32xbf16, #tpu.memory_space<vmem>>, %arg2: memref<16x288xbf16, #tpu.memory_space<vmem>>, %arg3: memref<16x1xf32, #tpu.memory_space<vmem>>, %arg4: memref<16x32xf32, #tpu.memory_space<vmem>>) attributes {dimension_semantics = [#tpu.dimension_semantics<parallel>], iteration_bounds = array<i64: 1>, scalar_prefetch = 0 : i64, scratch_operands = 0 : i64, tpu.core_type = #tpu.core_type<tc>, window_params = [{transform_indices = @transform_0, window_bounds = array<i64: 288, 32>}, {pipeline_mode = #tpu.pipeline_mode<synchronous>, transform_indices = @transform_1, window_bounds = array<i64: 16, 288>}, {pipeline_mode = #tpu.pipeline_mode<synchronous>, transform_indices = @transform_2, window_bounds = array<i64: 16, 1>}, {transform_indices = @transform_3, window_bounds = array<i64: 16, 32>}]} {
    %c0 = arith.constant 0 : index
    %c0_0 = arith.constant 0 : index
    %0 = vector.load %arg2[%c0, %c0_0] : memref<16x288xbf16, #tpu.memory_space<vmem>>, vector<16x288xbf16>
    %c0_1 = arith.constant 0 : index
    %c0_2 = arith.constant 0 : index
    %1 = vector.load %arg1[%c0_1, %c0_2] : memref<288x32xbf16, #tpu.memory_space<vmem>>, vector<288x32xbf16>
    %cst = arith.constant dense<0.000000e+00> : vector<16x32xf32>
    %2 = tpu.matmul %0, %1, %cst {dimension_numbers = #tpu.dot_dimension_numbers<[1], [0], [0], [1], [0, 0, 1, 1], [], []>} : vector<16x288xbf16>, vector<288x32xbf16>, vector<16x32xf32> -> vector<16x32xf32>
    %c0_3 = arith.constant 0 : index
    %c0_4 = arith.constant 0 : index
    %3 = vector.load %arg3[%c0_3, %c0_4] : memref<16x1xf32, #tpu.memory_space<vmem>>, vector<16x1xf32>
    %4 = vector.broadcast %3 : vector<16x1xf32> to vector<16x32xf32>
    %5 = arith.addf %2, %4 : vector<16x32xf32>
    %cst_5 = arith.constant 0.000000e+00 : f32
    %6 = vector.broadcast %cst_5 : f32 to vector<16x32xf32>
    %7 = arith.maximumf %5, %6 : vector<16x32xf32>
    %c0_6 = arith.constant 0 : index
    %c0_7 = arith.constant 0 : index
    %8 = vector.load %arg4[%c0_6, %c0_7] : memref<16x32xf32, #tpu.memory_space<vmem>>, vector<16x32xf32>
    tpu.vector_store %arg4[%c0_6, %c0_7], %7 {strides = array<i32>} : memref<16x32xf32, #tpu.memory_space<vmem>>, vector<16x32xf32>,
    return
  }
  func.func @transform_0(%arg0: i32) -> (i32, i32) {
    %c0_i32 = arith.constant 0 : i32
    %c0_i32_0 = arith.constant 0 : i32
    return %c0_i32, %arg0 : i32, i32
  }
  func.func @transform_1(%arg0: i32) -> (i32, i32) {
    %c0_i32 = arith.constant 0 : i32
    %c0_i32_0 = arith.constant 0 : i32
    %c0_i32_1 = arith.constant 0 : i32
    return %c0_i32, %c0_i32_0 : i32, i32
  }
  func.func @transform_2(%arg0: i32) -> (i32, i32) {
    %c0_i32 = arith.constant 0 : i32
    %c0_i32_0 = arith.constant 0 : i32
    %c0_i32_1 = arith.constant 0 : i32
    return %c0_i32, %c0_i32_0 : i32, i32
  }
  func.func @transform_3(%arg0: i32) -> (i32, i32) {
    %c0_i32 = arith.constant 0 : i32
    %c0_i32_0 = arith.constant 0 : i32
    return %c0_i32, %arg0 : i32, i32
  }
}

module attributes {stable_mosaic.version = 11 : i64} {
  func.func @_conv_relu_pred_kernel(%arg0: i32, %arg1: memref<144x128xbf16, #tpu.memory_space<vmem>>, %arg2: memref<3x144xbf16, #tpu.memory_space<vmem>>, %arg3: memref<3x1xf32, #tpu.memory_space<vmem>>, %arg4: memref<3x1xf32, #tpu.memory_space<vmem>>, %arg5: memref<1x1xf32, #tpu.memory_space<vmem>>, %arg6: memref<1x128xf32, #tpu.memory_space<vmem>>) attributes {dimension_semantics = [#tpu.dimension_semantics<parallel>], iteration_bounds = array<i64: 1>, scalar_prefetch = 0 : i64, scratch_operands = 0 : i64, tpu.core_type = #tpu.core_type<tc>, window_params = [{transform_indices = @transform_0, window_bounds = array<i64: 144, 128>}, {pipeline_mode = #tpu.pipeline_mode<synchronous>, transform_indices = @transform_1, window_bounds = array<i64: 3, 144>}, {pipeline_mode = #tpu.pipeline_mode<synchronous>, transform_indices = @transform_2, window_bounds = array<i64: 3, 1>}, {pipeline_mode = #tpu.pipeline_mode<synchronous>, transform_indices = @transform_3, window_bounds = array<i64: 3, 1>}, {pipeline_mode = #tpu.pipeline_mode<synchronous>, transform_indices = @transform_4, window_bounds = array<i64: 1, 1>}, {transform_indices = @transform_5, window_bounds = array<i64: 1, 128>}]} {
    %c0 = arith.constant 0 : index
    %c0_0 = arith.constant 0 : index
    %0 = vector.load %arg2[%c0, %c0_0] : memref<3x144xbf16, #tpu.memory_space<vmem>>, vector<3x144xbf16>
    %c0_1 = arith.constant 0 : index
    %c0_2 = arith.constant 0 : index
    %1 = vector.load %arg1[%c0_1, %c0_2] : memref<144x128xbf16, #tpu.memory_space<vmem>>, vector<144x128xbf16>
    %cst = arith.constant dense<0.000000e+00> : vector<3x128xf32>
    %2 = tpu.matmul %0, %1, %cst {dimension_numbers = #tpu.dot_dimension_numbers<[1], [0], [0], [1], [0, 0, 1, 1], [], []>} : vector<3x144xbf16>, vector<144x128xbf16>, vector<3x128xf32> -> vector<3x128xf32>
    %c0_3 = arith.constant 0 : index
    %c0_4 = arith.constant 0 : index
    %3 = vector.load %arg3[%c0_3, %c0_4] : memref<3x1xf32, #tpu.memory_space<vmem>>, vector<3x1xf32>
    %4 = vector.broadcast %3 : vector<3x1xf32> to vector<3x128xf32>
    %5 = arith.addf %2, %4 : vector<3x128xf32>
    %cst_5 = arith.constant 0.000000e+00 : f32
    %6 = vector.broadcast %cst_5 : f32 to vector<3x128xf32>
    %7 = arith.maximumf %5, %6 : vector<3x128xf32>
    %c0_6 = arith.constant 0 : index
    %c0_7 = arith.constant 0 : index
    %8 = vector.load %arg4[%c0_6, %c0_7] : memref<3x1xf32, #tpu.memory_space<vmem>>, vector<3x1xf32>
    %9 = vector.broadcast %8 : vector<3x1xf32> to vector<3x128xf32>
    %10 = arith.mulf %9, %7 : vector<3x128xf32>
    %cst_8 = arith.constant dense<0.000000e+00> : vector<128xf32>
    %11 = vector.multi_reduction <add>, %10, %cst_8 [0] : vector<3x128xf32> to vector<128xf32>
    %12 = vector.shape_cast %11 : vector<128xf32> to vector<1x128xf32>
    %c0_9 = arith.constant 0 : index
    %c0_10 = arith.constant 0 : index
    %13 = vector.load %arg5[%c0_9, %c0_10] : memref<1x1xf32, #tpu.memory_space<vmem>>, vector<1x1xf32>
    %14 = vector.broadcast %13 : vector<1x1xf32> to vector<1x128xf32>
    %15 = arith.addf %12, %14 : vector<1x128xf32>
    %16 = arith.negf %15 : vector<1x128xf32>
    %17 = math.exp %16 : vector<1x128xf32>
    %cst_11 = arith.constant 1.000000e+00 : f32
    %18 = vector.broadcast %cst_11 : f32 to vector<1x128xf32>
    %19 = arith.addf %18, %17 : vector<1x128xf32>
    %20 = arith.divf %18, %19 : vector<1x128xf32>
    %c0_12 = arith.constant 0 : index
    %c0_13 = arith.constant 0 : index
    %21 = vector.load %arg6[%c0_12, %c0_13] : memref<1x128xf32, #tpu.memory_space<vmem>>, vector<1x128xf32>
    tpu.vector_store %arg6[%c0_12, %c0_13], %20 {strides = array<i32>} : memref<1x128xf32, #tpu.memory_space<vmem>>, vector<1x128xf32>,
    return
  }
  func.func @transform_0(%arg0: i32) -> (i32, i32) {
    %c0_i32 = arith.constant 0 : i32
    %c0_i32_0 = arith.constant 0 : i32
    return %c0_i32, %arg0 : i32, i32
  }
  func.func @transform_1(%arg0: i32) -> (i32, i32) {
    %c0_i32 = arith.constant 0 : i32
    %c0_i32_0 = arith.constant 0 : i32
    %c0_i32_1 = arith.constant 0 : i32
    return %c0_i32, %c0_i32_0 : i32, i32
  }
  func.func @transform_2(%arg0: i32) -> (i32, i32) {
    %c0_i32 = arith.constant 0 : i32
    %c0_i32_0 = arith.constant 0 : i32
    %c0_i32_1 = arith.constant 0 : i32
    return %c0_i32, %c0_i32_0 : i32, i32
  }
  func.func @transform_3(%arg0: i32) -> (i32, i32) {
    %c0_i32 = arith.constant 0 : i32
    %c0_i32_0 = arith.constant 0 : i32
    %c0_i32_1 = arith.constant 0 : i32
    return %c0_i32, %c0_i32_0 : i32, i32
  }
  func.func @transform_4(%arg0: i32) -> (i32, i32) {
    %c0_i32 = arith.constant 0 : i32
    %c0_i32_0 = arith.constant 0 : i32
    %c0_i32_1 = arith.constant 0 : i32
    return %c0_i32, %c0_i32_0 : i32, i32
  }
  func.func @transform_5(%arg0: i32) -> (i32, i32) {
    %c0_i32 = arith.constant 0 : i32
    %c0_i32_0 = arith.constant 0 : i32
    return %c0_i32, %arg0 : i32, i32
  }
}

</mosaic_0001>

<bundles_post_ra>
// kernel: attention_forward.6
= control target key start
LH: loop header
LB: loop body
LE: loop exit
PB: predicated region body
PF: predicated region fallthrough
CT: control target
= control target key end

     0   :  { %v554_v0 = vmov 0.0   ;;  %vm65_vm0 = vcmask 1044480   ;;  %vm555_vm1 = vmmov 0   ;;  %vm66_vm2 = vcmask 1045504   ;;  %s686_s0 = inlined_call_operand.vmem [shape: bf16[4,75,128], index: 0, kind: input, shape index: {}]   ;;  %s687_s1 = inlined_call_operand.vmem [shape: bf16[16,75], index: 1, kind: input, shape index: {}]   ;;  %s688_s2 = inlined_call_operand.vmem [shape: f32[16,1], index: 2, kind: input, shape index: {}]   ;;  %s689_s3 = inlined_call_operand.vmem [shape: f32[16,128], index: 3, kind: output, shape index: {}]  }
   0x1   :  { %472 = vmatprep.subr.bf16.mxu0 %v554_v0  ;;  %486 = vmatprep.subr.bf16.mxu1 %v554_v0  ;;  %v533_v1 = vld [vmem:[%s686_s0] sm:$0xff]   ;;  %v534_v2 = vld [vmem:[%s686_s0 + $0x28] sm:$0xff]   ;;  %v536_v4 = vld [vmem:[%s686_s0 + $0x30] sm:$0xff]   ;;  %v556_v5 = vmov 0   ;;  %v557_v7 = vmov 65535   ;;  %vm61_vm3 = vcmask 613376  }
   0x2   :  { %473 = vmatpush3.bf16.msra.mxu0 %v533_v1  ;;  %v535_v3 = vld [vmem:[%s686_s0 + $0x8] sm:$0xff]   ;;  %487 = vmatpush3.bf16.msra.mxu1 %v534_v2  ;;  %v537_v6 = vld [vmem:[%s686_s0 + $0x10] sm:$0xff]   ;;  %v67_v8 = vsel %vm65_vm0, 4294967295, %v557_v7  ;;  %v538_v9 = vld [vmem:[%s686_s0 + $0x38] sm:$0xff]  }
   0x3   :  { %474 = vmatprep.subr.bf16.mxu0 %v554_v0  ;;  %488 = vmatprep.subr.bf16.mxu1 %v554_v0  ;;  %v539_v10 = vld [vmem:[%s686_s0 + $0x18] sm:$0xff]   ;;  %v540_v11 = vld [vmem:[%s686_s0 + $0x40] sm:$0xff]   ;;  %v68_v12 = vsel %vm66_vm2, %v67_v8, 0  ;;  %v542_v14 = vld [vmem:[%s686_s0 + $0x48] sm:$0x3f]  }
   0x4   :  { %482 = vmatprep.mubr.msk.bf16.mxu0 %vm555_vm1, %v554_v0  ;;  %496 = vmatprep.mubr.msk.bf16.mxu1 %vm555_vm1, %v554_v0  ;;  %v541_v13 = vld [vmem:[%s686_s0 + $0x20] sm:$0x3f]   ;;  %v154_v16 = vand.u32 %v542_v14, %v68_v12  ;;  %v544_v18 = vld [vmem:[%s686_s0 + $0x50] sm:$0xff]   ;;  %v545_v19 = vld [vmem:[%s686_s0 + $0x78] sm:$0xff]  }
   0x5   :  { %532 = vset.pattern.permute.xlu0 %v556_v5  ;;  %v70_v15 = vand.u32 %v541_v13, %v68_v12  ;;  %v543_v17 = vld [vmem:[%s687_s1] sm:$0xff]   ;;  %v546_v20 = vld [vmem:[%s686_s0 + $0x58] sm:$0xff]   ;;  %v372_v24 = vld [vmem:[%s688_s2 + $0x8] sm:$0xff] }
   0x6   :  { %475 = vmatpush3.bf16.msra.mxu0 %v535_v3  ;;  %489 = vmatpush3.bf16.msra.mxu1 %v536_v4  ;;  %v371_v21 = vld [vmem:[%s688_s2] sm:$0xff]  ;;  %v549_v25 = vld [vmem:[%s686_s0 + $0x88] sm:$0xff]   ;;  %v552_v27 = vld [vmem:[%s686_s0 + $0x70] sm:$0x3f]  }
   0x7   :  { %476 = vmatprep.subr.bf16.mxu0 %v554_v0  ;;  %490 = vmatprep.subr.bf16.mxu1 %v554_v0  ;;  %v547_v22 = vld [vmem:[%s686_s0 + $0x80] sm:$0xff]   ;;  %v550_v26 = vld [vmem:[%s686_s0 + $0x68] sm:$0xff]   ;;  %v551_v28 = vld [vmem:[%s686_s0 + $0x90] sm:$0xff]   ;;  %v240_v30 = vand.u32 %v552_v27, %v68_v12 }
   0x8   :  { %375 = vperm.xlu0 %532, %v371_v21   ;;  %v548_v23 = vld [vmem:[%s686_s0 + $0x60] sm:$0xff]   ;;  %v553_v29 = vld [vmem:[%s686_s0 + $0x98] sm:$0x3f]  }
   0x9   :  { %v326_v31 = vand.u32 %v553_v29, %v68_v12 }
   0xa   :  { %477 = vmatpush3.bf16.msra.mxu0 %v537_v6  ;;  %491 = vmatpush3.bf16.msra.mxu1 %v538_v9 }
   0xb   :  { %478 = vmatprep.subr.bf16.mxu0 %v554_v0  ;;  %492 = vmatprep.subr.bf16.mxu1 %v554_v0 }
   0xc   :  { %380 = vperm.xlu0 %532, %v372_v24  }
   0xe   :  { %479 = vmatpush3.bf16.msra.mxu0 %v539_v10  ;;  %493 = vmatpush3.bf16.msra.mxu1 %v540_v11 }
   0xf   :  { %480 = vmatprep.subr.bf16.mxu0 %v554_v0  ;;  %494 = vmatprep.subr.bf16.mxu1 %v554_v0 }
  0x12   :  { %481 = vmatpush3.bf16.msra.mxu0 %v70_v15  ;;  %495 = vmatpush3.bf16.msra.mxu1 %v154_v16 }
  0x13   :  { %500 = vmatprep.subr.bf16.mxu0 %v554_v0  ;;  %514 = vmatprep.subr.bf16.mxu1 %v554_v0 }
  0x15   :  { %483 = vmatmul.mubr.msk.bf16.vlgmr.msra.gmra.mrb[0].mxu0 %vm61_vm3, %v543_v17  ;;  %497 = vmatmul.mubr.msk.bf16.vlgmr.msra.gmra.mrb[0].mxu1 %vm61_vm3, %v543_v17 }
  0x16   :  { %501 = vmatpush3.bf16.msra.mxu0 %v544_v18  ;;  %515 = vmatpush3.bf16.msra.mxu1 %v545_v19 }
  0x17   :  { %502 = vmatprep.subr.bf16.mxu0 %v554_v0  ;;  %516 = vmatprep.subr.bf16.mxu1 %v554_v0 }
  0x18   :  { %510 = vmatprep.mubr.msk.bf16.mxu0 %vm555_vm1, %v554_v0  ;;  %524 = vmatprep.mubr.msk.bf16.mxu1 %vm555_vm1, %v554_v0 }
  0x1a   :  { %503 = vmatpush3.bf16.msra.mxu0 %v546_v20  ;;  %517 = vmatpush3.bf16.msra.mxu1 %v547_v22 }
  0x1b   :  { %504 = vmatprep.subr.bf16.mxu0 %v554_v0  ;;  %518 = vmatprep.subr.bf16.mxu1 %v554_v0 }
  0x1e   :  { %505 = vmatpush3.bf16.msra.mxu0 %v548_v23  ;;  %519 = vmatpush3.bf16.msra.mxu1 %v549_v25 }
  0x1f   :  { %506 = vmatprep.subr.bf16.mxu0 %v554_v0  ;;  %520 = vmatprep.subr.bf16.mxu1 %v554_v0 }
  0x22   :  { %507 = vmatpush3.bf16.msra.mxu0 %v550_v26  ;;  %521 = vmatpush3.bf16.msra.mxu1 %v551_v28 }
  0x23   :  { %508 = vmatprep.subr.bf16.mxu0 %v554_v0  ;;  %522 = vmatprep.subr.bf16.mxu1 %v554_v0 }
  0x26   :  { %509 = vmatpush3.bf16.msra.mxu0 %v240_v30  ;;  %523 = vmatpush3.bf16.msra.mxu1 %v326_v31 }
  0x29   :  { %511 = vmatmul.mubr.msk.bf16.vlgmr.msra.gmra.mrb[4].mxu0 %vm61_vm3, %v543_v17  ;;  %525 = vmatmul.mubr.msk.bf16.vlgmr.msra.gmra.mrb[4].mxu1 %vm61_vm3, %v543_v17 }
  0x87   :  { %v376_v42 = vpop.permute.xlu0 %375 }
  0x8b   :  { %v381_v56 = vpop.permute.xlu0 %380 }
  0xe8   :  { %v106_v32 = vpop.f32.mrb[0].mxu0  ;;  %v190_v33 = vpop.f32.mrb[0].mxu1 }
  0xe9   :  { %v484_v34 = vpop.f32.mrb[1].mxu0  ;;  %v197_v35 = vmax.f32 %v106_v32, %v190_v33  ;;  %v498_v36 = vpop.f32.mrb[1].mxu1 }
  0xea   :  { %v109_v37 = vpop.f32.mrb[2].mxu0  ;;  %v193_v38 = vpop.f32.mrb[2].mxu1 }
  0xeb   :  { %v485_v39 = vpop.f32.mrb[3].mxu0  ;;  %v198_v40 = vmax.f32 %v109_v37, %v193_v38  ;;  %v499_v41 = vpop.f32.mrb[3].mxu1 }
  0xfc   :  { %v276_v43 = vpop.f32.mrb[4].mxu0  ;;  %v362_v45 = vpop.f32.mrb[4].mxu1 }
  0xfd   :  { %v283_v44 = vmax.f32 %v197_v35, %v276_v43  ;;  %v512_v46 = vpop.f32.mrb[5].mxu0  ;;  %v526_v47 = vpop.f32.mrb[5].mxu1 }
  0xfe   :  { %v279_v48 = vpop.f32.mrb[6].mxu0  ;;  %v365_v51 = vpop.f32.mrb[6].mxu1 }
  0xff   :  { %v369_v49 = vmax.f32 %v283_v44, %v362_v45  ;;  %v284_v50 = vmax.f32 %v198_v40, %v279_v48  ;;  %v513_v52 = vpop.f32.mrb[7].mxu0  ;;  %v527_v53 = vpop.f32.mrb[7].mxu1 }
 0x101   :  { %v383_v54 = vadd.f32 %v376_v42, %v369_v49  ;;  %v370_v55 = vmax.f32 %v284_v50, %v365_v51 }
 0x103   :  { %v385_v57 = vmax.f32 %v383_v54, 0.0  ;;  %v384_v58 = vadd.f32 %v381_v56, %v370_v55 }
 0x105   :  { %387 = vst [vmem:[%s689_s3] sm:$0xff] %v385_v57  ;;  %v386_v59 = vmax.f32 %v384_v58, 0.0 }
 0x107   :  { %388 = vst [vmem:[%s689_s3 + $0x8] sm:$0xff] %v386_v59 }

// kernel: attention_forward.7
= control target key start
LH: loop header
LB: loop body
LE: loop exit
PB: predicated region body
PF: predicated region fallthrough
CT: control target
= control target key end

     0   :  { %v1809_v0 = vmov 0   ;;  %vm261_vm0 = vcmask 130048   ;;  %vm1307_vm1 = vcmask 261120   ;;  %s2276_s0 = inlined_call_operand.vmem [shape: bf16[4,400,32], index: 0, kind: input, shape index: {}]   ;;  %s2277_s1 = inlined_call_operand.vmem [shape: bf16[32,400], index: 1, kind: input, shape index: {}]   ;;  %s2278_s2 = inlined_call_operand.vmem [shape: f32[32,1], index: 2, kind: input, shape index: {}]   ;;  %s2279_s3 = inlined_call_operand.vmem [shape: f32[32,32], index: 3, kind: output, shape index: {}]  }
   0x1   :  { %317 = vmatprep.subr.bf16.mxu1 %v1809_v0  ;;  %v1697_v1 = vld [vmem:[%s2276_s0 + $0x40] sm:$0xff]   ;;  %1695 = vset.pattern.permute.xlu0 %v1809_v0  ;;  %v1700_v4 = vld [vmem:[%s2276_s0 + $0x48] sm:$0xff]   ;;  %v1703_v7 = vld [vmem:[%s2276_s0 + $0x50] sm:$0xff]  }
   0x2   :  { %v1698_v2 = vld [vmem:[%s2276_s0 + $0x80] sm:$0xff]   ;;  %1696 = vset.pattern.permute.xlu1 %v1809_v0  ;;  %1582 = vmatprep.subr.bf16.mxu0 %v1697_v1  ;;  %v1701_v5 = vld [vmem:[%s2276_s0 + $0x88] sm:$0xff]   ;;  %v1704_v8 = vld [vmem:[%s2276_s0 + $0x90] sm:$0xff]  }
   0x3   :  { %v1699_v3 = vld [vmem:[%s2276_s0] sm:$0xff]   ;;  %318 = vmatpush1.bf16.msra.mxu1 %v1698_v2  ;;  %v1702_v6 = vld [vmem:[%s2276_s0 + $0x8] sm:$0xff]   ;;  %v1705_v9 = vld [vmem:[%s2276_s0 + $0x10] sm:$0xff]  }
   0x4   :  { %1583 = vmatpush3.bf16.msra.mxu0 %v1699_v3  ;;  %319 = vmatprep.subr.bf16.mxu1 %v1809_v0  ;;  %v1706_v10 = vld [vmem:[%s2276_s0 + $0x58] sm:$0xff]   ;;  %v1709_v13 = vld [vmem:[%s2276_s0 + $0x60] sm:$0xff]   ;;  %v1712_v16 = vld [vmem:[%s2276_s0 + $0x68] sm:$0xff]  }
   0x5   :  { %1584 = vmatprep.subr.bf16.mxu0 %v1700_v4  ;;  %v1707_v11 = vld [vmem:[%s2276_s0 + $0x98] sm:$0xff]   ;;  %v1710_v14 = vld [vmem:[%s2276_s0 + $0xa0] sm:$0xff]   ;;  %v1713_v17 = vld [vmem:[%s2276_s0 + $0xa8] sm:$0xff]  }
   0x6   :  { %v1708_v12 = vld [vmem:[%s2276_s0 + $0x18] sm:$0xff]   ;;  %v1711_v15 = vld [vmem:[%s2276_s0 + $0x20] sm:$0xff]   ;;  %v1714_v18 = vld [vmem:[%s2276_s0 + $0x28] sm:$0xff]  }
   0x7   :  { %320 = vmatpush1.bf16.msra.mxu1 %v1701_v5  ;;  %v1715_v19 = vld [vmem:[%s2276_s0 + $0x70] sm:$0xff]   ;;  %v1718_v23 = vld [vmem:[%s2276_s0 + $0x78] sm:$0xff]   ;;  %v1728_v27 = vld [vmem:[%s2276_s0 + $0x108] sm:$0xff]  }
   0x8   :  { %1585 = vmatpush3.bf16.msra.mxu0 %v1702_v6  ;;  %321 = vmatprep.subr.bf16.mxu1 %v1809_v0  ;;  %v1716_v20 = vld [vmem:[%s2276_s0 + $0xb0] sm:$0xff]   ;;  %v1719_v24 = vld [vmem:[%s2276_s0 + $0xb8] sm:$0xff]   ;;  %v1724_v29 = vld [vmem:[%s2276_s0 + $0xc0] sm:$0xff]  }
   0x9   :  { %1586 = vmatprep.subr.bf16.mxu0 %v1703_v7  ;;  %v1717_v21 = vld [vmem:[%s2276_s0 + $0x30] sm:$0xff]   ;;  %v1917_v25 = vld [vmem:[%s2277_s1 + $0xc] ss:$16 sps:$4 sm:$0xff]   ;;  %v1946_v32 = vld [vmem:[%s2277_s1 + $0x8] ss:$16 sps:$4 sm:$0xff]  }
   0xa   :  { %v1905_v22 = vld [vmem:[%s2277_s1 + $0x4] ss:$16 sps:$4 sm:$0xff]   ;;  %v1720_v26 = vld [vmem:[%s2276_s0 + $0x38] sm:$0xff]   ;;  %1349 = vmatprep.mubr.msk.bf16.mxu1 %vm261_vm0, %v1917_v25  ;;  %v1931_v28 = vld [vmem:[%s2277_s1] ss:$16 sps:$4 sm:$0xff]  }
   0xb   :  { %322 = vmatpush1.bf16.msra.mxu1 %v1704_v8  ;;  %300 = vmatprep.mubr.bf16.mxu0 %v1905_v22  ;;  %v1730_v30 = vld [vmem:[%s2276_s0 + $0xc8] sm:$0xff]   ;;  %v1731_v31 = vld [vmem:[%s2276_s0 + $0x110] sm:$0xff]   ;;  %v1734_v35 = vld [vmem:[%s2276_s0 + $0x118] sm:$0xff]  }
   0xc   :  { %1587 = vmatpush3.bf16.msra.mxu0 %v1705_v9  ;;  %323 = vmatprep.subr.bf16.mxu1 %v1809_v0  ;;  %v1729_v33 = vld [vmem:[%s2276_s0 + $0x148] sm:$0xff]   ;;  %v1733_v34 = vld [vmem:[%s2276_s0 + $0xd0] sm:$0xff]   ;;  %v1736_v37 = vld [vmem:[%s2276_s0 + $0xd8] sm:$0xff]  }
   0xd   :  { %1588 = vmatprep.subr.bf16.mxu0 %v1706_v10  ;;  %v1732_v36 = vld [vmem:[%s2276_s0 + $0x150] sm:$0xff]   ;;  %v1737_v38 = vld [vmem:[%s2276_s0 + $0x120] sm:$0xff]   ;;  %v1735_v39 = vld [vmem:[%s2276_s0 + $0x158] sm:$0xff]  }
   0xe   :  { %v1739_v40 = vld [vmem:[%s2276_s0 + $0xe0] sm:$0xff]   ;;  %v1740_v42 = vld [vmem:[%s2276_s0 + $0x128] sm:$0xff]   ;;  %v1743_v47 = vld [vmem:[%s2276_s0 + $0x130] sm:$0xff]  }
   0xf   :  { %324 = vmatpush1.bf16.msra.mxu1 %v1707_v11  ;;  %v1738_v41 = vld [vmem:[%s2276_s0 + $0x160] sm:$0xff]   ;;  %v1996_v45 = vld [vmem:[%s2277_s1 + $0x2c] ss:$16 sps:$4 sm:$0xff]   ;;  %v2012_v48 = vld [vmem:[%s2277_s1 + $0x28] ss:$16 sps:$4 sm:$0xff]  }
  0x10   :  { %1589 = vmatpush3.bf16.msra.mxu0 %v1708_v12  ;;  %325 = vmatprep.subr.bf16.mxu1 %v1809_v0  ;;  %v1986_v43 = vld [vmem:[%s2277_s1 + $0x24] ss:$16 sps:$4 sm:$0xff]   ;;  %v1991_v44 = vld [vmem:[%s2277_s1 + $0x20] ss:$16 sps:$4 sm:$0xff]   ;;  %v1742_v46 = vld [vmem:[%s2276_s0 + $0xe8] sm:$0xff]  }
  0x11   :  { %1590 = vmatprep.subr.bf16.mxu0 %v1709_v13  ;;  %v1741_v49 = vld [vmem:[%s2276_s0 + $0x168] sm:$0xff]   ;;  %v1745_v50 = vld [vmem:[%s2276_s0 + $0xf0] sm:$0xff]   ;;  %v1751_v51 = vld [vmem:[%s2276_s0 + $0x138] sm:$0xff]  }
  0x12   :  { %v1744_v52 = vld [vmem:[%s2276_s0 + $0x170] sm:$0xff]   ;;  %v1754_v53 = vld [vmem:[%s2276_s0 + $0xf8] sm:$0xff]   ;;  %v1755_v54 = vld [vmem:[%s2276_s0 + $0x140] sm:$0xff]  }
  0x13   :  { %326 = vmatpush1.bf16.msra.mxu1 %v1710_v14  ;;  %v1752_v55 = vld [vmem:[%s2276_s0 + $0x178] sm:$0xff]   ;;  %v1757_v56 = vld [vmem:[%s2276_s0 + $0x100] sm:$0xff]   ;;  %v1759_v57 = vld [vmem:[%s2276_s0 + $0x1d0] sm:$0xff]  }
  0x14   :  { %1591 = vmatpush3.bf16.msra.mxu0 %v1711_v15  ;;  %327 = vmatprep.subr.bf16.mxu1 %v1809_v0  ;;  %v1756_v58 = vld [vmem:[%s2276_s0 + $0x180] sm:$0xff]   ;;  %v1761_v59 = vld [vmem:[%s2276_s0 + $0x190] sm:$0xff]   ;;  %v1762_v60 = vld [vmem:[%s2276_s0 + $0x1d8] sm:$0xff]  }
  0x15   :  { %1592 = vmatprep.subr.bf16.mxu0 %v1712_v16  ;;  %v1758_v61 = vld [vmem:[%s2276_s0 + $0x188] sm:$0xff]   ;;  %v1764_v62 = vld [vmem:[%s2276_s0 + $0x198] sm:$0xff]   ;;  %v1765_v63 = vld [vmem:[%s2276_s0 + $0x1e0] sm:$0xff]  }
  0x16   :  { %v1760_v1 = vld [vmem:[%s2276_s0 + $0x210] sm:$0xff]   ;;  %v1767_v2 = vld [vmem:[%s2276_s0 + $0x1a0] sm:$0xff]   ;;  %v1768_v3 = vld [vmem:[%s2276_s0 + $0x1e8] sm:$0xff]  }
  0x17   :  { %328 = vmatpush1.bf16.msra.mxu1 %v1713_v17  ;;  %v1763_v4 = vld [vmem:[%s2276_s0 + $0x218] sm:$0xff]   ;;  %v1770_v5 = vld [vmem:[%s2276_s0 + $0x1a8] sm:$0xff]   ;;  %v1771_v6 = vld [vmem:[%s2276_s0 + $0x1f0] sm:$0xff]  }
  0x18   :  { %1593 = vmatpush3.bf16.msra.mxu0 %v1714_v18  ;;  %329 = vmatprep.subr.bf16.mxu1 %v1809_v0  ;;  %v1766_v7 = vld [vmem:[%s2276_s0 + $0x220] sm:$0xff]   ;;  %v1773_v8 = vld [vmem:[%s2276_s0 + $0x1b0] sm:$0xff]   ;;  %v1774_v9 = vld [vmem:[%s2276_s0 + $0x1f8] sm:$0xff]  }
  0x19   :  { %1594 = vmatprep.subr.bf16.mxu0 %v1715_v19  ;;  %v1769_v10 = vld [vmem:[%s2276_s0 + $0x228] sm:$0xff]   ;;  %v1776_v11 = vld [vmem:[%s2276_s0 + $0x1b8] sm:$0xff]   ;;  %v1777_v12 = vld [vmem:[%s2276_s0 + $0x200] sm:$0xff]  }
  0x1a   :  { %v1772_v13 = vld [vmem:[%s2276_s0 + $0x230] sm:$0xff]   ;;  %v1779_v14 = vld [vmem:[%s2276_s0 + $0x1c0] sm:$0xff]   ;;  %v1780_v15 = vld [vmem:[%s2276_s0 + $0x208] sm:$0xff]  }
  0x1b   :  { %330 = vmatpush1.bf16.msra.mxu1 %v1716_v20  ;;  %v1775_v16 = vld [vmem:[%s2276_s0 + $0x238] sm:$0xff]   ;;  %v1782_v17 = vld [vmem:[%s2276_s0 + $0x1c8] sm:$0xff]   ;;  %v1778_v19 = vld [vmem:[%s2276_s0 + $0x240] sm:$0xff]  }
  0x1c   :  { %1595 = vmatpush3.bf16.msra.mxu0 %v1717_v21  ;;  %331 = vmatprep.subr.bf16.mxu1 %v1809_v0  ;;  %v1784_v18 = vld [vmem:[%s2276_s0 + $0x298] sm:$0xff]   ;;  %v1787_v21 = vld [vmem:[%s2276_s0 + $0x2a0] sm:$0xff]  }
  0x1d   :  { %1596 = vmatprep.subr.bf16.mxu0 %v1718_v23  ;;  %v1785_v20 = vld [vmem:[%s2276_s0 + $0x258] sm:$0xff]   ;;  %v1781_v23 = vld [vmem:[%s2276_s0 + $0x248] sm:$0xff]  }
  0x1f   :  { %332 = vmatpush1.bf16.msra.mxu1 %v1719_v24  ;;  %v1788_v24 = vld [vmem:[%s2276_s0 + $0x260] sm:$0xff]  }
  0x20   :  { %1597 = vmatpush3.bf16.msra.mxu0 %v1720_v26  ;;  %333 = vmatprep.subr.bf16.mxu1 %v1809_v0  ;;  %v1790_v26 = vld [vmem:[%s2276_s0 + $0x2a8] sm:$0xff]  }
  0x21   :  { %1610 = vmatprep.subr.bf16.mxu0 %v1728_v27  ;;  %v1783_v27 = vld [vmem:[%s2276_s0 + $0x250] sm:$0xff]  }
  0x23   :  { %301 = vmatmul.mubr.bf16.vlgmr.msra.gmra.mrb[0].mxu0 %v1931_v28  ;;  %334 = vmatpush1.bf16.msra.mxu1 %v1724_v29  ;;  %v1791_v29 = vld [vmem:[%s2276_s0 + $0x268] sm:$0xff]  }
  0x24   :  { %616 = vmatprep.subr.bf16.mxu1 %v1809_v0  ;;  %1611 = vmatpush3.bf16.msra.mxu0 %v1730_v30  ;;  %v1275_v30 = vld [vmem:[%s2278_s2] sm:$0xff] }
  0x25   :  { %1612 = vmatprep.subr.bf16.mxu0 %v1731_v31  ;;  %308 = vmatprep.mubr.bf16.mxu0 %v1986_v43  ;;  %v1277_v31 = vld [vmem:[%s2278_s2 + $0x10] sm:$0xff] }
  0x26   :  { %350 = vmatmul.mubr.bf16.vlgmr.msra.gmra.mrb[0].mxu1 %v1946_v32  ;;  %1281 = vperm.xlu0 %1695, %v1275_v30  }
  0x27   :  { %617 = vmatpush1.bf16.msra.mxu1 %v1729_v33  ;;  %1350 = vmatprep.mubr.msk.bf16.mxu1 %vm261_vm0, %v1996_v45  ;;  %v1793_v33 = vld [vmem:[%s2276_s0 + $0x2b0] sm:$0xff]  }
  0x28   :  { %618 = vmatprep.subr.bf16.mxu1 %v1809_v0  ;;  %1613 = vmatpush3.bf16.msra.mxu0 %v1733_v34  ;;  %v1786_v34 = vld [vmem:[%s2276_s0 + $0x2d8] sm:$0xff]  }
  0x29   :  { %1614 = vmatprep.subr.bf16.mxu0 %v1734_v35  ;;  %1291 = vperm.xlu1 %1696, %v1277_v31   ;;  %v1794_v35 = vld [vmem:[%s2276_s0 + $0x270] sm:$0xff]  }
  0x2b   :  { %619 = vmatpush1.bf16.msra.mxu1 %v1732_v36  ;;  %309 = vmatmul.mubr.bf16.gmra.mrb[4].mxu0 %v1991_v44  ;;  %v1276_v36 = vld [vmem:[%s2278_s2 + $0x8] sm:$0xff] }
  0x2c   :  { %620 = vmatprep.subr.bf16.mxu1 %v1809_v0  ;;  %1615 = vmatpush3.bf16.msra.mxu0 %v1736_v37  ;;  %v1796_v37 = vld [vmem:[%s2276_s0 + $0x2b8] sm:$0xff]  }
  0x2d   :  { %1616 = vmatprep.subr.bf16.mxu0 %v1737_v38  ;;  %599 = vmatprep.mubr.bf16.mxu0 %v1905_v22  ;;  %v1278_v38 = vld [vmem:[%s2278_s2 + $0x18] sm:$0xff] }
  0x2e   :  { %358 = vmatmul.mubr.bf16.gmra.mrb[4].mxu1 %v2012_v48  ;;  %1286 = vperm.xlu0 %1695, %v1276_v36  }
  0x2f   :  { %621 = vmatpush1.bf16.msra.mxu1 %v1735_v39  ;;  %1426 = vmatprep.mubr.msk.bf16.mxu1 %vm261_vm0, %v1917_v25  ;;  %v1797_v39 = vld [vmem:[%s2276_s0 + $0x278] sm:$0xff]  }
  0x30   :  { %622 = vmatprep.subr.bf16.mxu1 %v1809_v0  ;;  %1617 = vmatpush3.bf16.msra.mxu0 %v1739_v40  ;;  %v1799_v40 = vld [vmem:[%s2276_s0 + $0x2c0] sm:$0xff]  }
  0x31   :  { %1618 = vmatprep.subr.bf16.mxu0 %v1740_v42  ;;  %1296 = vperm.xlu1 %1696, %v1278_v38   ;;  %v1800_v42 = vld [vmem:[%s2276_s0 + $0x280] sm:$0xff]  }
  0x33   :  { %623 = vmatpush1.bf16.msra.mxu1 %v1738_v41  ;;  %v1792_v41 = vld [vmem:[%s2276_s0 + $0x2e8] sm:$0xff]  }
  0x34   :  { %624 = vmatprep.subr.bf16.mxu1 %v1809_v0  ;;  %1619 = vmatpush3.bf16.msra.mxu0 %v1742_v46  ;;  %v1802_v46 = vld [vmem:[%s2276_s0 + $0x2c8] sm:$0xff]  }
  0x35   :  { %1620 = vmatprep.subr.bf16.mxu0 %v1743_v47  ;;  %v1795_v47 = vld [vmem:[%s2276_s0 + $0x2f0] sm:$0xff]  }
  0x37   :  { %625 = vmatpush1.bf16.msra.mxu1 %v1741_v49  ;;  %v1803_v49 = vld [vmem:[%s2276_s0 + $0x288] sm:$0xff]  }
  0x38   :  { %626 = vmatprep.subr.bf16.mxu1 %v1809_v0  ;;  %1621 = vmatpush3.bf16.msra.mxu0 %v1745_v50  ;;  %v1805_v50 = vld [vmem:[%s2276_s0 + $0x2d0] sm:$0xff]  }
  0x39   :  { %1622 = vmatprep.subr.bf16.mxu0 %v1751_v51  ;;  %v1798_v51 = vld [vmem:[%s2276_s0 + $0x2f8] sm:$0xff]  }
  0x3b   :  { %627 = vmatpush1.bf16.msra.mxu1 %v1744_v52  ;;  %v1801_v52 = vld [vmem:[%s2276_s0 + $0x300] sm:$0xff]  }
  0x3c   :  { %628 = vmatprep.subr.bf16.mxu1 %v1809_v0  ;;  %1623 = vmatpush3.bf16.msra.mxu0 %v1754_v53  ;;  %v1804_v53 = vld [vmem:[%s2276_s0 + $0x308] sm:$0xff]  }
  0x3d   :  { %1624 = vmatprep.subr.bf16.mxu0 %v1755_v54  ;;  %v1807_v54 = vld [vmem:[%s2276_s0 + $0x310] sm:$0xff]  }
  0x3f   :  { %629 = vmatpush1.bf16.msra.mxu1 %v1752_v55  ;;  %v1808_v55 = vld [vmem:[%s2276_s0 + $0x318] sm:$0xff]  }
  0x40   :  { %630 = vmatprep.subr.bf16.mxu1 %v1809_v0  ;;  %1625 = vmatpush3.bf16.msra.mxu0 %v1757_v56 }
  0x41   :  { %1638 = vmatprep.subr.bf16.mxu0 %v1759_v57 }
  0x43   :  { %631 = vmatpush1.bf16.msra.mxu1 %v1756_v58  ;;  %600 = vmatmul.mubr.bf16.vlgmr.msra.gmra.mrb[8].mxu0 %v1931_v28 }
  0x44   :  { %632 = vmatprep.subr.bf16.mxu1 %v1809_v0  ;;  %1639 = vmatpush3.bf16.msra.mxu0 %v1761_v59 }
  0x45   :  { %607 = vmatprep.mubr.bf16.mxu0 %v1986_v43  ;;  %1640 = vmatprep.subr.bf16.mxu0 %v1762_v60 }
  0x47   :  { %633 = vmatpush1.bf16.msra.mxu1 %v1758_v61 }
  0x48   :  { %919 = vmatprep.subr.bf16.mxu1 %v1809_v0  ;;  %1641 = vmatpush3.bf16.msra.mxu0 %v1764_v62 }
  0x49   :  { %1642 = vmatprep.subr.bf16.mxu0 %v1765_v63 }
  0x4a   :  { %649 = vmatmul.mubr.bf16.vlgmr.msra.gmra.mrb[8].mxu1 %v1946_v32 }
  0x4b   :  { %920 = vmatpush1.bf16.msra.mxu1 %v1760_v1  ;;  %608 = vmatmul.mubr.bf16.gmra.mrb[12].mxu0 %v1991_v44 }
  0x4c   :  { %921 = vmatprep.subr.bf16.mxu1 %v1809_v0  ;;  %1427 = vmatprep.mubr.msk.bf16.mxu1 %vm261_vm0, %v1996_v45 }
  0x4d   :  { %1643 = vmatpush3.bf16.msra.mxu0 %v1767_v2  ;;  %902 = vmatprep.mubr.bf16.mxu0 %v1905_v22 }
  0x4e   :  { %1644 = vmatprep.subr.bf16.mxu0 %v1768_v3 }
  0x4f   :  { %922 = vmatpush1.bf16.msra.mxu1 %v1763_v4 }
  0x50   :  { %923 = vmatprep.subr.bf16.mxu1 %v1809_v0 }
  0x51   :  { %1645 = vmatpush3.bf16.msra.mxu0 %v1770_v5 }
  0x52   :  { %657 = vmatmul.mubr.bf16.gmra.mrb[12].mxu1 %v2012_v48  ;;  %1646 = vmatprep.subr.bf16.mxu0 %v1771_v6 }
  0x53   :  { %924 = vmatpush1.bf16.msra.mxu1 %v1766_v7  ;;  %1503 = vmatprep.mubr.msk.bf16.mxu1 %vm261_vm0, %v1917_v25 }
  0x54   :  { %925 = vmatprep.subr.bf16.mxu1 %v1809_v0 }
  0x55   :  { %1647 = vmatpush3.bf16.msra.mxu0 %v1773_v8 }
  0x56   :  { %1648 = vmatprep.subr.bf16.mxu0 %v1774_v9 }
  0x57   :  { %926 = vmatpush1.bf16.msra.mxu1 %v1769_v10 }
  0x58   :  { %927 = vmatprep.subr.bf16.mxu1 %v1809_v0 }
  0x59   :  { %1649 = vmatpush3.bf16.msra.mxu0 %v1776_v11 }
  0x5a   :  { %1650 = vmatprep.subr.bf16.mxu0 %v1777_v12 }
  0x5b   :  { %928 = vmatpush1.bf16.msra.mxu1 %v1772_v13 }
  0x5c   :  { %929 = vmatprep.subr.bf16.mxu1 %v1809_v0 }
  0x5d   :  { %1651 = vmatpush3.bf16.msra.mxu0 %v1779_v14 }
  0x5e   :  { %1652 = vmatprep.subr.bf16.mxu0 %v1780_v15 }
  0x5f   :  { %930 = vmatpush1.bf16.msra.mxu1 %v1775_v16 }
  0x60   :  { %931 = vmatprep.subr.bf16.mxu1 %v1809_v0 }
  0x61   :  { %1653 = vmatpush3.bf16.msra.mxu0 %v1782_v17 }
  0x62   :  { %1666 = vmatprep.subr.bf16.mxu0 %v1784_v18 }
  0x63   :  { %932 = vmatpush1.bf16.msra.mxu1 %v1778_v19 }
  0x64   :  { %933 = vmatprep.subr.bf16.mxu1 %v1809_v0  ;;  %903 = vmatmul.mubr.bf16.vlgmr.msra.gmra.mrb[16].mxu0 %v1931_v28 }
  0x65   :  { %1667 = vmatpush3.bf16.msra.mxu0 %v1785_v20  ;;  %910 = vmatprep.mubr.bf16.mxu0 %v1986_v43 }
  0x66   :  { %1668 = vmatprep.subr.bf16.mxu0 %v1787_v21 }
  0x67   :  { %934 = vmatpush1.bf16.msra.mxu1 %v1781_v23 }
  0x68   :  { %935 = vmatprep.subr.bf16.mxu1 %v1809_v0 }
  0x69   :  { %1669 = vmatpush3.bf16.msra.mxu0 %v1788_v24 }
  0x6a   :  { %1670 = vmatprep.subr.bf16.mxu0 %v1790_v26 }
  0x6b   :  { %936 = vmatpush1.bf16.msra.mxu1 %v1783_v27 }
  0x6c   :  { %1222 = vmatprep.subr.bf16.mxu1 %v1809_v0  ;;  %911 = vmatmul.mubr.bf16.gmra.mrb[20].mxu0 %v1991_v44 }
  0x6d   :  { %1671 = vmatpush3.bf16.msra.mxu0 %v1791_v29  ;;  %1205 = vmatprep.mubr.bf16.mxu0 %v1905_v22  ;;  %v1789_v22 = vld [vmem:[%s2276_s0 + $0x2e0] sm:$0xff]  }
  0x6e   :  { %952 = vmatmul.mubr.bf16.vlgmr.msra.gmra.mrb[16].mxu1 %v1946_v32  ;;  %1672 = vmatprep.subr.bf16.mxu0 %v1793_v33 }
  0x6f   :  { %1223 = vmatpush1.bf16.msra.mxu1 %v1786_v34  ;;  %1504 = vmatprep.mubr.msk.bf16.mxu1 %vm261_vm0, %v1996_v45 }
  0x70   :  { %1224 = vmatprep.subr.bf16.mxu1 %v1809_v0 }
  0x71   :  { %1673 = vmatpush3.bf16.msra.mxu0 %v1794_v35 }
  0x72   :  { %1674 = vmatprep.subr.bf16.mxu0 %v1796_v37 }
  0x73   :  { %1225 = vmatpush1.bf16.msra.mxu1 %v1789_v22 }
  0x74   :  { %1226 = vmatprep.subr.bf16.mxu1 %v1809_v0 }
  0x75   :  { %1675 = vmatpush3.bf16.msra.mxu0 %v1797_v39 }
  0x76   :  { %960 = vmatmul.mubr.bf16.gmra.mrb[20].mxu1 %v2012_v48  ;;  %1676 = vmatprep.subr.bf16.mxu0 %v1799_v40 }
  0x77   :  { %1227 = vmatpush1.bf16.msra.mxu1 %v1792_v41  ;;  %1580 = vmatprep.mubr.msk.bf16.mxu1 %vm261_vm0, %v1917_v25  ;;  %v1806_v25 = vld [vmem:[%s2276_s0 + $0x290] sm:$0xff]  }
  0x78   :  { %1228 = vmatprep.subr.bf16.mxu1 %v1809_v0 }
  0x79   :  { %1677 = vmatpush3.bf16.msra.mxu0 %v1800_v42 }
  0x7a   :  { %1678 = vmatprep.subr.bf16.mxu0 %v1802_v46 }
  0x7b   :  { %1229 = vmatpush1.bf16.msra.mxu1 %v1795_v47 }
  0x7c   :  { %1230 = vmatprep.subr.bf16.mxu1 %v1809_v0 }
  0x7d   :  { %1679 = vmatpush3.bf16.msra.mxu0 %v1803_v49 }
  0x7e   :  { %1680 = vmatprep.subr.bf16.mxu0 %v1805_v50 }
  0x7f   :  { %1231 = vmatpush1.bf16.msra.mxu1 %v1798_v51 }
  0x80   :  { %1232 = vmatprep.subr.bf16.mxu1 %v1809_v0 }
  0x81   :  { %1681 = vmatpush3.bf16.msra.mxu0 %v1806_v25 }
  0x83   :  { %1233 = vmatpush1.bf16.msra.mxu1 %v1801_v52 }
  0x84   :  { %1234 = vmatprep.subr.bf16.mxu1 %v1809_v0  ;;  %1206 = vmatmul.mubr.bf16.vlgmr.msra.gmra.mrb[24].mxu0 %v1931_v28 }
  0x85   :  { %1213 = vmatprep.mubr.bf16.mxu0 %v1986_v43 }
  0x87   :  { %1235 = vmatpush1.bf16.msra.mxu1 %v1804_v53 }
  0x88   :  { %1236 = vmatprep.subr.bf16.mxu1 %v1809_v0 }
  0x8b   :  { %1237 = vmatpush1.bf16.msra.mxu1 %v1807_v54 }
  0x8c   :  { %1238 = vmatprep.subr.bf16.mxu1 %v1809_v0  ;;  %1214 = vmatmul.mubr.bf16.gmra.mrb[28].mxu0 %v1991_v44 }
  0x8f   :  { %1239 = vmatpush1.bf16.msra.mxu1 %v1808_v55 }
  0x92   :  { %1255 = vmatmul.mubr.bf16.vlgmr.msra.gmra.mrb[24].mxu1 %v1946_v32 }
  0x93   :  { %1581 = vmatprep.mubr.msk.bf16.mxu1 %vm261_vm0, %v1996_v45 }
  0x9a   :  { %1263 = vmatmul.mubr.bf16.gmra.mrb[28].mxu1 %v2012_v48 }
  0xf6   :  { %v1598_v28 = vpop.f32.mrb[0].mxu0 }
  0xf7   :  { %v1599_v43 = vpop.f32.mrb[1].mxu0 }
  0xf8   :  { %v1600_v56 = vadd.f32 %v1599_v43, %v1598_v28  ;;  %v1601_v57 = vpop.f32.mrb[2].mxu0 }
  0xf9   :  { %v1602_v58 = vpop.f32.mrb[3].mxu0  ;;  %v351_v59 = vpop.f32.mrb[0].mxu1 }
  0xfa   :  { %v1603_v60 = vadd.f32 %v1602_v58, %v1601_v57  ;;  %v352_v61 = vadd.f32 %v1600_v56, %v351_v59  ;;  %v353_v62 = vpop.f32.mrb[1].mxu1 }
  0xfb   :  { %v354_v0 = vpop.f32.mrb[2].mxu1 }
  0xfc   :  { %v355_v63 = vadd.f32 %v1603_v60, %v354_v0  ;;  %v356_v44 = vpop.f32.mrb[3].mxu1 }
  0xfe   :  { %v1604_v1 = vpop.f32.mrb[4].mxu0 }
  0xff   :  { %v1605_v2 = vpop.f32.mrb[5].mxu0 }
 0x100   :  { %v1606_v32 = vadd.f32 %v1605_v2, %v1604_v1  ;;  %v1607_v3 = vpop.f32.mrb[6].mxu0 }
 0x101   :  { %v359_v4 = vpop.f32.mrb[4].mxu1  ;;  %v1608_v45 = vpop.f32.mrb[7].mxu0 }
 0x102   :  { %v360_v5 = vadd.f32 %v1606_v32, %v359_v4  ;;  %v1609_v48 = vadd.f32 %v1608_v45, %v1607_v3  ;;  %v361_v6 = vpop.f32.mrb[5].mxu1 }
 0x103   :  { %v362_v7 = vpop.f32.mrb[6].mxu1 }
 0x104   :  { %v363_v8 = vadd.f32 %v1609_v48, %v362_v7  ;;  %v364_v9 = vpop.f32.mrb[7].mxu1 }
 0x116   :  { %v1626_v10 = vpop.f32.mrb[8].mxu0 }
 0x117   :  { %v1627_v11 = vpop.f32.mrb[9].mxu0 }
 0x118   :  { %v1628_v12 = vadd.f32 %v1627_v11, %v1626_v10  ;;  %v1629_v13 = vpop.f32.mrb[10].mxu0 }
 0x119   :  { %v1630_v14 = vpop.f32.mrb[11].mxu0 }
 0x11a   :  { %v1631_v15 = vadd.f32 %v1630_v14, %v1629_v13  ;;  %v1282_v13 = vpop.permute.xlu0 %1281 }
 0x11d   :  { %v650_v16 = vpop.f32.mrb[8].mxu1 }
 0x11e   :  { %v651_v17 = vadd.f32 %v1628_v12, %v650_v16  ;;  %v652_v18 = vpop.f32.mrb[9].mxu1  ;;  %v1632_v19 = vpop.f32.mrb[12].mxu0 }
 0x11f   :  { %v653_v20 = vpop.f32.mrb[10].mxu1  ;;  %v1633_v21 = vpop.f32.mrb[13].mxu0 }
 0x120   :  { %v665_v23 = vmax.f32 %v352_v61, %v651_v17  ;;  %v654_v24 = vadd.f32 %v1631_v15, %v653_v20  ;;  %v655_v26 = vpop.f32.mrb[11].mxu1  ;;  %v1634_v27 = vadd.f32 %v1633_v21, %v1632_v19  ;;  %v1635_v29 = vpop.f32.mrb[14].mxu0 }
 0x121   :  { %v1636_v30 = vpop.f32.mrb[15].mxu0 }
 0x122   :  { %v666_v31 = vmax.f32 %v355_v63, %v654_v24  ;;  %v1637_v33 = vadd.f32 %v1636_v30, %v1635_v29  ;;  %v1292_v30 = vpop.permute.xlu1 %1291 }
 0x125   :  { %v658_v34 = vpop.f32.mrb[12].mxu1 }
 0x126   :  { %v659_v35 = vadd.f32 %v1634_v27, %v658_v34  ;;  %v660_v36 = vpop.f32.mrb[13].mxu1 }
 0x127   :  { %v661_v37 = vpop.f32.mrb[14].mxu1 }
 0x128   :  { %v667_v38 = vmax.f32 %v360_v5, %v659_v35  ;;  %v662_v22 = vadd.f32 %v1637_v33, %v661_v37  ;;  %v663_v39 = vpop.f32.mrb[15].mxu1 }
 0x12a   :  { %v668_v40 = vmax.f32 %v363_v8, %v662_v22 }
 0x137   :  { %v1654_v41 = vpop.f32.mrb[16].mxu0 }
 0x138   :  { %v1655_v42 = vpop.f32.mrb[17].mxu0 }
 0x139   :  { %v1656_v46 = vadd.f32 %v1655_v42, %v1654_v41  ;;  %v1657_v47 = vpop.f32.mrb[18].mxu0  ;;  %v1297_v41 = vpop.permute.xlu1 %1296 }
 0x13a   :  { %v1658_v49 = vpop.f32.mrb[19].mxu0 }
 0x13b   :  { %v1659_v50 = vadd.f32 %v1658_v49, %v1657_v47 }
 0x13f   :  { %v1660_v51 = vpop.f32.mrb[20].mxu0 }
 0x140   :  { %v1661_v25 = vpop.f32.mrb[21].mxu0 }
 0x141   :  { %v953_v52 = vpop.f32.mrb[16].mxu1  ;;  %v1662_v53 = vadd.f32 %v1661_v25, %v1660_v51  ;;  %v1663_v54 = vpop.f32.mrb[22].mxu0 }
 0x142   :  { %v954_v55 = vadd.f32 %v1656_v46, %v953_v52  ;;  %v955_v28 = vpop.f32.mrb[17].mxu1  ;;  %v1664_v43 = vpop.f32.mrb[23].mxu0 }
 0x143   :  { %v956_v56 = vpop.f32.mrb[18].mxu1  ;;  %v1665_v57 = vadd.f32 %v1664_v43, %v1663_v54 }
 0x144   :  { %v968_v58 = vmax.f32 %v665_v23, %v954_v55  ;;  %v957_v59 = vadd.f32 %v1659_v50, %v956_v56  ;;  %v958_v60 = vpop.f32.mrb[19].mxu1  ;;  %v1287_v23 = vpop.permute.xlu0 %1286 }
 0x146   :  { %v969_v61 = vmax.f32 %v666_v31, %v957_v59 }
 0x149   :  { %v961_v62 = vpop.f32.mrb[20].mxu1 }
 0x14a   :  { %v962_v0 = vadd.f32 %v1662_v53, %v961_v62  ;;  %v963_v63 = vpop.f32.mrb[21].mxu1 }
 0x14b   :  { %v964_v44 = vpop.f32.mrb[22].mxu1 }
 0x14c   :  { %v970_v1 = vmax.f32 %v667_v38, %v962_v0  ;;  %v965_v2 = vadd.f32 %v1665_v57, %v964_v44  ;;  %v966_v32 = vpop.f32.mrb[23].mxu1 }
 0x14e   :  { %v971_v3 = vmax.f32 %v668_v40, %v965_v2 }
 0x157   :  { %v1682_v4 = vpop.f32.mrb[24].mxu0 }
 0x158   :  { %v1683_v45 = vpop.f32.mrb[25].mxu0 }
 0x159   :  { %v1684_v5 = vadd.f32 %v1683_v45, %v1682_v4  ;;  %v1685_v48 = vpop.f32.mrb[26].mxu0 }
 0x15a   :  { %v1686_v6 = vpop.f32.mrb[27].mxu0 }
 0x15b   :  { %v1687_v7 = vadd.f32 %v1686_v6, %v1685_v48 }
 0x15f   :  { %v1688_v8 = vpop.f32.mrb[28].mxu0 }
 0x160   :  { %v1689_v9 = vpop.f32.mrb[29].mxu0 }
 0x161   :  { %v1690_v10 = vadd.f32 %v1689_v9, %v1688_v8  ;;  %v1691_v11 = vpop.f32.mrb[30].mxu0 }
 0x162   :  { %v1692_v12 = vpop.f32.mrb[31].mxu0 }
 0x163   :  { %v1693_v14 = vadd.f32 %v1692_v12, %v1691_v11 }
 0x165   :  { %v1256_v15 = vpop.f32.mrb[24].mxu1 }
 0x166   :  { %v1257_v16 = vadd.f32 %v1684_v5, %v1256_v15  ;;  %v1258_v17 = vpop.f32.mrb[25].mxu1 }
 0x167   :  { %v1259_v18 = vpop.f32.mrb[26].mxu1 }
 0x168   :  { %v1271_v19 = vmax.f32 %v968_v58, %v1257_v16  ;;  %v1260_v20 = vadd.f32 %v1687_v7, %v1259_v18  ;;  %v1261_v21 = vpop.f32.mrb[27].mxu1 }
 0x16a   :  { %v1299_v24 = vadd.f32 %v1282_v13, %v1271_v19  ;;  %v1272_v26 = vmax.f32 %v969_v61, %v1260_v20 }
 0x16c   :  { %v1303_v27 = vmax.f32 %v1299_v24, 0.0  ;;  %v1300_v29 = vadd.f32 %v1287_v23, %v1272_v26 }
 0x16d   :  { %v1264_v31 = vpop.f32.mrb[28].mxu1 }
 0x16e   :  { %1308 = vst.msk [vmem:[%s2279_s3] sm:$0xff] %vm1307_vm1, %v1303_v27  ;;  %v1304_v33 = vmax.f32 %v1300_v29, 0.0  ;;  %v1265_v34 = vadd.f32 %v1690_v10, %v1264_v31  ;;  %v1266_v35 = vpop.f32.mrb[29].mxu1 }
 0x16f   :  { %v1267_v36 = vpop.f32.mrb[30].mxu1 }
 0x170   :  { %1309 = vst.msk [vmem:[%s2279_s3 + $0x8] sm:$0xff] %vm1307_vm1, %v1304_v33  ;;  %v1273_v37 = vmax.f32 %v970_v1, %v1265_v34  ;;  %v1268_v38 = vadd.f32 %v1693_v14, %v1267_v36  ;;  %v1269_v22 = vpop.f32.mrb[31].mxu1 }
 0x172   :  { %v1301_v39 = vadd.f32 %v1292_v30, %v1273_v37  ;;  %v1274_v40 = vmax.f32 %v971_v3, %v1268_v38 }
 0x174   :  { %v1305_v42 = vmax.f32 %v1301_v39, 0.0  ;;  %v1302_v46 = vadd.f32 %v1297_v41, %v1274_v40 }
 0x176   :  { %1310 = vst.msk [vmem:[%s2279_s3 + $0x10] sm:$0xff] %vm1307_vm1, %v1305_v42  ;;  %v1306_v47 = vmax.f32 %v1302_v46, 0.0 }
 0x178   :  { %1311 = vst.msk [vmem:[%s2279_s3 + $0x18] sm:$0xff] %vm1307_vm1, %v1306_v47 }

// kernel: attention_forward.8
= control target key start
LH: loop header
LB: loop body
LE: loop exit
PB: predicated region body
PF: predicated region fallthrough
CT: control target
= control target key end

     0   :  { %vm587_vm0 = vcmask 261120   ;;  %vm2931_vm1 = vcmask 64512   ;;  %s5523_s0 = inlined_call_operand.vmem [shape: bf16[4,800,8], index: 0, kind: input, shape index: {}]   ;;  %s5524_s1 = inlined_call_operand.vmem [shape: bf16[64,800], index: 1, kind: input, shape index: {}]   ;;  %s5525_s2 = inlined_call_operand.vmem [shape: f32[64,1], index: 2, kind: input, shape index: {}]   ;;  %s5526_s3 = inlined_call_operand.vmem [shape: f32[64,8], index: 3, kind: output, shape index: {}]  }
   0x1   :  { %v4059_v0 = vld [vmem:[%s5523_s0 + $0x40] sm:$0xff]   ;;  %v4063_v4 = vld [vmem:[%s5523_s0 + $0x48] sm:$0xff]   ;;  %v4067_v8 = vld [vmem:[%s5523_s0 + $0x50] sm:$0xff]  }
   0x2   :  { %v4060_v1 = vld [vmem:[%s5523_s0 + $0xc0] sm:$0xff]   ;;  %3488 = vmatprep.subr.bf16.mxu0 %v4059_v0  ;;  %v4064_v5 = vld [vmem:[%s5523_s0 + $0xc8] sm:$0xff]   ;;  %v4068_v9 = vld [vmem:[%s5523_s0 + $0xd0] sm:$0xff]  }
   0x3   :  { %v4061_v2 = vld [vmem:[%s5523_s0] sm:$0xff]   ;;  %3528 = vmatprep.subr.bf16.mxu1 %v4060_v1  ;;  %v4065_v6 = vld [vmem:[%s5523_s0 + $0x8] sm:$0xff]   ;;  %v4069_v10 = vld [vmem:[%s5523_s0 + $0x10] sm:$0xff]  }
   0x4   :  { %v4062_v3 = vld [vmem:[%s5523_s0 + $0x80] sm:$0xff]   ;;  %3489 = vmatpush3.bf16.msra.mxu0 %v4061_v2  ;;  %v4066_v7 = vld [vmem:[%s5523_s0 + $0x88] sm:$0xff]   ;;  %v4070_v11 = vld [vmem:[%s5523_s0 + $0x90] sm:$0xff]  }
   0x5   :  { %3529 = vmatpush3.bf16.msra.mxu1 %v4062_v3  ;;  %3490 = vmatprep.subr.bf16.mxu0 %v4063_v4  ;;  %v4071_v12 = vld [vmem:[%s5523_s0 + $0x58] sm:$0xff]   ;;  %v4075_v16 = vld [vmem:[%s5523_s0 + $0x60] sm:$0xff]   ;;  %v4079_v20 = vld [vmem:[%s5523_s0 + $0x68] sm:$0xff]  }
   0x6   :  { %3530 = vmatprep.subr.bf16.mxu1 %v4064_v5  ;;  %v4072_v13 = vld [vmem:[%s5523_s0 + $0xd8] sm:$0xff]   ;;  %v4076_v17 = vld [vmem:[%s5523_s0 + $0xe0] sm:$0xff]   ;;  %v4080_v21 = vld [vmem:[%s5523_s0 + $0xe8] sm:$0xff]  }
   0x7   :  { %v4073_v14 = vld [vmem:[%s5523_s0 + $0x18] sm:$0xff]   ;;  %v4077_v18 = vld [vmem:[%s5523_s0 + $0x20] sm:$0xff]   ;;  %v4081_v22 = vld [vmem:[%s5523_s0 + $0x28] sm:$0xff]  }
   0x8   :  { %3491 = vmatpush3.bf16.msra.mxu0 %v4065_v6  ;;  %v4074_v15 = vld [vmem:[%s5523_s0 + $0x98] sm:$0xff]   ;;  %v4078_v19 = vld [vmem:[%s5523_s0 + $0xa0] sm:$0xff]   ;;  %v4082_v23 = vld [vmem:[%s5523_s0 + $0xa8] sm:$0xff]  }
   0x9   :  { %3531 = vmatpush3.bf16.msra.mxu1 %v4066_v7  ;;  %3492 = vmatprep.subr.bf16.mxu0 %v4067_v8  ;;  %v4083_v24 = vld [vmem:[%s5523_s0 + $0x70] sm:$0xff]   ;;  %v4087_v28 = vld [vmem:[%s5523_s0 + $0x78] sm:$0xff]   ;;  %v4447_v32 = vld [vmem:[%s5524_s1 + $0x4] ss:$28 sps:$4 sm:$0xff]  }
   0xa   :  { %3532 = vmatprep.subr.bf16.mxu1 %v4068_v9  ;;  %v4084_v25 = vld [vmem:[%s5523_s0 + $0xf0] sm:$0xff]   ;;  %v4088_v29 = vld [vmem:[%s5523_s0 + $0xf8] sm:$0xff]   ;;  %v4452_v33 = vld [vmem:[%s5524_s1 + $0xc] ss:$28 sps:$4 sm:$0xff]   ;;  %632 = vmatprep.mubr.bf16.mxu0 %v4447_v32 }
   0xb   :  { %v4085_v26 = vld [vmem:[%s5523_s0 + $0x30] sm:$0xff]   ;;  %v4089_v30 = vld [vmem:[%s5523_s0 + $0x38] sm:$0xff]   ;;  %v4463_v35 = vld [vmem:[%s5524_s1 + $0x8] ss:$28 sps:$4 sm:$0xff]   ;;  %697 = vmatprep.mubr.bf16.mxu1 %v4452_v33 }
   0xc   :  { %3493 = vmatpush3.bf16.msra.mxu0 %v4069_v10  ;;  %v4086_v27 = vld [vmem:[%s5523_s0 + $0xb0] sm:$0xff]   ;;  %v4090_v31 = vld [vmem:[%s5523_s0 + $0xb8] sm:$0xff]   ;;  %v4097_v36 = vld [vmem:[%s5523_s0 + $0x140] sm:$0xff]  }
   0xd   :  { %3533 = vmatpush3.bf16.msra.mxu1 %v4070_v11  ;;  %3494 = vmatprep.subr.bf16.mxu0 %v4071_v12  ;;  %v4458_v34 = vld [vmem:[%s5524_s1] ss:$28 sps:$4 sm:$0xff]   ;;  %v4099_v38 = vld [vmem:[%s5523_s0 + $0x148] sm:$0xff]   ;;  %v4497_v43 = vld [vmem:[%s5524_s1 + $0x38] ss:$28 sps:$4 sm:$0xff]  }
   0xe   :  { %3534 = vmatprep.subr.bf16.mxu1 %v4072_v13  ;;  %v4098_v37 = vld [vmem:[%s5523_s0 + $0x100] sm:$0xff]   ;;  %v4100_v39 = vld [vmem:[%s5523_s0 + $0x108] sm:$0xff]   ;;  %v4483_v40 = vld [vmem:[%s5524_s1 + $0x3c] ss:$28 sps:$4 sm:$0xff]  }
   0xf   :  { %v4488_v41 = vld [vmem:[%s5524_s1 + $0x44] ss:$28 sps:$4 sm:$0xff]   ;;  %v4108_v45 = vld [vmem:[%s5523_s0 + $0x150] sm:$0xff]   ;;  %v4110_v47 = vld [vmem:[%s5523_s0 + $0x158] sm:$0xff]  }
  0x10   :  { %3495 = vmatpush3.bf16.msra.mxu0 %v4073_v14  ;;  %v4105_v42 = vld [vmem:[%s5523_s0 + $0x180] sm:$0xff]   ;;  %v4109_v46 = vld [vmem:[%s5523_s0 + $0x110] sm:$0xff]   ;;  %v4111_v48 = vld [vmem:[%s5523_s0 + $0x118] sm:$0xff]  }
  0x11   :  { %3535 = vmatpush3.bf16.msra.mxu1 %v4074_v15  ;;  %3496 = vmatprep.subr.bf16.mxu0 %v4075_v16  ;;  %v4503_v44 = vld [vmem:[%s5524_s1 + $0x40] ss:$28 sps:$4 sm:$0xff]   ;;  %v4522_v49 = vld [vmem:[%s5524_s1 + $0x74] ss:$28 sps:$4 sm:$0xff]   ;;  %v4120_v55 = vld [vmem:[%s5523_s0 + $0x168] sm:$0xff]  }
  0x12   :  { %3536 = vmatprep.subr.bf16.mxu1 %v4076_v17  ;;  %v4527_v50 = vld [vmem:[%s5524_s1 + $0x7c] ss:$28 sps:$4 sm:$0xff]   ;;  %v4532_v51 = vld [vmem:[%s5524_s1 + $0x70] ss:$28 sps:$4 sm:$0xff]   ;;  %v4118_v53 = vld [vmem:[%s5523_s0 + $0x160] sm:$0xff]  }
  0x13   :  { %v4537_v52 = vld [vmem:[%s5524_s1 + $0x78] ss:$28 sps:$4 sm:$0xff]   ;;  %v4119_v54 = vld [vmem:[%s5523_s0 + $0x120] sm:$0xff]   ;;  %v4121_v56 = vld [vmem:[%s5523_s0 + $0x128] sm:$0xff]  }
  0x14   :  { %3497 = vmatpush3.bf16.msra.mxu0 %v4077_v18  ;;  %v4558_v57 = vld [vmem:[%s5524_s1 + $0xac] ss:$28 sps:$4 sm:$0xff]   ;;  %v4563_v58 = vld [vmem:[%s5524_s1 + $0xb4] ss:$28 sps:$4 sm:$0xff]   ;;  %v4131_v0 = vld [vmem:[%s5523_s0 + $0x178] sm:$0xff]  }
  0x15   :  { %3537 = vmatpush3.bf16.msra.mxu1 %v4078_v19  ;;  %3498 = vmatprep.subr.bf16.mxu0 %v4079_v20  ;;  %v4126_v59 = vld [vmem:[%s5523_s0 + $0x188] sm:$0xff]   ;;  %v4129_v62 = vld [vmem:[%s5523_s0 + $0x170] sm:$0xff]   ;;  %v4132_v1 = vld [vmem:[%s5523_s0 + $0x138] sm:$0xff]  }
  0x16   :  { %3538 = vmatprep.subr.bf16.mxu1 %v4080_v21  ;;  %v4573_v60 = vld [vmem:[%s5524_s1 + $0xa8] ss:$28 sps:$4 sm:$0xff]   ;;  %v4578_v61 = vld [vmem:[%s5524_s1 + $0xb0] ss:$28 sps:$4 sm:$0xff]   ;;  %v4602_v3 = vld [vmem:[%s5524_s1 + $0x18] ss:$28 sps:$4 sm:$0xff]  }
  0x17   :  { %v4130_v63 = vld [vmem:[%s5523_s0 + $0x130] sm:$0xff]   ;;  %v4142_v10 = vld [vmem:[%s5523_s0 + $0x258] sm:$0xff]   ;;  %v4647_v14 = vld [vmem:[%s5524_s1 + $0x4c] ss:$28 sps:$4 sm:$0xff]  }
  0x18   :  { %3499 = vmatpush3.bf16.msra.mxu0 %v4081_v22  ;;  %v4597_v2 = vld [vmem:[%s5524_s1 + $0x14] ss:$28 sps:$4 sm:$0xff]   ;;  %v4143_v11 = vld [vmem:[%s5523_s0 + $0x1d8] sm:$0xff]   ;;  %v4148_v15 = vld [vmem:[%s5523_s0 + $0x260] sm:$0xff]  }
  0x19   :  { %3539 = vmatpush3.bf16.msra.mxu1 %v4082_v23  ;;  %3500 = vmatprep.subr.bf16.mxu0 %v4083_v24  ;;  %v4607_v4 = vld [vmem:[%s5524_s1 + $0x10] ss:$28 sps:$4 sm:$0xff]   ;;  %v4144_v12 = vld [vmem:[%s5523_s0 + $0x218] sm:$0xff]   ;;  %v4656_v16 = vld [vmem:[%s5524_s1 + $0x48] ss:$28 sps:$4 sm:$0xff]  }
  0x1a   :  { %3540 = vmatprep.subr.bf16.mxu1 %v4084_v25  ;;  %v4137_v5 = vld [vmem:[%s5523_s0 + $0x250] sm:$0xff]   ;;  %v4145_v13 = vld [vmem:[%s5523_s0 + $0x198] sm:$0xff]   ;;  %v4150_v17 = vld [vmem:[%s5523_s0 + $0x1e0] sm:$0xff]  }
  0x1b   :  { %v4618_v6 = vld [vmem:[%s5524_s1 + $0x50] ss:$28 sps:$4 sm:$0xff]   ;;  %v4151_v18 = vld [vmem:[%s5523_s0 + $0x220] sm:$0xff]  }
  0x1c   :  { %3501 = vmatpush3.bf16.msra.mxu0 %v4085_v26  ;;  %v4139_v7 = vld [vmem:[%s5523_s0 + $0x1d0] sm:$0xff]   ;;  %v4152_v19 = vld [vmem:[%s5523_s0 + $0x1a0] sm:$0xff]   ;;  %v4153_v20 = vld [vmem:[%s5523_s0 + $0x268] sm:$0xff]  }
  0x1d   :  { %3541 = vmatpush3.bf16.msra.mxu1 %v4086_v27  ;;  %3502 = vmatprep.subr.bf16.mxu0 %v4087_v28  ;;  %v4140_v8 = vld [vmem:[%s5523_s0 + $0x210] sm:$0xff]   ;;  %v4154_v21 = vld [vmem:[%s5523_s0 + $0x1e8] sm:$0xff]   ;;  %v4683_v24 = vld [vmem:[%s5524_s1 + $0x84] ss:$28 sps:$4 sm:$0xff]  }
  0x1e   :  { %3542 = vmatprep.subr.bf16.mxu1 %v4088_v29  ;;  %v4141_v9 = vld [vmem:[%s5523_s0 + $0x190] sm:$0xff]   ;;  %v4155_v22 = vld [vmem:[%s5523_s0 + $0x228] sm:$0xff]   ;;  %v4691_v26 = vld [vmem:[%s5524_s1 + $0x80] ss:$28 sps:$4 sm:$0xff]  }
  0x1f   :  { %v4156_v23 = vld [vmem:[%s5523_s0 + $0x1a8] sm:$0xff]   ;;  %v4159_v25 = vld [vmem:[%s5523_s0 + $0x270] sm:$0xff]  }
  0x20   :  { %3503 = vmatpush3.bf16.msra.mxu0 %v4089_v30  ;;  %v4161_v27 = vld [vmem:[%s5523_s0 + $0x1f0] sm:$0xff]   ;;  %v4707_v30 = vld [vmem:[%s5524_s1 + $0x88] ss:$28 sps:$4 sm:$0xff]  }
  0x21   :  { %3543 = vmatpush3.bf16.msra.mxu1 %v4090_v31  ;;  %3568 = vmatprep.subr.bf16.mxu0 %v4097_v36  ;;  %v4162_v28 = vld [vmem:[%s5523_s0 + $0x230] sm:$0xff]   ;;  %v4165_v31 = vld [vmem:[%s5523_s0 + $0x278] sm:$0xff]  }
  0x22   :  { %3992 = vmatprep.subr.bf16.mxu1 %v4105_v42  ;;  %v4163_v29 = vld [vmem:[%s5523_s0 + $0x1b0] sm:$0xff]   ;;  %v4717_v36 = vld [vmem:[%s5524_s1 + $0xc0] ss:$28 sps:$4 sm:$0xff]  }
  0x23   :  { %633 = vmatmul.mubr.bf16.vlgmr.msra.gmra.mrb[0].mxu0 %v4458_v34 }
  0x24   :  { %698 = vmatmul.mubr.bf16.vlgmr.msra.gmra.mrb[0].mxu1 %v4463_v35  ;;  %3569 = vmatpush3.bf16.msra.mxu0 %v4098_v37  ;;  %v4167_v37 = vld [vmem:[%s5523_s0 + $0x1f8] sm:$0xff]  }
  0x25   :  { %3570 = vmatprep.subr.bf16.mxu0 %v4099_v38  ;;  %640 = vmatprep.mubr.bf16.mxu0 %v4483_v40  ;;  %v4168_v38 = vld [vmem:[%s5523_s0 + $0x238] sm:$0xff]  }
  0x26   :  { %705 = vmatprep.mubr.bf16.mxu1 %v4488_v41  ;;  %3993 = vmatpush3.bf16.msra.mxu1 %v4105_v42  ;;  %v4734_v42 = vld [vmem:[%s5524_s1 + $0xbc] ss:$28 sps:$4 sm:$0xff]  }
  0x27   :  { %3994 = vmatprep.subr.bf16.mxu1 %v4126_v59 }
  0x28   :  { %3571 = vmatpush3.bf16.msra.mxu0 %v4100_v39  ;;  %v4169_v39 = vld [vmem:[%s5523_s0 + $0x1b8] sm:$0xff]  }
  0x29   :  { %3572 = vmatprep.subr.bf16.mxu0 %v4108_v45  ;;  %v4172_v45 = vld [vmem:[%s5523_s0 + $0x280] sm:$0xff]  }
  0x2a   :  { %3995 = vmatpush3.bf16.msra.mxu1 %v4126_v59  ;;  %v4181_v59 = vld [vmem:[%s5523_s0 + $0x2d0] sm:$0xff]  }
  0x2b   :  { %641 = vmatmul.mubr.bf16.gmra.mrb[4].mxu0 %v4497_v43  ;;  %3654 = vmatprep.subr.bf16.mxu1 %v4137_v5  ;;  %v4194_v5 = vld [vmem:[%s5523_s0 + $0x318] sm:$0xff]  }
  0x2c   :  { %706 = vmatmul.mubr.bf16.gmra.mrb[4].mxu1 %v4503_v44  ;;  %3573 = vmatpush3.bf16.msra.mxu0 %v4109_v46  ;;  %v4742_v46 = vld [vmem:[%s5524_s1 + $0xb8] ss:$28 sps:$4 sm:$0xff]  }
  0x2d   :  { %3574 = vmatprep.subr.bf16.mxu0 %v4110_v47  ;;  %648 = vmatprep.mubr.bf16.mxu0 %v4522_v49  ;;  %v4174_v47 = vld [vmem:[%s5523_s0 + $0x200] sm:$0xff]  }
  0x2e   :  { %713 = vmatprep.mubr.bf16.mxu1 %v4527_v50 }
  0x30   :  { %3575 = vmatpush3.bf16.msra.mxu0 %v4111_v48  ;;  %v4175_v48 = vld [vmem:[%s5523_s0 + $0x240] sm:$0xff]  }
  0x31   :  { %3576 = vmatprep.subr.bf16.mxu0 %v4118_v53  ;;  %v4176_v53 = vld [vmem:[%s5523_s0 + $0x1c0] sm:$0xff]  }
  0x33   :  { %649 = vmatmul.mubr.bf16.gmra.mrb[8].mxu0 %v4532_v51 }
  0x34   :  { %714 = vmatmul.mubr.bf16.gmra.mrb[8].mxu1 %v4537_v52  ;;  %3577 = vmatpush3.bf16.msra.mxu0 %v4119_v54  ;;  %v4177_v54 = vld [vmem:[%s5523_s0 + $0x288] sm:$0xff]  }
  0x35   :  { %3578 = vmatprep.subr.bf16.mxu0 %v4120_v55  ;;  %656 = vmatprep.mubr.bf16.mxu0 %v4558_v57  ;;  %v4178_v55 = vld [vmem:[%s5523_s0 + $0x208] sm:$0xff]  }
  0x36   :  { %721 = vmatprep.mubr.bf16.mxu1 %v4563_v58 }
  0x38   :  { %3579 = vmatpush3.bf16.msra.mxu0 %v4121_v56  ;;  %v4179_v56 = vld [vmem:[%s5523_s0 + $0x248] sm:$0xff]  }
  0x39   :  { %3580 = vmatprep.subr.bf16.mxu0 %v4129_v62  ;;  %v4182_v62 = vld [vmem:[%s5523_s0 + $0x290] sm:$0xff]  }
  0x3b   :  { %657 = vmatmul.mubr.bf16.gmra.mrb[12].mxu0 %v4573_v60 }
  0x3c   :  { %722 = vmatmul.mubr.bf16.gmra.mrb[12].mxu1 %v4578_v61  ;;  %3581 = vmatpush3.bf16.msra.mxu0 %v4130_v63  ;;  %v4183_v63 = vld [vmem:[%s5523_s0 + $0x2d8] sm:$0xff]  }
  0x3d   :  { %3582 = vmatprep.subr.bf16.mxu0 %v4131_v0  ;;  %762 = vmatprep.mubr.bf16.mxu0 %v4597_v2  ;;  %v4185_v0 = vld [vmem:[%s5523_s0 + $0x310] sm:$0xff]  }
  0x3e   :  { %3996 = vmatprep.mubr.msk.bf16.mxu1 %vm587_vm0, %v4602_v3 }
  0x40   :  { %3583 = vmatpush3.bf16.msra.mxu0 %v4132_v1  ;;  %v4184_v1 = vld [vmem:[%s5523_s0 + $0x298] sm:$0xff]  }
  0x41   :  { %3614 = vmatprep.subr.bf16.mxu0 %v4139_v7  ;;  %v4193_v7 = vld [vmem:[%s5523_s0 + $0x2b8] sm:$0xff]  }
  0x43   :  { %763 = vmatmul.mubr.bf16.vlgmr.msra.gmra.mrb[16].mxu0 %v4607_v4 }
  0x44   :  { %3997 = vmatmul.mubr.msk.bf16.vlgmr.msra.gmra.mrb[16].mxu1 %vm587_vm0, %v4618_v6  ;;  %3615 = vmatpush3.bf16.msra.mxu0 %v4141_v9  ;;  %v4204_v9 = vld [vmem:[%s5523_s0 + $0x3a8] sm:$0xff]  }
  0x45   :  { %3655 = vmatpush3.bf16.msra.mxu1 %v4140_v8  ;;  %3616 = vmatprep.subr.bf16.mxu0 %v4143_v11  ;;  %v4195_v8 = vld [vmem:[%s5523_s0 + $0x300] sm:$0xff]   ;;  %v4207_v11 = vld [vmem:[%s5523_s0 + $0x3f0] sm:$0xff]  }
  0x46   :  { %3656 = vmatprep.subr.bf16.mxu1 %v4142_v10  ;;  %770 = vmatprep.mubr.bf16.mxu0 %v4647_v14  ;;  %v4206_v10 = vld [vmem:[%s5523_s0 + $0x328] sm:$0xff]  }
  0x47   :  { %4000 = vmatprep.mubr.msk.bf16.mxu1 %vm587_vm0, %v4707_v30 }
  0x48   :  { %3617 = vmatpush3.bf16.msra.mxu0 %v4145_v13  ;;  %v4211_v13 = vld [vmem:[%s5523_s0 + $0x3f8] sm:$0xff]  }
  0x49   :  { %3657 = vmatpush3.bf16.msra.mxu1 %v4144_v12  ;;  %3618 = vmatprep.subr.bf16.mxu0 %v4150_v17  ;;  %v4210_v12 = vld [vmem:[%s5523_s0 + $0x330] sm:$0xff]   ;;  %v4214_v17 = vld [vmem:[%s5523_s0 + $0x338] sm:$0xff]  }
  0x4a   :  { %3658 = vmatprep.subr.bf16.mxu1 %v4148_v15  ;;  %v4212_v15 = vld [vmem:[%s5523_s0 + $0x3b8] sm:$0xff]  }
  0x4b   :  { %771 = vmatmul.mubr.bf16.gmra.mrb[20].mxu0 %v4656_v16 }
  0x4c   :  { %3619 = vmatpush3.bf16.msra.mxu0 %v4152_v19  ;;  %778 = vmatprep.mubr.bf16.mxu0 %v4683_v24  ;;  %v4217_v19 = vld [vmem:[%s5523_s0 + $0x380] sm:$0xff]  }
  0x4d   :  { %3659 = vmatpush3.bf16.msra.mxu1 %v4151_v18  ;;  %3620 = vmatprep.subr.bf16.mxu0 %v4154_v21  ;;  %v4215_v18 = vld [vmem:[%s5523_s0 + $0x400] sm:$0xff]   ;;  %v4219_v21 = vld [vmem:[%s5523_s0 + $0x408] sm:$0xff]  }
  0x4e   :  { %3660 = vmatprep.subr.bf16.mxu1 %v4153_v20  ;;  %4001 = vmatmul.mubr.msk.bf16.gmra.mrb[20].mxu1 %vm587_vm0, %v4717_v36  ;;  %v4218_v20 = vld [vmem:[%s5523_s0 + $0x340] sm:$0xff]  }
  0x4f   :  { %1358 = vmatprep.mubr.bf16.mxu1 %v4452_v33 }
  0x50   :  { %3621 = vmatpush3.bf16.msra.mxu0 %v4156_v23  ;;  %v4222_v23 = vld [vmem:[%s5523_s0 + $0x348] sm:$0xff]  }
  0x51   :  { %3661 = vmatpush3.bf16.msra.mxu1 %v4155_v22  ;;  %3622 = vmatprep.subr.bf16.mxu0 %v4161_v27  ;;  %v4221_v22 = vld [vmem:[%s5523_s0 + $0x388] sm:$0xff]   ;;  %v4226_v27 = vld [vmem:[%s5523_s0 + $0x350] sm:$0xff]  }
  0x52   :  { %3662 = vmatprep.subr.bf16.mxu1 %v4159_v25  ;;  %v4225_v25 = vld [vmem:[%s5523_s0 + $0x390] sm:$0xff]  }
  0x53   :  { %779 = vmatmul.mubr.bf16.gmra.mrb[24].mxu0 %v4691_v26 }
  0x54   :  { %3623 = vmatpush3.bf16.msra.mxu0 %v4163_v29  ;;  %786 = vmatprep.mubr.bf16.mxu0 %v4734_v42  ;;  %v4229_v29 = vld [vmem:[%s5523_s0 + $0x398] sm:$0xff]  }
  0x55   :  { %3663 = vmatpush3.bf16.msra.mxu1 %v4162_v28  ;;  %3624 = vmatprep.subr.bf16.mxu0 %v4167_v37  ;;  %v4227_v28 = vld [vmem:[%s5523_s0 + $0x418] sm:$0xff]  }
  0x56   :  { %3664 = vmatprep.subr.bf16.mxu1 %v4165_v31  ;;  %v4228_v31 = vld [vmem:[%s5523_s0 + $0x3d8] sm:$0xff]  }
  0x57   :  { %v4230_v37 = vld [vmem:[%s5523_s0 + $0x358] sm:$0xff]  }
  0x58   :  { %3625 = vmatpush3.bf16.msra.mxu0 %v4169_v39  ;;  %v4955_v39 = vld [vmem:[%s5524_s1 + $0x4] ss:$28 sps:$4 sm:$0xff]  }
  0x59   :  { %3665 = vmatpush3.bf16.msra.mxu1 %v4168_v38  ;;  %3626 = vmatprep.subr.bf16.mxu0 %v4174_v47  ;;  %v4235_v38 = vld [vmem:[%s5523_s0 + $0x4a0] sm:$0xff]  }
  0x5a   :  { %3666 = vmatprep.subr.bf16.mxu1 %v4172_v45  ;;  %v4232_v45 = vld [vmem:[%s5523_s0 + $0x420] sm:$0xff]  }
  0x5b   :  { %787 = vmatmul.mubr.bf16.gmra.mrb[28].mxu0 %v4742_v46  ;;  %v4970_v47 = vld [vmem:[%s5524_s1 + $0x8] ss:$28 sps:$4 sm:$0xff]  }
  0x5c   :  { %1293 = vmatprep.mubr.bf16.mxu0 %v4447_v32  ;;  %3627 = vmatpush3.bf16.msra.mxu0 %v4176_v53  ;;  %v4180_v32 = vld [vmem:[%s5523_s0 + $0x1c8] sm:$0xff]   ;;  %v4979_v53 = vld [vmem:[%s5524_s1] ss:$28 sps:$4 sm:$0xff]  }
  0x5d   :  { %3667 = vmatpush3.bf16.msra.mxu1 %v4175_v48  ;;  %3628 = vmatprep.subr.bf16.mxu0 %v4178_v55  ;;  %v4244_v48 = vld [vmem:[%s5523_s0 + $0x4a8] sm:$0xff]  }
  0x5e   :  { %3668 = vmatprep.subr.bf16.mxu1 %v4177_v54  ;;  %v4985_v54 = vld [vmem:[%s5524_s1 + $0x44] ss:$28 sps:$4 sm:$0xff]   ;;  %v4234_v55 = vld [vmem:[%s5523_s0 + $0x428] sm:$0xff]  }
  0x60   :  { %3629 = vmatpush3.bf16.msra.mxu0 %v4180_v32  ;;  %v4997_v32 = vld [vmem:[%s5524_s1 + $0x3c] ss:$28 sps:$4 sm:$0xff]  }
  0x61   :  { %3669 = vmatpush3.bf16.msra.mxu1 %v4179_v56  ;;  %3694 = vmatprep.subr.bf16.mxu0 %v4181_v59  ;;  %v4236_v56 = vld [vmem:[%s5523_s0 + $0x470] sm:$0xff]  }
  0x62   :  { %4004 = vmatprep.subr.bf16.mxu1 %v4185_v0  ;;  %v4249_v59 = vld [vmem:[%s5523_s0 + $0x570] sm:$0xff]  }
  0x63   :  { %1294 = vmatmul.mubr.bf16.vlgmr.msra.gmra.mrb[32].mxu0 %v4458_v34  ;;  %v4187_v34 = vld [vmem:[%s5523_s0 + $0x2a0] sm:$0xff]  }
  0x64   :  { %1359 = vmatmul.mubr.bf16.vlgmr.msra.gmra.mrb[24].mxu1 %v4463_v35  ;;  %3695 = vmatpush3.bf16.msra.mxu0 %v4182_v62  ;;  %v4186_v35 = vld [vmem:[%s5523_s0 + $0x2e0] sm:$0xff]   ;;  %v4237_v62 = vld [vmem:[%s5523_s0 + $0x430] sm:$0xff]  }
  0x65   :  { %1366 = vmatprep.mubr.bf16.mxu1 %v4488_v41  ;;  %1301 = vmatprep.mubr.bf16.mxu0 %v4483_v40  ;;  %v4188_v41 = vld [vmem:[%s5523_s0 + $0x2e8] sm:$0xff]  }
  0x66   :  { %3696 = vmatprep.subr.bf16.mxu0 %v4183_v63  ;;  %4005 = vmatpush3.bf16.msra.mxu1 %v4185_v0  ;;  %v4189_v40 = vld [vmem:[%s5523_s0 + $0x2a8] sm:$0xff]   ;;  %v4238_v63 = vld [vmem:[%s5523_s0 + $0x478] sm:$0xff]  }
  0x67   :  { %4006 = vmatprep.subr.bf16.mxu1 %v4194_v5  ;;  %v5012_v0 = vld [vmem:[%s5524_s1 + $0x40] ss:$28 sps:$4 sm:$0xff]  }
  0x68   :  { %3697 = vmatpush3.bf16.msra.mxu0 %v4184_v1  ;;  %v5018_v1 = vld [vmem:[%s5524_s1 + $0x38] ss:$28 sps:$4 sm:$0xff]  }
  0x69   :  { %3698 = vmatprep.subr.bf16.mxu0 %v4186_v35  ;;  %v5024_v35 = vld [vmem:[%s5524_s1 + $0x7c] ss:$28 sps:$4 sm:$0xff]  }
  0x6a   :  { %4007 = vmatpush3.bf16.msra.mxu1 %v4194_v5  ;;  %v4241_v5 = vld [vmem:[%s5523_s0 + $0x440] sm:$0xff]  }
  0x6b   :  { %1302 = vmatmul.mubr.bf16.gmra.mrb[36].mxu0 %v4497_v43  ;;  %v4191_v43 = vld [vmem:[%s5523_s0 + $0x2b0] sm:$0xff]  }
  0x6c   :  { %1367 = vmatmul.mubr.bf16.gmra.mrb[28].mxu1 %v4503_v44  ;;  %3699 = vmatpush3.bf16.msra.mxu0 %v4187_v34  ;;  %v4190_v44 = vld [vmem:[%s5523_s0 + $0x2f0] sm:$0xff]   ;;  %v4239_v34 = vld [vmem:[%s5523_s0 + $0x438] sm:$0xff]  }
  0x6d   :  { %1374 = vmatprep.mubr.bf16.mxu1 %v4527_v50  ;;  %1309 = vmatprep.mubr.bf16.mxu0 %v4522_v49  ;;  %v4192_v49 = vld [vmem:[%s5523_s0 + $0x2f8] sm:$0xff]   ;;  %v4199_v50 = vld [vmem:[%s5523_s0 + $0x3e0] sm:$0xff]  }
  0x6e   :  { %3700 = vmatprep.subr.bf16.mxu0 %v4188_v41  ;;  %3780 = vmatprep.subr.bf16.mxu1 %v4199_v50  ;;  %v5033_v41 = vld [vmem:[%s5524_s1 + $0x74] ss:$28 sps:$4 sm:$0xff]  }
  0x6f   :  { %v5060_v50 = vld [vmem:[%s5524_s1 + $0xb4] ss:$28 sps:$4 sm:$0xff]  }
  0x70   :  { %3701 = vmatpush3.bf16.msra.mxu0 %v4189_v40  ;;  %v4240_v40 = vld [vmem:[%s5523_s0 + $0x480] sm:$0xff]  }
  0x71   :  { %3702 = vmatprep.subr.bf16.mxu0 %v4190_v44  ;;  %v4242_v44 = vld [vmem:[%s5523_s0 + $0x488] sm:$0xff]  }
  0x73   :  { %1310 = vmatmul.mubr.bf16.gmra.mrb[40].mxu0 %v4532_v51  ;;  %v4196_v51 = vld [vmem:[%s5523_s0 + $0x2c0] sm:$0xff]  }
  0x74   :  { %1375 = vmatmul.mubr.bf16.gmra.mrb[32].mxu1 %v4537_v52  ;;  %3703 = vmatpush3.bf16.msra.mxu0 %v4191_v43  ;;  %v4197_v52 = vld [vmem:[%s5523_s0 + $0x308] sm:$0xff]   ;;  %v5048_v43 = vld [vmem:[%s5524_s1 + $0x78] ss:$28 sps:$4 sm:$0xff]  }
  0x75   :  { %1382 = vmatprep.mubr.bf16.mxu1 %v4563_v58  ;;  %1317 = vmatprep.mubr.bf16.mxu0 %v4558_v57  ;;  %v4198_v57 = vld [vmem:[%s5523_s0 + $0x2c8] sm:$0xff]   ;;  %v4201_v58 = vld [vmem:[%s5523_s0 + $0x360] sm:$0xff]  }
  0x76   :  { %3704 = vmatprep.subr.bf16.mxu0 %v4192_v49  ;;  %v5054_v49 = vld [vmem:[%s5524_s1 + $0x70] ss:$28 sps:$4 sm:$0xff]  }
  0x78   :  { %3705 = vmatpush3.bf16.msra.mxu0 %v4193_v7  ;;  %v4243_v7 = vld [vmem:[%s5523_s0 + $0x448] sm:$0xff]  }
  0x79   :  { %3706 = vmatprep.subr.bf16.mxu0 %v4195_v8  ;;  %v5069_v8 = vld [vmem:[%s5524_s1 + $0xac] ss:$28 sps:$4 sm:$0xff]  }
  0x7b   :  { %1318 = vmatmul.mubr.bf16.gmra.mrb[44].mxu0 %v4573_v60  ;;  %v4202_v60 = vld [vmem:[%s5523_s0 + $0x320] sm:$0xff]  }
  0x7c   :  { %1383 = vmatmul.mubr.bf16.gmra.mrb[36].mxu1 %v4578_v61  ;;  %3707 = vmatpush3.bf16.msra.mxu0 %v4196_v51  ;;  %v4200_v61 = vld [vmem:[%s5523_s0 + $0x3a0] sm:$0xff]   ;;  %v4245_v51 = vld [vmem:[%s5523_s0 + $0x490] sm:$0xff]  }
  0x7d   :  { %4008 = vmatprep.mubr.msk.bf16.mxu1 %vm587_vm0, %v4602_v3  ;;  %1423 = vmatprep.mubr.bf16.mxu0 %v4597_v2  ;;  %v4203_v3 = vld [vmem:[%s5523_s0 + $0x3e8] sm:$0xff]  }
  0x7e   :  { %3708 = vmatprep.subr.bf16.mxu0 %v4197_v52  ;;  %v4205_v2 = vld [vmem:[%s5523_s0 + $0x368] sm:$0xff]   ;;  %v4246_v52 = vld [vmem:[%s5523_s0 + $0x450] sm:$0xff]  }
  0x80   :  { %3709 = vmatpush3.bf16.msra.mxu0 %v4198_v57  ;;  %v4247_v57 = vld [vmem:[%s5523_s0 + $0x498] sm:$0xff]  }
  0x81   :  { %3740 = vmatprep.subr.bf16.mxu0 %v4201_v58  ;;  %v5084_v58 = vld [vmem:[%s5524_s1 + $0xb0] ss:$28 sps:$4 sm:$0xff]  }
  0x83   :  { %1424 = vmatmul.mubr.bf16.vlgmr.msra.gmra.mrb[48].mxu0 %v4607_v4  ;;  %v4208_v4 = vld [vmem:[%s5523_s0 + $0x3b0] sm:$0xff]  }
  0x84   :  { %4009 = vmatmul.mubr.msk.bf16.vlgmr.msra.gmra.mrb[40].mxu1 %vm587_vm0, %v4618_v6  ;;  %3741 = vmatpush3.bf16.msra.mxu0 %v4202_v60  ;;  %v4209_v6 = vld [vmem:[%s5523_s0 + $0x370] sm:$0xff]  }
  0x85   :  { %3781 = vmatpush3.bf16.msra.mxu1 %v4200_v61  ;;  %3742 = vmatprep.subr.bf16.mxu0 %v4205_v2  ;;  %v5090_v61 = vld [vmem:[%s5524_s1 + $0xa8] ss:$28 sps:$4 sm:$0xff]   ;;  %v5096_v60 = vld [vmem:[%s5524_s1 + $0x18] ss:$28 sps:$4 sm:$0xff]  }
  0x86   :  { %3782 = vmatprep.subr.bf16.mxu1 %v4203_v3  ;;  %1431 = vmatprep.mubr.bf16.mxu0 %v4647_v14  ;;  %v4213_v14 = vld [vmem:[%s5523_s0 + $0x378] sm:$0xff]   ;;  %v5106_v2 = vld [vmem:[%s5524_s1 + $0x14] ss:$28 sps:$4 sm:$0xff]  }
  0x87   :  { %4012 = vmatprep.mubr.msk.bf16.mxu1 %vm587_vm0, %v4707_v30  ;;  %v4248_v3 = vld [vmem:[%s5523_s0 + $0x458] sm:$0xff]  }
  0x88   :  { %3743 = vmatpush3.bf16.msra.mxu0 %v4206_v10  ;;  %v4250_v10 = vld [vmem:[%s5523_s0 + $0x530] sm:$0xff]  }
  0x89   :  { %3783 = vmatpush3.bf16.msra.mxu1 %v4204_v9  ;;  %3744 = vmatprep.subr.bf16.mxu0 %v4209_v6  ;;  %v4251_v9 = vld [vmem:[%s5523_s0 + $0x4f0] sm:$0xff]   ;;  %v4253_v6 = vld [vmem:[%s5523_s0 + $0x578] sm:$0xff]  }
  0x8a   :  { %3784 = vmatprep.subr.bf16.mxu1 %v4207_v11  ;;  %v4252_v11 = vld [vmem:[%s5523_s0 + $0x4b0] sm:$0xff]  }
  0x8b   :  { %1432 = vmatmul.mubr.bf16.gmra.mrb[52].mxu0 %v4656_v16  ;;  %v4216_v16 = vld [vmem:[%s5523_s0 + $0x3c0] sm:$0xff]  }
  0x8c   :  { %4013 = vmatmul.mubr.msk.bf16.gmra.mrb[44].mxu1 %vm587_vm0, %v4717_v36  ;;  %3745 = vmatpush3.bf16.msra.mxu0 %v4210_v12  ;;  %v5127_v12 = vld [vmem:[%s5524_s1 + $0x50] ss:$28 sps:$4 sm:$0xff]  }
  0x8d   :  { %3785 = vmatpush3.bf16.msra.mxu1 %v4208_v4  ;;  %3746 = vmatprep.subr.bf16.mxu0 %v4213_v14  ;;  %v4255_v4 = vld [vmem:[%s5523_s0 + $0x4f8] sm:$0xff]   ;;  %v5137_v14 = vld [vmem:[%s5524_s1 + $0x10] ss:$28 sps:$4 sm:$0xff]  }
  0x8e   :  { %3786 = vmatprep.subr.bf16.mxu1 %v4211_v13  ;;  %1439 = vmatprep.mubr.bf16.mxu0 %v4683_v24  ;;  %v4223_v24 = vld [vmem:[%s5523_s0 + $0x410] sm:$0xff]   ;;  %v4254_v13 = vld [vmem:[%s5523_s0 + $0x538] sm:$0xff]  }
  0x8f   :  { %2027 = vmatprep.mubr.bf16.mxu1 %v4452_v33  ;;  %v4220_v33 = vld [vmem:[%s5523_s0 + $0x3c8] sm:$0xff]  }
  0x90   :  { %3747 = vmatpush3.bf16.msra.mxu0 %v4214_v17  ;;  %v4257_v17 = vld [vmem:[%s5523_s0 + $0x580] sm:$0xff]  }
  0x91   :  { %3787 = vmatpush3.bf16.msra.mxu1 %v4212_v15  ;;  %3748 = vmatprep.subr.bf16.mxu0 %v4217_v19  ;;  %v4256_v15 = vld [vmem:[%s5523_s0 + $0x4b8] sm:$0xff]   ;;  %v4259_v19 = vld [vmem:[%s5523_s0 + $0x500] sm:$0xff]  }
  0x92   :  { %3788 = vmatprep.subr.bf16.mxu1 %v4215_v18  ;;  %v5149_v18 = vld [vmem:[%s5524_s1 + $0x4c] ss:$28 sps:$4 sm:$0xff]  }
  0x93   :  { %1440 = vmatmul.mubr.bf16.gmra.mrb[56].mxu0 %v4691_v26  ;;  %v4224_v26 = vld [vmem:[%s5523_s0 + $0x3d0] sm:$0xff]  }
  0x94   :  { %3749 = vmatpush3.bf16.msra.mxu0 %v4218_v20  ;;  %1447 = vmatprep.mubr.bf16.mxu0 %v4734_v42  ;;  %v4231_v42 = vld [vmem:[%s5523_s0 + $0x460] sm:$0xff]  }
  0x95   :  { %3789 = vmatpush3.bf16.msra.mxu1 %v4216_v16  ;;  %3750 = vmatprep.subr.bf16.mxu0 %v4221_v22  ;;  %v4258_v16 = vld [vmem:[%s5523_s0 + $0x540] sm:$0xff]   ;;  %v4263_v22 = vld [vmem:[%s5523_s0 + $0x508] sm:$0xff]  }
  0x96   :  { %3790 = vmatprep.subr.bf16.mxu1 %v4219_v21  ;;  %v4260_v20 = vld [vmem:[%s5523_s0 + $0x4c0] sm:$0xff]   ;;  %v4261_v21 = vld [vmem:[%s5523_s0 + $0x588] sm:$0xff]  }
  0x98   :  { %3751 = vmatpush3.bf16.msra.mxu0 %v4222_v23  ;;  %v4264_v23 = vld [vmem:[%s5523_s0 + $0x4c8] sm:$0xff]  }
  0x99   :  { %3791 = vmatpush3.bf16.msra.mxu1 %v4220_v33  ;;  %3752 = vmatprep.subr.bf16.mxu0 %v4225_v25  ;;  %v5177_v33 = vld [vmem:[%s5524_s1 + $0x48] ss:$28 sps:$4 sm:$0xff]   ;;  %v4267_v25 = vld [vmem:[%s5523_s0 + $0x510] sm:$0xff]  }
  0x9a   :  { %3792 = vmatprep.subr.bf16.mxu1 %v4223_v24  ;;  %v4265_v24 = vld [vmem:[%s5523_s0 + $0x590] sm:$0xff]  }
  0x9b   :  { %1448 = vmatmul.mubr.bf16.gmra.mrb[60].mxu0 %v4742_v46  ;;  %v4233_v46 = vld [vmem:[%s5523_s0 + $0x468] sm:$0xff]  }
  0x9c   :  { %3753 = vmatpush3.bf16.msra.mxu0 %v4226_v27  ;;  %1962 = vmatprep.mubr.bf16.mxu0 %v4955_v39  ;;  %v4321_v27 = vld [vmem:[%s5524_s1 + $0xc] ss:$28 sps:$4 sm:$0xff]  }
  0x9d   :  { %3793 = vmatpush3.bf16.msra.mxu1 %v4224_v26  ;;  %3754 = vmatprep.subr.bf16.mxu0 %v4229_v29  ;;  %v4266_v26 = vld [vmem:[%s5523_s0 + $0x550] sm:$0xff]   ;;  %v4269_v29 = vld [vmem:[%s5523_s0 + $0x598] sm:$0xff]  }
  0x9e   :  { %3794 = vmatprep.subr.bf16.mxu1 %v4227_v28  ;;  %v4268_v28 = vld [vmem:[%s5523_s0 + $0x4d0] sm:$0xff]  }
  0xa0   :  { %3755 = vmatpush3.bf16.msra.mxu0 %v4230_v37  ;;  %v4270_v37 = vld [vmem:[%s5523_s0 + $0x558] sm:$0xff]  }
  0xa1   :  { %3795 = vmatpush3.bf16.msra.mxu1 %v4228_v31  ;;  %3820 = vmatprep.subr.bf16.mxu0 %v4231_v42  ;;  %v4271_v31 = vld [vmem:[%s5523_s0 + $0x518] sm:$0xff]  }
  0xa2   :  { %4016 = vmatprep.subr.bf16.mxu1 %v4235_v38  ;;  %v4272_v42 = vld [vmem:[%s5523_s0 + $0x4d8] sm:$0xff]  }
  0xa3   :  { %1963 = vmatmul.mubr.bf16.vlgmr.msra.gmra.mrb[64].mxu0 %v4979_v53 }
  0xa4   :  { %2028 = vmatmul.mubr.bf16.vlgmr.msra.gmra.mrb[48].mxu1 %v4970_v47  ;;  %3821 = vmatpush3.bf16.msra.mxu0 %v4232_v45  ;;  %v4273_v45 = vld [vmem:[%s5523_s0 + $0x5a0] sm:$0xff]  }
  0xa5   :  { %2035 = vmatprep.mubr.bf16.mxu1 %v4985_v54  ;;  %4017 = vmatpush3.bf16.msra.mxu1 %v4235_v38  ;;  %v5216_v38 = vld [vmem:[%s5524_s1 + $0x80] ss:$28 sps:$4 sm:$0xff]  }
  0xa6   :  { %3822 = vmatprep.subr.bf16.mxu0 %v4233_v46  ;;  %1970 = vmatprep.mubr.bf16.mxu0 %v4997_v32  ;;  %v5228_v46 = vld [vmem:[%s5524_s1 + $0xbc] ss:$28 sps:$4 sm:$0xff]  }
  0xa7   :  { %4018 = vmatprep.subr.bf16.mxu1 %v4244_v48 }
  0xa8   :  { %3823 = vmatpush3.bf16.msra.mxu0 %v4234_v55  ;;  %v4274_v55 = vld [vmem:[%s5523_s0 + $0x560] sm:$0xff]  }
  0xa9   :  { %4019 = vmatpush3.bf16.msra.mxu1 %v4244_v48  ;;  %3824 = vmatprep.subr.bf16.mxu0 %v4236_v56  ;;  %v4275_v48 = vld [vmem:[%s5523_s0 + $0x520] sm:$0xff]  }
  0xaa   :  { %3906 = vmatprep.subr.bf16.mxu1 %v4249_v59  ;;  %v4276_v56 = vld [vmem:[%s5523_s0 + $0x4e0] sm:$0xff]   ;;  %v4277_v59 = vld [vmem:[%s5523_s0 + $0x5a8] sm:$0xff]  }
  0xab   :  { %1971 = vmatmul.mubr.bf16.gmra.mrb[68].mxu0 %v5018_v1 }
  0xac   :  { %2036 = vmatmul.mubr.bf16.gmra.mrb[52].mxu1 %v5012_v0  ;;  %3825 = vmatpush3.bf16.msra.mxu0 %v4237_v62  ;;  %v4279_v62 = vld [vmem:[%s5523_s0 + $0x528] sm:$0xff]  }
  0xad   :  { %2043 = vmatprep.mubr.bf16.mxu1 %v5024_v35  ;;  %1978 = vmatprep.mubr.bf16.mxu0 %v5033_v41 }
  0xae   :  { %3826 = vmatprep.subr.bf16.mxu0 %v4238_v63  ;;  %v5249_v63 = vld [vmem:[%s5524_s1 + $0xb8] ss:$28 sps:$4 sm:$0xff]  }
  0xb0   :  { %3827 = vmatpush3.bf16.msra.mxu0 %v4239_v34  ;;  %v4278_v34 = vld [vmem:[%s5523_s0 + $0x568] sm:$0xff]  }
  0xb1   :  { %3828 = vmatprep.subr.bf16.mxu0 %v4240_v40  ;;  %v4280_v40 = vld [vmem:[%s5523_s0 + $0x4e8] sm:$0xff]  }
  0xb3   :  { %1979 = vmatmul.mubr.bf16.gmra.mrb[72].mxu0 %v5054_v49 }
  0xb4   :  { %2044 = vmatmul.mubr.bf16.gmra.mrb[56].mxu1 %v5048_v43  ;;  %3829 = vmatpush3.bf16.msra.mxu0 %v4241_v5  ;;  %v4281_v5 = vld [vmem:[%s5523_s0 + $0x5f0] sm:$0xff]  }
  0xb5   :  { %2051 = vmatprep.mubr.bf16.mxu1 %v5060_v50  ;;  %1986 = vmatprep.mubr.bf16.mxu0 %v5069_v8 }
  0xb6   :  { %3830 = vmatprep.subr.bf16.mxu0 %v4242_v44  ;;  %v2869_v44 = vld [vmem:[%s5525_s2 + $0x10] sm:$0xff] }
  0xb8   :  { %3831 = vmatpush3.bf16.msra.mxu0 %v4243_v7  ;;  %v4327_v7 = vmov 0  }
  0xb9   :  { %3832 = vmatprep.subr.bf16.mxu0 %v4245_v51  ;;  %4058 = vset.pattern.permute.xlu1 %v4327_v7  ;;  %v2867_v51 = vld [vmem:[%s5525_s2] sm:$0xff] }
  0xba   :  { %4057 = vset.pattern.permute.xlu0 %v4327_v7  ;;  %2887 = vperm.xlu1 %4058, %v2869_v44  }
  0xbb   :  { %1987 = vmatmul.mubr.bf16.gmra.mrb[76].mxu0 %v5090_v61  ;;  %2877 = vperm.xlu0 %4057, %v2867_v51  }
  0xbc   :  { %2052 = vmatmul.mubr.bf16.gmra.mrb[60].mxu1 %v5084_v58  ;;  %3833 = vmatpush3.bf16.msra.mxu0 %v4246_v52  ;;  %v4282_v52 = vld [vmem:[%s5523_s0 + $0x5b0] sm:$0xff]  }
  0xbd   :  { %4020 = vmatprep.mubr.msk.bf16.mxu1 %vm587_vm0, %v5096_v60  ;;  %2092 = vmatprep.mubr.bf16.mxu0 %v5106_v2 }
  0xbe   :  { %3834 = vmatprep.subr.bf16.mxu0 %v4247_v57  ;;  %v4283_v57 = vld [vmem:[%s5523_s0 + $0x5f8] sm:$0xff]  }
  0xc0   :  { %3835 = vmatpush3.bf16.msra.mxu0 %v4248_v3  ;;  %v2870_v3 = vld [vmem:[%s5525_s2 + $0x18] sm:$0xff] }
  0xc1   :  { %3866 = vmatprep.subr.bf16.mxu0 %v4251_v9  ;;  %v4285_v9 = vld [vmem:[%s5523_s0 + $0x600] sm:$0xff]   ;;  %2892 = vperm.xlu1 %4058, %v2870_v3  }
  0xc3   :  { %2093 = vmatmul.mubr.bf16.vlgmr.msra.gmra.mrb[80].mxu0 %v5137_v14 }
  0xc4   :  { %4021 = vmatmul.mubr.msk.bf16.vlgmr.msra.gmra.mrb[64].mxu1 %vm587_vm0, %v5127_v12  ;;  %3867 = vmatpush3.bf16.msra.mxu0 %v4252_v11  ;;  %v2871_v11 = vld [vmem:[%s5525_s2 + $0x20] sm:$0xff] }
  0xc5   :  { %3907 = vmatpush3.bf16.msra.mxu1 %v4250_v10  ;;  %3868 = vmatprep.subr.bf16.mxu0 %v4255_v4  ;;  %v2872_v10 = vld [vmem:[%s5525_s2 + $0x28] sm:$0xff]  ;;  %v2873_v4 = vld [vmem:[%s5525_s2 + $0x30] sm:$0xff] }
  0xc6   :  { %3908 = vmatprep.subr.bf16.mxu1 %v4253_v6  ;;  %2100 = vmatprep.mubr.bf16.mxu0 %v5149_v18  ;;  %v4289_v6 = vld [vmem:[%s5523_s0 + $0x610] sm:$0xff]  }
  0xc7   :  { %4024 = vmatprep.mubr.msk.bf16.mxu1 %vm587_vm0, %v4707_v30  ;;  %v4262_v30 = vld [vmem:[%s5523_s0 + $0x548] sm:$0xff]   ;;  %2902 = vperm.xlu1 %4058, %v2872_v10  }
  0xc8   :  { %3869 = vmatpush3.bf16.msra.mxu0 %v4256_v15 }
  0xc9   :  { %3909 = vmatpush3.bf16.msra.mxu1 %v4254_v13  ;;  %3870 = vmatprep.subr.bf16.mxu0 %v4259_v19 }
  0xca   :  { %3910 = vmatprep.subr.bf16.mxu1 %v4257_v17 }
  0xcb   :  { %2101 = vmatmul.mubr.bf16.gmra.mrb[84].mxu0 %v5177_v33 }
  0xcc   :  { %4025 = vmatmul.mubr.msk.bf16.gmra.mrb[68].mxu1 %vm587_vm0, %v4717_v36  ;;  %3871 = vmatpush3.bf16.msra.mxu0 %v4260_v20  ;;  %v5189_v36 = vld [vmem:[%s5524_s1 + $0x84] ss:$28 sps:$4 sm:$0xff]  }
  0xcd   :  { %3911 = vmatpush3.bf16.msra.mxu1 %v4258_v16  ;;  %3872 = vmatprep.subr.bf16.mxu0 %v4263_v22  ;;  %v4292_v22 = vld [vmem:[%s5523_s0 + $0x5d8] sm:$0xff]  }
  0xce   :  { %3912 = vmatprep.subr.bf16.mxu1 %v4261_v21  ;;  %2108 = vmatprep.mubr.bf16.mxu0 %v5189_v36 }
  0xcf   :  { %2696 = vmatprep.mubr.bf16.mxu1 %v4321_v27  ;;  %v4294_v27 = vld [vmem:[%s5523_s0 + $0x5e0] sm:$0xff]  }
  0xd0   :  { %3873 = vmatpush3.bf16.msra.mxu0 %v4264_v23 }
  0xd1   :  { %3913 = vmatpush3.bf16.msra.mxu1 %v4262_v30  ;;  %3874 = vmatprep.subr.bf16.mxu0 %v4267_v25 }
  0xd2   :  { %3914 = vmatprep.subr.bf16.mxu1 %v4265_v24 }
  0xd3   :  { %2109 = vmatmul.mubr.bf16.gmra.mrb[88].mxu0 %v5216_v38 }
  0xd4   :  { %3875 = vmatpush3.bf16.msra.mxu0 %v4268_v28  ;;  %2116 = vmatprep.mubr.bf16.mxu0 %v5228_v46  ;;  %v4295_v28 = vld [vmem:[%s5523_s0 + $0x628] sm:$0xff]  }
  0xd5   :  { %3915 = vmatpush3.bf16.msra.mxu1 %v4266_v26  ;;  %3876 = vmatprep.subr.bf16.mxu0 %v4271_v31 }
  0xd6   :  { %3916 = vmatprep.subr.bf16.mxu1 %v4269_v29 }
  0xd8   :  { %3877 = vmatpush3.bf16.msra.mxu0 %v4272_v42 }
  0xd9   :  { %3917 = vmatpush3.bf16.msra.mxu1 %v4270_v37  ;;  %3878 = vmatprep.subr.bf16.mxu0 %v4275_v48 }
  0xda   :  { %3918 = vmatprep.subr.bf16.mxu1 %v4273_v45 }
  0xdb   :  { %2117 = vmatmul.mubr.bf16.gmra.mrb[92].mxu0 %v5249_v63 }
  0xdc   :  { %3879 = vmatpush3.bf16.msra.mxu0 %v4276_v56  ;;  %2631 = vmatprep.mubr.bf16.mxu0 %v4955_v39  ;;  %v4284_v39 = vld [vmem:[%s5523_s0 + $0x5b8] sm:$0xff]  }
  0xdd   :  { %3919 = vmatpush3.bf16.msra.mxu1 %v4274_v55  ;;  %3880 = vmatprep.subr.bf16.mxu0 %v4279_v62  ;;  %v4296_v55 = vld [vmem:[%s5523_s0 + $0x5e8] sm:$0xff]  }
  0xde   :  { %3920 = vmatprep.subr.bf16.mxu1 %v4277_v59 }
  0xe0   :  { %3881 = vmatpush3.bf16.msra.mxu0 %v4280_v40 }
  0xe1   :  { %3921 = vmatpush3.bf16.msra.mxu1 %v4278_v34  ;;  %3946 = vmatprep.subr.bf16.mxu0 %v4281_v5 }
  0xe2   :  { %4040 = vmatprep.subr.bf16.mxu1 %v4281_v5  ;;  %v4298_v5 = vld [vmem:[%s5523_s0 + $0x638] sm:$0xff]  }
  0xe3   :  { %2632 = vmatmul.mubr.bf16.vlgmr.msra.gmra.mrb[96].mxu0 %v4979_v53  ;;  %v4286_v53 = vld [vmem:[%s5523_s0 + $0x5c0] sm:$0xff]  }
  0xe4   :  { %2697 = vmatmul.mubr.bf16.vlgmr.msra.gmra.mrb[72].mxu1 %v4970_v47  ;;  %3947 = vmatpush3.bf16.msra.mxu0 %v4282_v52  ;;  %v2868_v47 = vld [vmem:[%s5525_s2 + $0x8] sm:$0xff] }
  0xe5   :  { %4048 = vmatpush3.bf16.msra.mxu1 %v4282_v52  ;;  %2704 = vmatprep.mubr.bf16.mxu1 %v4985_v54  ;;  %v4287_v54 = vld [vmem:[%s5523_s0 + $0x608] sm:$0xff]  }
  0xe6   :  { %4041 = vmatprep.subr.bf16.mxu1 %v4283_v57  ;;  %3948 = vmatprep.subr.bf16.mxu0 %v4283_v57 }
  0xe7   :  { %2639 = vmatprep.mubr.bf16.mxu0 %v4997_v32  ;;  %2882 = vperm.xlu0 %4057, %v2868_v47   ;;  %v4288_v32 = vld [vmem:[%s5523_s0 + $0x5c8] sm:$0xff]  }
  0xe8   :  { %3949 = vmatpush3.bf16.msra.mxu0 %v4284_v39 }
  0xe9   :  { %4049 = vmatpush3.bf16.msra.mxu1 %v4284_v39  ;;  %3950 = vmatprep.subr.bf16.mxu0 %v4285_v9 }
  0xea   :  { %4042 = vmatprep.subr.bf16.mxu1 %v4285_v9 }
  0xeb   :  { %2640 = vmatmul.mubr.bf16.gmra.mrb[100].mxu0 %v5018_v1  ;;  %2897 = vperm.xlu0 %4057, %v2871_v11   ;;  %v4290_v1 = vld [vmem:[%s5523_s0 + $0x5d0] sm:$0xff]  }
  0xec   :  { %2705 = vmatmul.mubr.bf16.gmra.mrb[76].mxu1 %v5012_v0  ;;  %3951 = vmatpush3.bf16.msra.mxu0 %v4286_v53  ;;  %v2874_v0 = vld [vmem:[%s5525_s2 + $0x38] sm:$0xff] }
  0xed   :  { %4050 = vmatpush3.bf16.msra.mxu1 %v4286_v53  ;;  %2712 = vmatprep.mubr.bf16.mxu1 %v5024_v35  ;;  %v4291_v35 = vld [vmem:[%s5523_s0 + $0x618] sm:$0xff]  }
  0xee   :  { %4043 = vmatprep.subr.bf16.mxu1 %v4287_v54  ;;  %3952 = vmatprep.subr.bf16.mxu0 %v4287_v54 }
  0xef   :  { %2647 = vmatprep.mubr.bf16.mxu0 %v5033_v41  ;;  %2912 = vperm.xlu1 %4058, %v2874_v0  }
  0xf0   :  { %3953 = vmatpush3.bf16.msra.mxu0 %v4288_v32  ;;  %2907 = vperm.xlu0 %4057, %v2873_v4  }
  0xf1   :  { %4051 = vmatpush3.bf16.msra.mxu1 %v4288_v32  ;;  %3954 = vmatprep.subr.bf16.mxu0 %v4289_v6 }
  0xf2   :  { %4044 = vmatprep.subr.bf16.mxu1 %v4289_v6 }
  0xf3   :  { %2648 = vmatmul.mubr.bf16.gmra.mrb[104].mxu0 %v5054_v49 }
  0xf4   :  { %2713 = vmatmul.mubr.bf16.gmra.mrb[80].mxu1 %v5048_v43  ;;  %3955 = vmatpush3.bf16.msra.mxu0 %v4290_v1  ;;  %v4293_v43 = vld [vmem:[%s5523_s0 + $0x620] sm:$0xff]  }
  0xf5   :  { %4052 = vmatpush3.bf16.msra.mxu1 %v4290_v1  ;;  %2720 = vmatprep.mubr.bf16.mxu1 %v5060_v50 }
  0xf6   :  { %v3504_v13 = vpop.f32.mrb[0].mxu0  ;;  %4045 = vmatprep.subr.bf16.mxu1 %v4291_v35  ;;  %3956 = vmatprep.subr.bf16.mxu0 %v4291_v35 }
  0xf7   :  { %v3544_v15 = vpop.f32.mrb[0].mxu1  ;;  %v3505_v41 = vpop.f32.mrb[1].mxu0  ;;  %2655 = vmatprep.mubr.bf16.mxu0 %v5069_v8 }
  0xf8   :  { %v3545_v17 = vpop.f32.mrb[1].mxu1  ;;  %v3506_v19 = vadd.f32 %v3505_v41, %v3504_v13  ;;  %v3507_v20 = vpop.f32.mrb[2].mxu0  ;;  %3957 = vmatpush3.bf16.msra.mxu0 %v4292_v22 }
  0xf9   :  { %v3546_v16 = vadd.f32 %v3545_v17, %v3544_v15  ;;  %v3547_v21 = vpop.f32.mrb[2].mxu1  ;;  %v3508_v30 = vpop.f32.mrb[3].mxu0  ;;  %4053 = vmatpush3.bf16.msra.mxu1 %v4292_v22  ;;  %3958 = vmatprep.subr.bf16.mxu0 %v4293_v43 }
  0xfa   :  { %v3548_v23 = vpop.f32.mrb[3].mxu1  ;;  %v3509_v25 = vadd.f32 %v3508_v30, %v3507_v20  ;;  %4046 = vmatprep.subr.bf16.mxu1 %v4293_v43 }
  0xfb   :  { %v5329_v24 = vadd.f32 %v3546_v16, %v3506_v19  ;;  %v3549_v26 = vadd.f32 %v3548_v23, %v3547_v21  ;;  %2656 = vmatmul.mubr.bf16.gmra.mrb[108].mxu0 %v5090_v61 }
  0xfc   :  { %2721 = vmatmul.mubr.bf16.gmra.mrb[84].mxu1 %v5084_v58  ;;  %3959 = vmatpush3.bf16.msra.mxu0 %v4294_v27  ;;  %v4297_v58 = vld [vmem:[%s5523_s0 + $0x630] sm:$0xff]  }
  0xfd   :  { %v5335_v49 = vadd.f32 %v3549_v26, %v3509_v25  ;;  %4054 = vmatpush3.bf16.msra.mxu1 %v4294_v27  ;;  %3960 = vmatprep.subr.bf16.mxu0 %v4295_v28 }
  0xfe   :  { %v3510_v29 = vpop.f32.mrb[4].mxu0  ;;  %4047 = vmatprep.subr.bf16.mxu1 %v4295_v28  ;;  %2785 = vmatprep.mubr.bf16.mxu1 %v5228_v46 }
  0xff   :  { %v3550_v31 = vpop.f32.mrb[4].mxu1  ;;  %v3511_v50 = vpop.f32.mrb[5].mxu0  ;;  %2761 = vmatprep.mubr.bf16.mxu0 %v5106_v2 }
 0x100   :  { %v3551_v37 = vpop.f32.mrb[5].mxu1  ;;  %v3512_v42 = vadd.f32 %v3511_v50, %v3510_v29  ;;  %v3513_v45 = vpop.f32.mrb[6].mxu0  ;;  %3961 = vmatpush3.bf16.msra.mxu0 %v4296_v55 }
 0x101   :  { %v3552_v8 = vadd.f32 %v3551_v37, %v3550_v31  ;;  %v3553_v48 = vpop.f32.mrb[6].mxu1  ;;  %v3514_v56 = vpop.f32.mrb[7].mxu0  ;;  %4055 = vmatpush3.bf16.msra.mxu1 %v4296_v55 }
 0x102   :  { %v3554_v59 = vpop.f32.mrb[7].mxu1  ;;  %v3515_v34 = vadd.f32 %v3514_v56, %v3513_v45  ;;  %4028 = vmatprep.subr.bf16.mxu1 %v4297_v58 }
 0x103   :  { %v5349_v62 = vadd.f32 %v3552_v8, %v3512_v42  ;;  %v3555_v40 = vadd.f32 %v3554_v59, %v3553_v48  ;;  %2762 = vmatmul.mubr.bf16.vlgmr.msra.gmra.mrb[112].mxu0 %v5137_v14 }
 0x104   :  { %2786 = vmatmul.mubr.bf16.vlgmr.msra.gmra.mrb[88].mxu1 %v5249_v63  ;;  %2769 = vmatprep.mubr.bf16.mxu0 %v5149_v18 }
 0x105   :  { %v5355_v61 = vadd.f32 %v3555_v40, %v3515_v34  ;;  %4029 = vmatpush3.bf16.msra.mxu1 %v4297_v58  ;;  %4032 = vmatprep.mubr.msk.bf16.mxu1 %vm587_vm0, %v5096_v60  ;;  %v4325_v60 = vld [vmem:[%s5524_s1 + $0x88] ss:$28 sps:$4 sm:$0xff]  }
 0x106   :  { %v3516_v44 = vpop.f32.mrb[8].mxu0  ;;  %4030 = vmatprep.subr.bf16.mxu1 %v4298_v5 }
 0x107   :  { %v3556_v7 = vpop.f32.mrb[8].mxu1  ;;  %v3517_v51 = vpop.f32.mrb[9].mxu0 }
 0x108   :  { %v3557_v52 = vpop.f32.mrb[9].mxu1  ;;  %v3518_v57 = vadd.f32 %v3517_v51, %v3516_v44  ;;  %v3519_v46 = vpop.f32.mrb[10].mxu0 }
 0x109   :  { %v3558_v39 = vadd.f32 %v3557_v52, %v3556_v7  ;;  %v3559_v3 = vpop.f32.mrb[10].mxu1  ;;  %v3520_v2 = vpop.f32.mrb[11].mxu0  ;;  %4031 = vmatpush3.bf16.msra.mxu1 %v4298_v5 }
 0x10a   :  { %v3560_v9 = vpop.f32.mrb[11].mxu1  ;;  %v3521_v53 = vadd.f32 %v3520_v2, %v3519_v46 }
 0x10b   :  { %v716_v47 = vadd.f32 %v3558_v39, %v3518_v57  ;;  %v3561_v10 = vadd.f32 %v3560_v9, %v3559_v3  ;;  %2770 = vmatmul.mubr.bf16.gmra.mrb[116].mxu0 %v5177_v33  ;;  %v4326_v33 = vld [vmem:[%s5524_s1 + $0xc0] ss:$28 sps:$4 sm:$0xff]  }
 0x10c   :  { %4033 = vmatmul.mubr.msk.bf16.vlgmr.msra.gmra.mrb[92].mxu1 %vm587_vm0, %v5127_v12  ;;  %2777 = vmatprep.mubr.bf16.mxu0 %v5189_v36 }
 0x10d   :  { %v719_v54 = vadd.f32 %v3561_v10, %v3521_v53  ;;  %4036 = vmatprep.mubr.msk.bf16.mxu1 %vm587_vm0, %v4325_v60 }
 0x10e   :  { %v3522_v63 = vpop.f32.mrb[12].mxu0 }
 0x10f   :  { %v3562_v32 = vpop.f32.mrb[12].mxu1  ;;  %v3523_v11 = vpop.f32.mrb[13].mxu0 }
 0x110   :  { %v3563_v6 = vpop.f32.mrb[13].mxu1  ;;  %v3524_v14 = vadd.f32 %v3523_v11, %v3522_v63  ;;  %v3525_v1 = vpop.f32.mrb[14].mxu0 }
 0x111   :  { %v3564_v0 = vadd.f32 %v3563_v6, %v3562_v32  ;;  %v3565_v4 = vpop.f32.mrb[14].mxu1  ;;  %v3526_v18 = vpop.f32.mrb[15].mxu0 }
 0x112   :  { %v3566_v35 = vpop.f32.mrb[15].mxu1  ;;  %v3527_v15 = vadd.f32 %v3526_v18, %v3525_v1 }
 0x113   :  { %v724_v13 = vadd.f32 %v3564_v0, %v3524_v14  ;;  %v3567_v41 = vadd.f32 %v3566_v35, %v3565_v4  ;;  %2778 = vmatmul.mubr.bf16.gmra.mrb[120].mxu0 %v5216_v38 }
 0x114   :  { %4037 = vmatmul.mubr.msk.bf16.gmra.mrb[96].mxu1 %vm587_vm0, %v4326_v33 }
 0x115   :  { %v727_v12 = vadd.f32 %v3567_v41, %v3527_v15 }
 0x116   :  { %v3584_v19 = vpop.f32.mrb[16].mxu0 }
 0x117   :  { %v3998_v17 = vpop.f32.mrb[16].mxu1  ;;  %v3585_v20 = vpop.f32.mrb[17].mxu0 }
 0x118   :  { %v829_v16 = vpop.f32.mrb[17].mxu1  ;;  %v3586_v22 = vadd.f32 %v3585_v20, %v3584_v19  ;;  %v3587_v30 = vpop.f32.mrb[18].mxu0 }
 0x119   :  { %v3999_v21 = vpop.f32.mrb[18].mxu1  ;;  %v3588_v43 = vpop.f32.mrb[19].mxu0 }
 0x11a   :  { %v832_v23 = vpop.f32.mrb[19].mxu1  ;;  %v3589_v25 = vadd.f32 %v3588_v43, %v3587_v30  ;;  %v765_v36 = vadd.f32 %v3586_v22, %v5329_v24 }
 0x11c   :  { %v5380_v26 = vadd.f32 %v829_v16, %v765_v36  ;;  %v768_v27 = vadd.f32 %v3589_v25, %v5335_v49 }
 0x11e   :  { %v5383_v28 = vadd.f32 %v832_v23, %v768_v27  ;;  %v3590_v29 = vpop.f32.mrb[20].mxu0 }
 0x11f   :  { %v3591_v31 = vpop.f32.mrb[21].mxu0 }
 0x120   :  { %v3592_v50 = vadd.f32 %v3591_v31, %v3590_v29  ;;  %v3593_v37 = vpop.f32.mrb[22].mxu0 }
 0x121   :  { %v3594_v42 = vpop.f32.mrb[23].mxu0  ;;  %v4002_v5 = vpop.f32.mrb[20].mxu1 }
 0x122   :  { %v773_v38 = vadd.f32 %v3592_v50, %v5349_v62  ;;  %v3595_v8 = vadd.f32 %v3594_v42, %v3593_v37  ;;  %v845_v7 = vpop.f32.mrb[21].mxu1 }
 0x123   :  { %v4003_v62 = vpop.f32.mrb[22].mxu1 }
 0x124   :  { %v5386_v45 = vadd.f32 %v3998_v17, %v773_v38  ;;  %v776_v48 = vadd.f32 %v3595_v8, %v5355_v61  ;;  %v848_v52 = vpop.f32.mrb[23].mxu1 }
 0x126   :  { %v5389_v55 = vadd.f32 %v3999_v21, %v776_v48  ;;  %v3596_v24 = vpop.f32.mrb[24].mxu0 }
 0x127   :  { %v3597_v56 = vpop.f32.mrb[25].mxu0 }
 0x128   :  { %v3598_v59 = vadd.f32 %v3597_v56, %v3596_v24  ;;  %v3599_v49 = vpop.f32.mrb[26].mxu0 }
 0x129   :  { %v3600_v58 = vpop.f32.mrb[27].mxu0 }
 0x12a   :  { %v3601_v34 = vadd.f32 %v3600_v58, %v3599_v49  ;;  %v781_v40 = vadd.f32 %v3598_v59, %v716_v47 }
 0x12c   :  { %v784_v44 = vadd.f32 %v3601_v34, %v719_v54  ;;  %v5391_v51 = vadd.f32 %v845_v7, %v781_v40 }
 0x12e   :  { %v5393_v57 = vadd.f32 %v848_v52, %v784_v44  ;;  %v3602_v39 = vpop.f32.mrb[28].mxu0 }
 0x12f   :  { %v3603_v61 = vpop.f32.mrb[29].mxu0 }
 0x130   :  { %v3604_v46 = vadd.f32 %v3603_v61, %v3602_v39  ;;  %v3605_v3 = vpop.f32.mrb[30].mxu0 }
 0x131   :  { %v3606_v2 = vpop.f32.mrb[31].mxu0 }
 0x132   :  { %v789_v9 = vadd.f32 %v3604_v46, %v724_v13  ;;  %v3607_v53 = vadd.f32 %v3606_v2, %v3605_v3 }
 0x134   :  { %v5395_v10 = vadd.f32 %v4002_v5, %v789_v9  ;;  %v792_v63 = vadd.f32 %v3607_v53, %v727_v12 }
 0x136   :  { %v5397_v47 = vadd.f32 %v4003_v62, %v792_v63  ;;  %v3630_v32 = vpop.f32.mrb[32].mxu0 }
 0x137   :  { %v3670_v54 = vpop.f32.mrb[24].mxu1  ;;  %v3631_v6 = vpop.f32.mrb[33].mxu0 }
 0x138   :  { %v3671_v11 = vpop.f32.mrb[25].mxu1  ;;  %v3632_v1 = vadd.f32 %v3631_v6, %v3630_v32  ;;  %v3633_v4 = vpop.f32.mrb[34].mxu0 }
 0x139   :  { %v3672_v14 = vadd.f32 %v3671_v11, %v3670_v54  ;;  %v3673_v0 = vpop.f32.mrb[26].mxu1  ;;  %v3634_v18 = vpop.f32.mrb[35].mxu0 }
 0x13a   :  { %v3674_v60 = vpop.f32.mrb[27].mxu1  ;;  %v3635_v41 = vadd.f32 %v3634_v18, %v3633_v4 }
 0x13b   :  { %v3675_v35 = vadd.f32 %v3674_v60, %v3673_v0  ;;  %v1361_v15 = vadd.f32 %v3672_v14, %v3632_v1 }
 0x13d   :  { %v1364_v13 = vadd.f32 %v3675_v35, %v3635_v41 }
 0x13e   :  { %v3636_v19 = vpop.f32.mrb[36].mxu0 }
 0x13f   :  { %v3676_v17 = vpop.f32.mrb[28].mxu1  ;;  %v3637_v12 = vpop.f32.mrb[37].mxu0 }
 0x140   :  { %v3677_v16 = vpop.f32.mrb[29].mxu1  ;;  %v3638_v21 = vadd.f32 %v3637_v12, %v3636_v19  ;;  %v3639_v22 = vpop.f32.mrb[38].mxu0 }
 0x141   :  { %v3678_v33 = vadd.f32 %v3677_v16, %v3676_v17  ;;  %v3679_v20 = vpop.f32.mrb[30].mxu1  ;;  %v3640_v23 = vpop.f32.mrb[39].mxu0 }
 0x142   :  { %v3680_v30 = vpop.f32.mrb[31].mxu1  ;;  %v3641_v36 = vadd.f32 %v3640_v23, %v3639_v22 }
 0x143   :  { %v3681_v43 = vadd.f32 %v3680_v30, %v3679_v20  ;;  %v1369_v25 = vadd.f32 %v3678_v33, %v3638_v21 }
 0x145   :  { %v1372_v27 = vadd.f32 %v3681_v43, %v3641_v36 }
 0x146   :  { %v3642_v31 = vpop.f32.mrb[40].mxu0 }
 0x147   :  { %v3682_v29 = vpop.f32.mrb[32].mxu1  ;;  %v3643_v37 = vpop.f32.mrb[41].mxu0 }
 0x148   :  { %v3683_v50 = vpop.f32.mrb[33].mxu1  ;;  %v3644_v8 = vadd.f32 %v3643_v37, %v3642_v31  ;;  %v3645_v48 = vpop.f32.mrb[42].mxu0 }
 0x149   :  { %v3684_v42 = vadd.f32 %v3683_v50, %v3682_v29  ;;  %v3685_v38 = vpop.f32.mrb[34].mxu1  ;;  %v3646_v56 = vpop.f32.mrb[43].mxu0 }
 0x14a   :  { %v3686_v24 = vpop.f32.mrb[35].mxu1  ;;  %v3647_v58 = vadd.f32 %v3646_v56, %v3645_v48 }
 0x14b   :  { %v3687_v59 = vadd.f32 %v3686_v24, %v3685_v38  ;;  %v1377_v49 = vadd.f32 %v3684_v42, %v3644_v8 }
 0x14d   :  { %v1380_v34 = vadd.f32 %v3687_v59, %v3647_v58 }
 0x14e   :  { %v3648_v5 = vpop.f32.mrb[44].mxu0 }
 0x14f   :  { %v3688_v40 = vpop.f32.mrb[36].mxu1  ;;  %v3649_v7 = vpop.f32.mrb[45].mxu0 }
 0x150   :  { %v3689_v44 = vpop.f32.mrb[37].mxu1  ;;  %v3650_v39 = vadd.f32 %v3649_v7, %v3648_v5  ;;  %v3651_v61 = vpop.f32.mrb[46].mxu0 }
 0x151   :  { %v3690_v62 = vadd.f32 %v3689_v44, %v3688_v40  ;;  %v3691_v52 = vpop.f32.mrb[38].mxu1  ;;  %v3652_v3 = vpop.f32.mrb[47].mxu0 }
 0x152   :  { %v3692_v46 = vpop.f32.mrb[39].mxu1  ;;  %v3653_v53 = vadd.f32 %v3652_v3, %v3651_v61 }
 0x153   :  { %v3693_v2 = vadd.f32 %v3692_v46, %v3691_v52  ;;  %v1385_v9 = vadd.f32 %v3690_v62, %v3650_v39 }
 0x155   :  { %v1388_v63 = vadd.f32 %v3693_v2, %v3653_v53 }
 0x156   :  { %v3710_v32 = vpop.f32.mrb[48].mxu0 }
 0x157   :  { %v4010_v54 = vpop.f32.mrb[40].mxu1  ;;  %v3711_v6 = vpop.f32.mrb[49].mxu0 }
 0x158   :  { %v1490_v11 = vpop.f32.mrb[41].mxu1  ;;  %v3712_v0 = vadd.f32 %v3711_v6, %v3710_v32  ;;  %v3713_v1 = vpop.f32.mrb[50].mxu0 }
 0x159   :  { %v4011_v14 = vpop.f32.mrb[42].mxu1  ;;  %v3714_v60 = vpop.f32.mrb[51].mxu0 }
 0x15a   :  { %v1493_v4 = vpop.f32.mrb[43].mxu1  ;;  %v3715_v18 = vadd.f32 %v3714_v60, %v3713_v1  ;;  %v1426_v35 = vadd.f32 %v3712_v0, %v1361_v15 }
 0x15c   :  { %v5399_v41 = vadd.f32 %v1490_v11, %v1426_v35  ;;  %v1429_v17 = vadd.f32 %v3715_v18, %v1364_v13 }
 0x15e   :  { %v1521_v16 = vmax.f32 %v5380_v26, %v5399_v41  ;;  %v5403_v12 = vadd.f32 %v1493_v4, %v1429_v17  ;;  %v3716_v33 = vpop.f32.mrb[52].mxu0 }
 0x15f   :  { %v4014_v19 = vpop.f32.mrb[44].mxu1  ;;  %v3717_v21 = vpop.f32.mrb[53].mxu0 }
 0x160   :  { %v1506_v20 = vpop.f32.mrb[45].mxu1  ;;  %v1522_v30 = vmax.f32 %v5383_v28, %v5403_v12  ;;  %v3718_v23 = vadd.f32 %v3717_v21, %v3716_v33  ;;  %v3719_v43 = vpop.f32.mrb[54].mxu0 }
 0x161   :  { %v4015_v22 = vpop.f32.mrb[46].mxu1  ;;  %v3720_v15 = vpop.f32.mrb[55].mxu0 }
 0x162   :  { %v1509_v36 = vpop.f32.mrb[47].mxu1  ;;  %v1434_v29 = vadd.f32 %v3718_v23, %v1369_v25  ;;  %v3721_v31 = vadd.f32 %v3720_v15, %v3719_v43 }
 0x164   :  { %v5407_v13 = vadd.f32 %v4010_v54, %v1434_v29  ;;  %v1437_v50 = vadd.f32 %v3721_v31, %v1372_v27 }
 0x166   :  { %v1523_v37 = vmax.f32 %v5386_v45, %v5407_v13  ;;  %v5411_v42 = vadd.f32 %v4011_v14, %v1437_v50  ;;  %v3722_v38 = vpop.f32.mrb[56].mxu0 }
 0x167   :  { %v3723_v8 = vpop.f32.mrb[57].mxu0 }
 0x168   :  { %v1524_v48 = vmax.f32 %v5389_v55, %v5411_v42  ;;  %v3724_v24 = vadd.f32 %v3723_v8, %v3722_v38  ;;  %v3725_v56 = vpop.f32.mrb[58].mxu0 }
 0x169   :  { %v3726_v59 = vpop.f32.mrb[59].mxu0 }
 0x16a   :  { %v3727_v58 = vadd.f32 %v3726_v59, %v3725_v56  ;;  %v1442_v40 = vadd.f32 %v3724_v24, %v1377_v49 }
 0x16c   :  { %v5415_v25 = vadd.f32 %v1506_v20, %v1442_v40  ;;  %v1445_v5 = vadd.f32 %v3727_v58, %v1380_v34 }
 0x16e   :  { %v1525_v27 = vmax.f32 %v5391_v51, %v5415_v25  ;;  %v5419_v44 = vadd.f32 %v1509_v36, %v1445_v5  ;;  %v3728_v7 = vpop.f32.mrb[60].mxu0 }
 0x16f   :  { %v3729_v62 = vpop.f32.mrb[61].mxu0 }
 0x170   :  { %v1526_v52 = vmax.f32 %v5393_v57, %v5419_v44  ;;  %v3730_v39 = vadd.f32 %v3729_v62, %v3728_v7  ;;  %v3731_v61 = vpop.f32.mrb[62].mxu0 }
 0x171   :  { %v3732_v46 = vpop.f32.mrb[63].mxu0 }
 0x172   :  { %v1450_v3 = vadd.f32 %v3730_v39, %v1385_v9  ;;  %v3733_v2 = vadd.f32 %v3732_v46, %v3731_v61 }
 0x174   :  { %v5423_v53 = vadd.f32 %v4014_v19, %v1450_v3  ;;  %v1453_v49 = vadd.f32 %v3733_v2, %v1388_v63 }
 0x176   :  { %v5425_v34 = vadd.f32 %v4015_v22, %v1453_v49  ;;  %v3756_v32 = vpop.f32.mrb[64].mxu0  ;;  %v1527_v6 = vmax.f32 %v5395_v10, %v5423_v53 }
 0x177   :  { %v3796_v54 = vpop.f32.mrb[48].mxu1  ;;  %v3757_v14 = vpop.f32.mrb[65].mxu0 }
 0x178   :  { %v3797_v11 = vpop.f32.mrb[49].mxu1  ;;  %v3758_v4 = vadd.f32 %v3757_v14, %v3756_v32  ;;  %v3759_v60 = vpop.f32.mrb[66].mxu0  ;;  %v1528_v9 = vmax.f32 %v5397_v47, %v5425_v34 }
 0x179   :  { %v3798_v0 = vadd.f32 %v3797_v11, %v3796_v54  ;;  %v3799_v1 = vpop.f32.mrb[50].mxu1  ;;  %v3760_v35 = vpop.f32.mrb[67].mxu0 }
 0x17a   :  { %v3800_v18 = vpop.f32.mrb[51].mxu1  ;;  %v3761_v19 = vadd.f32 %v3760_v35, %v3759_v60 }
 0x17b   :  { %v3801_v17 = vadd.f32 %v3800_v18, %v3799_v1  ;;  %v2030_v63 = vadd.f32 %v3798_v0, %v3758_v4 }
 0x17d   :  { %v2033_v33 = vadd.f32 %v3801_v17, %v3761_v19 }
 0x17e   :  { %v3762_v21 = vpop.f32.mrb[68].mxu0 }
 0x17f   :  { %v3802_v20 = vpop.f32.mrb[52].mxu1  ;;  %v3763_v23 = vpop.f32.mrb[69].mxu0 }
 0x180   :  { %v3803_v22 = vpop.f32.mrb[53].mxu1  ;;  %v3764_v15 = vadd.f32 %v3763_v23, %v3762_v21  ;;  %v3765_v29 = vpop.f32.mrb[70].mxu0 }
 0x181   :  { %v3804_v43 = vadd.f32 %v3803_v22, %v3802_v20  ;;  %v3805_v36 = vpop.f32.mrb[54].mxu1  ;;  %v3766_v50 = vpop.f32.mrb[71].mxu0 }
 0x182   :  { %v3806_v31 = vpop.f32.mrb[55].mxu1  ;;  %v3767_v24 = vadd.f32 %v3766_v50, %v3765_v29 }
 0x183   :  { %v3807_v38 = vadd.f32 %v3806_v31, %v3805_v36  ;;  %v2038_v8 = vadd.f32 %v3804_v43, %v3764_v15 }
 0x185   :  { %v2041_v56 = vadd.f32 %v3807_v38, %v3767_v24 }
 0x186   :  { %v3768_v58 = vpop.f32.mrb[72].mxu0 }
 0x187   :  { %v3808_v59 = vpop.f32.mrb[56].mxu1  ;;  %v3769_v5 = vpop.f32.mrb[73].mxu0 }
 0x188   :  { %v3809_v40 = vpop.f32.mrb[57].mxu1  ;;  %v3770_v39 = vadd.f32 %v3769_v5, %v3768_v58  ;;  %v3771_v61 = vpop.f32.mrb[74].mxu0 }
 0x189   :  { %v3810_v7 = vadd.f32 %v3809_v40, %v3808_v59  ;;  %v3811_v62 = vpop.f32.mrb[58].mxu1  ;;  %v3772_v3 = vpop.f32.mrb[75].mxu0 }
 0x18a   :  { %v3812_v46 = vpop.f32.mrb[59].mxu1  ;;  %v3773_v54 = vadd.f32 %v3772_v3, %v3771_v61 }
 0x18b   :  { %v3813_v2 = vadd.f32 %v3812_v46, %v3811_v62  ;;  %v2046_v49 = vadd.f32 %v3810_v7, %v3770_v39 }
 0x18d   :  { %v2049_v32 = vadd.f32 %v3813_v2, %v3773_v54 }
 0x18e   :  { %v3774_v14 = vpop.f32.mrb[76].mxu0 }
 0x18f   :  { %v3814_v11 = vpop.f32.mrb[60].mxu1  ;;  %v3775_v1 = vpop.f32.mrb[77].mxu0 }
 0x190   :  { %v3815_v0 = vpop.f32.mrb[61].mxu1  ;;  %v3776_v18 = vadd.f32 %v3775_v1, %v3774_v14  ;;  %v3777_v35 = vpop.f32.mrb[78].mxu0 }
 0x191   :  { %v3816_v4 = vadd.f32 %v3815_v0, %v3814_v11  ;;  %v3817_v60 = vpop.f32.mrb[62].mxu1  ;;  %v3778_v19 = vpop.f32.mrb[79].mxu0 }
 0x192   :  { %v3818_v17 = vpop.f32.mrb[63].mxu1  ;;  %v3779_v22 = vadd.f32 %v3778_v19, %v3777_v35 }
 0x193   :  { %v3819_v20 = vadd.f32 %v3818_v17, %v3817_v60  ;;  %v2054_v21 = vadd.f32 %v3816_v4, %v3776_v18 }
 0x195   :  { %v2057_v23 = vadd.f32 %v3819_v20, %v3779_v22 }
 0x196   :  { %v3836_v36 = vpop.f32.mrb[80].mxu0 }
 0x197   :  { %v4022_v43 = vpop.f32.mrb[64].mxu1  ;;  %v3837_v29 = vpop.f32.mrb[81].mxu0 }
 0x198   :  { %v2159_v15 = vpop.f32.mrb[65].mxu1  ;;  %v3838_v50 = vadd.f32 %v3837_v29, %v3836_v36  ;;  %v3839_v38 = vpop.f32.mrb[82].mxu0 }
 0x199   :  { %v4023_v31 = vpop.f32.mrb[66].mxu1  ;;  %v3840_v59 = vpop.f32.mrb[83].mxu0 }
 0x19a   :  { %v2162_v24 = vpop.f32.mrb[67].mxu1  ;;  %v3841_v58 = vadd.f32 %v3840_v59, %v3839_v38  ;;  %v2095_v40 = vadd.f32 %v3838_v50, %v2030_v63 }
 0x19c   :  { %v2160_v5 = vadd.f32 %v2159_v15, %v2095_v40  ;;  %v2098_v7 = vadd.f32 %v3841_v58, %v2033_v33 }
 0x19e   :  { %v5434_v39 = vmax.f32 %v1521_v16, %v2160_v5  ;;  %v2163_v61 = vadd.f32 %v2162_v24, %v2098_v7  ;;  %v3842_v46 = vpop.f32.mrb[84].mxu0 }
 0x19f   :  { %v4026_v62 = vpop.f32.mrb[68].mxu1  ;;  %v3843_v2 = vpop.f32.mrb[85].mxu0 }
 0x1a0   :  { %v2175_v3 = vpop.f32.mrb[69].mxu1  ;;  %v5439_v11 = vmax.f32 %v1522_v30, %v2163_v61  ;;  %v3844_v14 = vadd.f32 %v3843_v2, %v3842_v46  ;;  %v3845_v63 = vpop.f32.mrb[86].mxu0 }
 0x1a1   :  { %v4027_v54 = vpop.f32.mrb[70].mxu1  ;;  %v3846_v33 = vpop.f32.mrb[87].mxu0 }
 0x1a2   :  { %v2178_v0 = vpop.f32.mrb[71].mxu1  ;;  %v2103_v1 = vadd.f32 %v3844_v14, %v2038_v8  ;;  %v3847_v4 = vadd.f32 %v3846_v33, %v3845_v63 }
 0x1a4   :  { %v2168_v60 = vadd.f32 %v4022_v43, %v2103_v1  ;;  %v2106_v26 = vadd.f32 %v3847_v4, %v2041_v56 }
 0x1a6   :  { %v5444_v41 = vmax.f32 %v1523_v37, %v2168_v60  ;;  %v2171_v16 = vadd.f32 %v4023_v31, %v2106_v26  ;;  %v3848_v18 = vpop.f32.mrb[88].mxu0 }
 0x1a7   :  { %v3849_v35 = vpop.f32.mrb[89].mxu0 }
 0x1a8   :  { %v5449_v28 = vmax.f32 %v1524_v48, %v2171_v16  ;;  %v3850_v12 = vadd.f32 %v3849_v35, %v3848_v18  ;;  %v3851_v30 = vpop.f32.mrb[90].mxu0 }
 0x1a9   :  { %v3852_v17 = vpop.f32.mrb[91].mxu0 }
 0x1aa   :  { %v3853_v8 = vadd.f32 %v3852_v17, %v3851_v30  ;;  %v2111_v19 = vadd.f32 %v3850_v12, %v2046_v49 }
 0x1ac   :  { %v2176_v20 = vadd.f32 %v2175_v3, %v2111_v19  ;;  %v2114_v56 = vadd.f32 %v3853_v8, %v2049_v32 }
 0x1ae   :  { %v5454_v45 = vmax.f32 %v1525_v27, %v2176_v20  ;;  %v2179_v13 = vadd.f32 %v2178_v0, %v2114_v56  ;;  %v3854_v37 = vpop.f32.mrb[92].mxu0 }
 0x1af   :  { %v3855_v22 = vpop.f32.mrb[93].mxu0 }
 0x1b0   :  { %v5459_v55 = vmax.f32 %v1526_v52, %v2179_v13  ;;  %v3856_v42 = vadd.f32 %v3855_v22, %v3854_v37  ;;  %v3857_v48 = vpop.f32.mrb[94].mxu0 }
 0x1b1   :  { %v3858_v43 = vpop.f32.mrb[95].mxu0 }
 0x1b2   :  { %v2119_v36 = vadd.f32 %v3856_v42, %v2054_v21  ;;  %v3859_v49 = vadd.f32 %v3858_v43, %v3857_v48 }
 0x1b4   :  { %v2184_v15 = vadd.f32 %v4026_v62, %v2119_v36  ;;  %v2122_v32 = vadd.f32 %v3859_v49, %v2057_v23 }
 0x1b6   :  { %v2187_v31 = vadd.f32 %v4027_v54, %v2122_v32  ;;  %v3882_v51 = vpop.f32.mrb[96].mxu0  ;;  %v5464_v27 = vmax.f32 %v1527_v6, %v2184_v15 }
 0x1b7   :  { %v3922_v29 = vpop.f32.mrb[72].mxu1  ;;  %v3883_v50 = vpop.f32.mrb[97].mxu0 }
 0x1b8   :  { %v3923_v25 = vpop.f32.mrb[73].mxu1  ;;  %v3884_v52 = vadd.f32 %v3883_v50, %v3882_v51  ;;  %v3885_v38 = vpop.f32.mrb[98].mxu0  ;;  %v5469_v21 = vmax.f32 %v1528_v9, %v2187_v31 }
 0x1b9   :  { %v3924_v57 = vadd.f32 %v3923_v25, %v3922_v29  ;;  %v3925_v44 = vpop.f32.mrb[74].mxu1  ;;  %v3886_v23 = vpop.f32.mrb[99].mxu0 }
 0x1ba   :  { %v3926_v24 = vpop.f32.mrb[75].mxu1  ;;  %v3887_v40 = vadd.f32 %v3886_v23, %v3885_v38  ;;  %v2888_v31 = vpop.permute.xlu1 %2887 }
 0x1bb   :  { %v3927_v59 = vadd.f32 %v3926_v24, %v3925_v44  ;;  %v2699_v58 = vadd.f32 %v3924_v57, %v3884_v52  ;;  %v2878_v25 = vpop.permute.xlu0 %2877 }
 0x1bd   :  { %v2702_v5 = vadd.f32 %v3927_v59, %v3887_v40 }
 0x1be   :  { %v3888_v10 = vpop.f32.mrb[100].mxu0 }
 0x1bf   :  { %v3928_v7 = vpop.f32.mrb[76].mxu1  ;;  %v3889_v6 = vpop.f32.mrb[101].mxu0 }
 0x1c0   :  { %v3929_v53 = vpop.f32.mrb[77].mxu1  ;;  %v3890_v46 = vadd.f32 %v3889_v6, %v3888_v10  ;;  %v3891_v3 = vpop.f32.mrb[102].mxu0 }
 0x1c1   :  { %v3930_v62 = vadd.f32 %v3929_v53, %v3928_v7  ;;  %v3931_v61 = vpop.f32.mrb[78].mxu1  ;;  %v3892_v54 = vpop.f32.mrb[103].mxu0 }
 0x1c2   :  { %v3932_v2 = vpop.f32.mrb[79].mxu1  ;;  %v3893_v47 = vadd.f32 %v3892_v54, %v3891_v3 }
 0x1c3   :  { %v3933_v14 = vadd.f32 %v3932_v2, %v3931_v61  ;;  %v5471_v63 = vadd.f32 %v3930_v62, %v3890_v46  ;;  %v2893_v61 = vpop.permute.xlu1 %2892  ;;  %v2883_v2 = vpop.permute.xlu0 %2882 }
 0x1c5   :  { %v5473_v34 = vadd.f32 %v3933_v14, %v3893_v47 }
 0x1c6   :  { %v3894_v0 = vpop.f32.mrb[104].mxu0 }
 0x1c7   :  { %v3934_v9 = vpop.f32.mrb[80].mxu1  ;;  %v3895_v1 = vpop.f32.mrb[105].mxu0 }
 0x1c8   :  { %v3935_v33 = vpop.f32.mrb[81].mxu1  ;;  %v3896_v26 = vadd.f32 %v3895_v1, %v3894_v0  ;;  %v3897_v16 = vpop.f32.mrb[106].mxu0 }
 0x1c9   :  { %v3936_v4 = vadd.f32 %v3935_v33, %v3934_v9  ;;  %v3937_v60 = vpop.f32.mrb[82].mxu1  ;;  %v3898_v35 = vpop.f32.mrb[107].mxu0 }
 0x1ca   :  { %v3938_v18 = vpop.f32.mrb[83].mxu1  ;;  %v3899_v17 = vadd.f32 %v3898_v35, %v3897_v16 }
 0x1cb   :  { %v3939_v12 = vadd.f32 %v3938_v18, %v3937_v60  ;;  %v5475_v30 = vadd.f32 %v3936_v4, %v3896_v26 }
 0x1cd   :  { %v5477_v8 = vadd.f32 %v3939_v12, %v3899_v17  ;;  %v2898_v12 = vpop.permute.xlu0 %2897 }
 0x1ce   :  { %v3900_v20 = vpop.f32.mrb[108].mxu0 }
 0x1cf   :  { %v3940_v19 = vpop.f32.mrb[84].mxu1  ;;  %v3901_v13 = vpop.f32.mrb[109].mxu0 }
 0x1d0   :  { %v3941_v56 = vpop.f32.mrb[85].mxu1  ;;  %v3902_v42 = vadd.f32 %v3901_v13, %v3900_v20  ;;  %v3903_v48 = vpop.f32.mrb[110].mxu0 }
 0x1d1   :  { %v3942_v37 = vadd.f32 %v3941_v56, %v3940_v19  ;;  %v3943_v22 = vpop.f32.mrb[86].mxu1  ;;  %v3904_v36 = vpop.f32.mrb[111].mxu0 }
 0x1d2   :  { %v3944_v43 = vpop.f32.mrb[87].mxu1  ;;  %v3905_v32 = vadd.f32 %v3904_v36, %v3903_v48  ;;  %v2903_v13 = vpop.permute.xlu1 %2902 }
 0x1d3   :  { %v3945_v49 = vadd.f32 %v3944_v43, %v3943_v22  ;;  %v2723_v15 = vadd.f32 %v3942_v37, %v3902_v42 }
 0x1d5   :  { %v2726_v29 = vadd.f32 %v3945_v49, %v3905_v32 }
 0x1d6   :  { %v3962_v57 = vpop.f32.mrb[112].mxu0 }
 0x1d7   :  { %v3980_v51 = vpop.f32.mrb[88].mxu1  ;;  %v3963_v38 = vpop.f32.mrb[113].mxu0 }
 0x1d8   :  { %v3981_v50 = vpop.f32.mrb[89].mxu1  ;;  %v3964_v23 = vadd.f32 %v3963_v38, %v3962_v57  ;;  %v3965_v59 = vpop.f32.mrb[114].mxu0 }
 0x1d9   :  { %v3982_v44 = vadd.f32 %v3981_v50, %v3980_v51  ;;  %v3983_v52 = vpop.f32.mrb[90].mxu1  ;;  %v3966_v7 = vpop.f32.mrb[115].mxu0 }
 0x1da   :  { %v3984_v24 = vpop.f32.mrb[91].mxu1  ;;  %v3967_v53 = vadd.f32 %v3966_v7, %v3965_v59  ;;  %v2764_v6 = vadd.f32 %v3964_v23, %v2699_v58  ;;  %v2908_v51 = vpop.permute.xlu0 %2907 }
 0x1db   :  { %v3985_v40 = vadd.f32 %v3984_v24, %v3983_v52  ;;  %v2788_v10 = vadd.f32 %v3982_v44, %v2723_v15  ;;  %v2913_v38 = vpop.permute.xlu1 %2912 }
 0x1dc   :  { %v2767_v46 = vadd.f32 %v3967_v53, %v2702_v5 }
 0x1dd   :  { %v2791_v62 = vadd.f32 %v3985_v40, %v2726_v29 }
 0x1de   :  { %v3968_v14 = vpop.f32.mrb[116].mxu0 }
 0x1df   :  { %v4034_v3 = vpop.f32.mrb[92].mxu1  ;;  %v3969_v0 = vpop.f32.mrb[117].mxu0 }
 0x1e0   :  { %v2828_v54 = vpop.f32.mrb[93].mxu1  ;;  %v3970_v1 = vadd.f32 %v3969_v0, %v3968_v14  ;;  %v3971_v4 = vpop.f32.mrb[118].mxu0 }
 0x1e1   :  { %v2829_v47 = vadd.f32 %v2828_v54, %v2764_v6  ;;  %v4035_v9 = vpop.f32.mrb[94].mxu1  ;;  %v3972_v16 = vpop.f32.mrb[119].mxu0 }
 0x1e2   :  { %v2831_v33 = vpop.f32.mrb[95].mxu1  ;;  %v2772_v18 = vadd.f32 %v3970_v1, %v5471_v63  ;;  %v3973_v58 = vadd.f32 %v3972_v16, %v3971_v4 }
 0x1e3   :  { %v2859_v60 = vmax.f32 %v5434_v39, %v2829_v47  ;;  %v2832_v26 = vadd.f32 %v2831_v33, %v2767_v46 }
 0x1e4   :  { %v2837_v17 = vadd.f32 %v4034_v3, %v2772_v18  ;;  %v2775_v19 = vadd.f32 %v3973_v58, %v5473_v34 }
 0x1e5   :  { %v2915_v35 = vadd.f32 %v2878_v25, %v2859_v60  ;;  %v2860_v5 = vmax.f32 %v5439_v11, %v2832_v26 }
 0x1e6   :  { %v2861_v22 = vmax.f32 %v5444_v41, %v2837_v17  ;;  %v2840_v39 = vadd.f32 %v4035_v9, %v2775_v19  ;;  %v3974_v43 = vpop.f32.mrb[120].mxu0 }
 0x1e7   :  { %v2923_v20 = vmax.f32 %v2915_v35, 0.0  ;;  %v2916_v56 = vadd.f32 %v2883_v2, %v2860_v5  ;;  %v4038_v37 = vpop.f32.mrb[96].mxu1  ;;  %v3975_v36 = vpop.f32.mrb[121].mxu0 }
 0x1e8   :  { %v2853_v42 = vadd.f32 %v4038_v37, %v2788_v10  ;;  %v2844_v48 = vpop.f32.mrb[97].mxu1  ;;  %v2917_v49 = vadd.f32 %v2888_v31, %v2861_v22  ;;  %v2862_v34 = vmax.f32 %v5449_v28, %v2840_v39  ;;  %v3977_v29 = vpop.f32.mrb[122].mxu0  ;;  %v3976_v25 = vadd.f32 %v3975_v36, %v3974_v43 }
 0x1e9   :  { %2932 = vst.msk [vmem:[%s5526_s3] sm:$0xff] %vm2931_vm1, %v2923_v20  ;;  %v2924_v11 = vmax.f32 %v2916_v56, 0.0  ;;  %v4039_v63 = vpop.f32.mrb[98].mxu1  ;;  %v3978_v50 = vpop.f32.mrb[123].mxu0 }
 0x1ea   :  { %v2856_v15 = vadd.f32 %v4039_v63, %v2791_v62  ;;  %v2865_v32 = vmax.f32 %v5464_v27, %v2853_v42  ;;  %v2847_v41 = vpop.f32.mrb[99].mxu1  ;;  %v2925_v57 = vmax.f32 %v2917_v49, 0.0  ;;  %v2918_v44 = vadd.f32 %v2893_v61, %v2862_v34 }
 0x1eb   :  { %2933 = vst.msk [vmem:[%s5526_s3 + $0x8] sm:$0xff] %vm2931_vm1, %v2924_v11  ;;  %v2780_v28 = vadd.f32 %v3976_v25, %v5475_v30  ;;  %v3979_v24 = vadd.f32 %v3978_v50, %v3977_v29 }
 0x1ec   :  { %v2866_v52 = vmax.f32 %v5469_v21, %v2856_v15  ;;  %v2921_v31 = vadd.f32 %v2908_v51, %v2865_v32  ;;  %2934 = vst.msk [vmem:[%s5526_s3 + $0x10] sm:$0xff] %vm2931_vm1, %v2925_v57  ;;  %v2926_v27 = vmax.f32 %v2918_v44, 0.0 }
 0x1ed   :  { %v2845_v40 = vadd.f32 %v2844_v48, %v2780_v28  ;;  %v2783_v7 = vadd.f32 %v3979_v24, %v5477_v8 }
 0x1ee   :  { %v2922_v23 = vadd.f32 %v2913_v38, %v2866_v52  ;;  %v2929_v59 = vmax.f32 %v2921_v31, 0.0  ;;  %2935 = vst.msk [vmem:[%s5526_s3 + $0x18] sm:$0xff] %vm2931_vm1, %v2926_v27 }
 0x1ef   :  { %v2863_v30 = vmax.f32 %v5454_v45, %v2845_v40  ;;  %v2848_v10 = vadd.f32 %v2847_v41, %v2783_v7 }
 0x1f0   :  { %v2930_v21 = vmax.f32 %v2922_v23, 0.0  ;;  %2938 = vst.msk [vmem:[%s5526_s3 + $0x30] sm:$0xff] %vm2931_vm1, %v2929_v59 }
 0x1f1   :  { %v2919_v8 = vadd.f32 %v2898_v12, %v2863_v30  ;;  %v2864_v53 = vmax.f32 %v5459_v55, %v2848_v10 }
 0x1f2   :  { %2939 = vst.msk [vmem:[%s5526_s3 + $0x38] sm:$0xff] %vm2931_vm1, %v2930_v21 }
 0x1f3   :  { %v2927_v6 = vmax.f32 %v2919_v8, 0.0  ;;  %v2920_v62 = vadd.f32 %v2903_v13, %v2864_v53 }
 0x1f5   :  { %2936 = vst.msk [vmem:[%s5526_s3 + $0x20] sm:$0xff] %vm2931_vm1, %v2927_v6  ;;  %v2928_v61 = vmax.f32 %v2920_v62, 0.0 }
 0x1f7   :  { %2937 = vst.msk [vmem:[%s5526_s3 + $0x28] sm:$0xff] %vm2931_vm1, %v2928_v61 }

// kernel: attention_forward.9
= control target key start
LH: loop header
LB: loop body
LE: loop exit
PB: predicated region body
PF: predicated region fallthrough
CT: control target
= control target key end

     0   :  { %v731_v1 = vmov 0   ;;  %vm389_vm0 = vcmask 523264   ;;  %vm547_vm1 = vcmask 64512   ;;  %s916_s0 = inlined_call_operand.vmem [shape: bf16[576,8], index: 0, kind: input, shape index: {}]   ;;  %s917_s1 = inlined_call_operand.vmem [shape: bf16[32,576], index: 1, kind: input, shape index: {}]   ;;  %s918_s2 = inlined_call_operand.vmem [shape: f32[32,1], index: 2, kind: input, shape index: {}]   ;;  %s919_s3 = inlined_call_operand.vmem [shape: f32[32,8], index: 3, kind: output, shape index: {}]  }
   0x1   :  { %v681_v0 = vld [vmem:[%s916_s0 + $0x40] sm:$0xff]   ;;  %679 = vset.pattern.permute.xlu0 %v731_v1  ;;  %680 = vset.pattern.permute.xlu1 %v731_v1  ;;  %v685_v5 = vld [vmem:[%s916_s0 + $0x48] sm:$0xff]   ;;  %v689_v9 = vld [vmem:[%s916_s0 + $0x50] sm:$0xff]  }
   0x2   :  { %v682_v2 = vld [vmem:[%s916_s0] sm:$0xff]   ;;  %604 = vmatprep.subr.bf16.mxu0 %v681_v0  ;;  %v686_v6 = vld [vmem:[%s916_s0 + $0x8] sm:$0xff]   ;;  %v690_v10 = vld [vmem:[%s916_s0 + $0x10] sm:$0xff]  }
   0x3   :  { %v683_v3 = vld [vmem:[%s916_s0 + $0xc0] sm:$0xff]   ;;  %605 = vmatpush3.bf16.msra.mxu0 %v682_v2  ;;  %v687_v7 = vld [vmem:[%s916_s0 + $0xc8] sm:$0xff]   ;;  %v691_v11 = vld [vmem:[%s916_s0 + $0xd0] sm:$0xff]  }
   0x4   :  { %v684_v4 = vld [vmem:[%s916_s0 + $0x80] sm:$0xff]   ;;  %632 = vmatprep.subr.bf16.mxu1 %v683_v3  ;;  %606 = vmatprep.subr.bf16.mxu0 %v685_v5  ;;  %v688_v8 = vld [vmem:[%s916_s0 + $0x88] sm:$0xff]   ;;  %v692_v12 = vld [vmem:[%s916_s0 + $0x90] sm:$0xff]  }
   0x5   :  { %633 = vmatpush3.bf16.msra.mxu1 %v684_v4  ;;  %v693_v13 = vld [vmem:[%s916_s0 + $0x58] sm:$0xff]   ;;  %v697_v17 = vld [vmem:[%s916_s0 + $0x60] sm:$0xff]   ;;  %v701_v21 = vld [vmem:[%s916_s0 + $0x68] sm:$0xff]  }
   0x6   :  { %634 = vmatprep.subr.bf16.mxu1 %v687_v7  ;;  %v694_v14 = vld [vmem:[%s916_s0 + $0x18] sm:$0xff]   ;;  %v698_v18 = vld [vmem:[%s916_s0 + $0x20] sm:$0xff]   ;;  %v702_v22 = vld [vmem:[%s916_s0 + $0x28] sm:$0xff]  }
   0x7   :  { %607 = vmatpush3.bf16.msra.mxu0 %v686_v6  ;;  %v695_v15 = vld [vmem:[%s916_s0 + $0xd8] sm:$0xff]   ;;  %v699_v19 = vld [vmem:[%s916_s0 + $0xe0] sm:$0xff]   ;;  %v703_v23 = vld [vmem:[%s916_s0 + $0xe8] sm:$0xff]  }
   0x8   :  { %608 = vmatprep.subr.bf16.mxu0 %v689_v9  ;;  %v696_v16 = vld [vmem:[%s916_s0 + $0x98] sm:$0xff]   ;;  %v700_v20 = vld [vmem:[%s916_s0 + $0xa0] sm:$0xff]   ;;  %v704_v24 = vld [vmem:[%s916_s0 + $0xa8] sm:$0xff]  }
   0x9   :  { %635 = vmatpush3.bf16.msra.mxu1 %v688_v8  ;;  %v705_v25 = vld [vmem:[%s916_s0 + $0x70] sm:$0xff]   ;;  %v709_v29 = vld [vmem:[%s916_s0 + $0x78] sm:$0xff]   ;;  %v716_v35 = vld [vmem:[%s916_s0 + $0x100] sm:$0xff]  }
   0xa   :  { %636 = vmatprep.subr.bf16.mxu1 %v691_v11  ;;  %v706_v26 = vld [vmem:[%s916_s0 + $0x30] sm:$0xff]   ;;  %v710_v30 = vld [vmem:[%s916_s0 + $0x38] sm:$0xff]   ;;  %v719_v37 = vld [vmem:[%s917_s1 + $0xc] ss:$20 sps:$4 sm:$0xff]  }
   0xb   :  { %609 = vmatpush3.bf16.msra.mxu0 %v690_v10  ;;  %v707_v27 = vld [vmem:[%s916_s0 + $0xf0] sm:$0xff]   ;;  %v711_v31 = vld [vmem:[%s916_s0 + $0xf8] sm:$0xff]   ;;  %v720_v38 = vld [vmem:[%s916_s0 + $0x108] sm:$0xff]   ;;  %477 = vmatprep.mubr.bf16.mxu1 %v719_v37 }
   0xc   :  { %610 = vmatprep.subr.bf16.mxu0 %v693_v13  ;;  %v708_v28 = vld [vmem:[%s916_s0 + $0xb0] sm:$0xff]   ;;  %v714_v33 = vld [vmem:[%s917_s1 + $0x4] ss:$20 sps:$4 sm:$0xff]   ;;  %v717_v36 = vld [vmem:[%s917_s1 + $0x8] ss:$20 sps:$4 sm:$0xff]  }
   0xd   :  { %637 = vmatpush3.bf16.msra.mxu1 %v692_v12  ;;  %v712_v32 = vld [vmem:[%s917_s1] ss:$20 sps:$4 sm:$0xff]   ;;  %v715_v34 = vld [vmem:[%s916_s0 + $0xb8] sm:$0xff]   ;;  %428 = vmatprep.mubr.bf16.mxu0 %v714_v33  ;;  %v727_v43 = vld [vmem:[%s917_s1 + $0x30] ss:$20 sps:$4 sm:$0xff]  }
   0xe   :  { %638 = vmatprep.subr.bf16.mxu1 %v695_v15  ;;  %v721_v39 = vld [vmem:[%s917_s1 + $0x2c] ss:$20 sps:$4 sm:$0xff]   ;;  %v723_v40 = vld [vmem:[%s917_s1 + $0x28] ss:$20 sps:$4 sm:$0xff]   ;;  %v724_v41 = vld [vmem:[%s916_s0 + $0x110] sm:$0xff]  }
   0xf   :  { %611 = vmatpush3.bf16.msra.mxu0 %v694_v14  ;;  %v725_v42 = vld [vmem:[%s917_s1 + $0x34] ss:$20 sps:$4 sm:$0xff]   ;;  %v728_v44 = vld [vmem:[%s916_s0 + $0x118] sm:$0xff]   ;;  %v729_v45 = vld [vmem:[%s917_s1 + $0x10] ss:$20 sps:$4 sm:$0xff]  }
  0x10   :  { %612 = vmatprep.subr.bf16.mxu0 %v697_v17  ;;  %v99_v46 = vld [vmem:[%s918_s2] sm:$0xff]  ;;  %v101_v47 = vld [vmem:[%s918_s2 + $0x10] sm:$0xff]  ;;  %v100_v48 = vld [vmem:[%s918_s2 + $0x8] sm:$0xff] }
  0x11   :  { %639 = vmatpush3.bf16.msra.mxu1 %v696_v16  ;;  %105 = vperm.xlu0 %679, %v99_v46   ;;  %v102_v49 = vld [vmem:[%s918_s2 + $0x18] sm:$0xff] }
  0x12   :  { %640 = vmatprep.subr.bf16.mxu1 %v699_v19  ;;  %115 = vperm.xlu1 %680, %v101_v47   ;;  %v730_v50 = vld [vmem:[%s917_s1 + $0x38] ss:$20 sps:$4 sm:$0xff]  }
  0x13   :  { %613 = vmatpush3.bf16.msra.mxu0 %v698_v18 }
  0x14   :  { %614 = vmatprep.subr.bf16.mxu0 %v701_v21 }
  0x15   :  { %641 = vmatpush3.bf16.msra.mxu1 %v700_v20  ;;  %110 = vperm.xlu0 %679, %v100_v48  }
  0x16   :  { %642 = vmatprep.subr.bf16.mxu1 %v703_v23  ;;  %120 = vperm.xlu1 %680, %v102_v49  }
  0x17   :  { %615 = vmatpush3.bf16.msra.mxu0 %v702_v22 }
  0x18   :  { %616 = vmatprep.subr.bf16.mxu0 %v705_v25 }
  0x19   :  { %643 = vmatpush3.bf16.msra.mxu1 %v704_v24 }
  0x1a   :  { %644 = vmatprep.subr.bf16.mxu1 %v707_v27 }
  0x1b   :  { %617 = vmatpush3.bf16.msra.mxu0 %v706_v26 }
  0x1c   :  { %618 = vmatprep.subr.bf16.mxu0 %v709_v29 }
  0x1d   :  { %645 = vmatpush3.bf16.msra.mxu1 %v708_v28 }
  0x1e   :  { %646 = vmatprep.subr.bf16.mxu1 %v711_v31 }
  0x1f   :  { %619 = vmatpush3.bf16.msra.mxu0 %v710_v30 }
  0x20   :  { %666 = vmatprep.subr.bf16.mxu0 %v716_v35 }
  0x21   :  { %647 = vmatpush3.bf16.msra.mxu1 %v715_v34 }
  0x22   :  { %429 = vmatmul.mubr.bf16.vlgmr.msra.gmra.mrb[0].mxu0 %v712_v32 }
  0x23   :  { %667 = vmatpush3.bf16.msra.mxu0 %v716_v35  ;;  %436 = vmatprep.mubr.bf16.mxu0 %v721_v39 }
  0x24   :  { %478 = vmatmul.mubr.bf16.vlgmr.msra.gmra.mrb[0].mxu1 %v717_v36  ;;  %668 = vmatprep.subr.bf16.mxu0 %v720_v38 }
  0x25   :  { %485 = vmatprep.mubr.bf16.mxu1 %v725_v42 }
  0x27   :  { %669 = vmatpush3.bf16.msra.mxu0 %v720_v38 }
  0x28   :  { %670 = vmatprep.subr.bf16.mxu0 %v724_v41 }
  0x2a   :  { %437 = vmatmul.mubr.bf16.gmra.mrb[4].mxu0 %v723_v40 }
  0x2b   :  { %674 = vmatprep.mubr.msk.bf16.mxu0 %vm389_vm0, %v729_v45  ;;  %671 = vmatpush3.bf16.msra.mxu0 %v724_v41 }
  0x2c   :  { %486 = vmatmul.mubr.bf16.gmra.mrb[4].mxu1 %v727_v43  ;;  %672 = vmatprep.subr.bf16.mxu0 %v728_v44 }
  0x2f   :  { %673 = vmatpush3.bf16.msra.mxu0 %v728_v44 }
  0x32   :  { %675 = vmatmul.mubr.msk.bf16.vlgmr.msra.gmra.mrb[8].mxu0 %vm389_vm0, %v730_v50 }
  0x90   :  { %v106_v51 = vpop.permute.xlu0 %105 }
  0x91   :  { %v116_v3 = vpop.permute.xlu1 %115 }
  0x94   :  { %v111_v56 = vpop.permute.xlu0 %110 }
  0x95   :  { %v121_v16 = vpop.permute.xlu1 %120 }
  0xf5   :  { %v620_v52 = vpop.f32.mrb[0].mxu0 }
  0xf6   :  { %v621_v53 = vpop.f32.mrb[1].mxu0 }
  0xf7   :  { %v622_v54 = vadd.f32 %v621_v53, %v620_v52  ;;  %v623_v55 = vpop.f32.mrb[2].mxu0  ;;  %v648_v57 = vpop.f32.mrb[0].mxu1 }
  0xf8   :  { %v624_v58 = vpop.f32.mrb[3].mxu0  ;;  %v649_v61 = vpop.f32.mrb[1].mxu1 }
  0xf9   :  { %v431_v59 = vadd.f32 %v622_v54, %v106_v51  ;;  %v625_v60 = vadd.f32 %v624_v58, %v623_v55  ;;  %v650_v62 = vadd.f32 %v649_v61, %v648_v57  ;;  %v651_v63 = vpop.f32.mrb[2].mxu1 }
  0xfa   :  { %v652_v1 = vpop.f32.mrb[3].mxu1 }
  0xfb   :  { %v434_v0 = vadd.f32 %v625_v60, %v111_v56  ;;  %v653_v2 = vadd.f32 %v652_v1, %v651_v63  ;;  %v480_v4 = vadd.f32 %v650_v62, %v431_v59 }
  0xfd   :  { %v626_v5 = vpop.f32.mrb[4].mxu0  ;;  %v483_v7 = vadd.f32 %v653_v2, %v434_v0 }
  0xfe   :  { %v627_v6 = vpop.f32.mrb[5].mxu0 }
  0xff   :  { %v628_v8 = vadd.f32 %v627_v6, %v626_v5  ;;  %v629_v9 = vpop.f32.mrb[6].mxu0  ;;  %v654_v10 = vpop.f32.mrb[4].mxu1 }
 0x100   :  { %v630_v11 = vpop.f32.mrb[7].mxu0  ;;  %v655_v14 = vpop.f32.mrb[5].mxu1 }
 0x101   :  { %v439_v12 = vadd.f32 %v628_v8, %v116_v3  ;;  %v631_v13 = vadd.f32 %v630_v11, %v629_v9  ;;  %v656_v15 = vadd.f32 %v655_v14, %v654_v10  ;;  %v657_v17 = vpop.f32.mrb[6].mxu1 }
 0x102   :  { %v658_v19 = vpop.f32.mrb[7].mxu1 }
 0x103   :  { %v442_v18 = vadd.f32 %v631_v13, %v121_v16  ;;  %v659_v20 = vadd.f32 %v658_v19, %v657_v17  ;;  %v488_v21 = vadd.f32 %v656_v15, %v439_v12 }
 0x105   :  { %v676_v22 = vpop.f32.mrb[8].mxu0  ;;  %v491_v23 = vadd.f32 %v659_v20, %v442_v18 }
 0x106   :  { %v537_v24 = vadd.f32 %v676_v22, %v488_v21  ;;  %v528_v25 = vpop.f32.mrb[9].mxu0 }
 0x107   :  { %v529_v26 = vadd.f32 %v528_v25, %v480_v4  ;;  %v677_v27 = vpop.f32.mrb[10].mxu0 }
 0x108   :  { %v545_v28 = vmax.f32 %v537_v24, 0.0  ;;  %v540_v29 = vadd.f32 %v677_v27, %v491_v23  ;;  %v531_v30 = vpop.f32.mrb[11].mxu0 }
 0x109   :  { %v543_v31 = vmax.f32 %v529_v26, 0.0  ;;  %v532_v32 = vadd.f32 %v531_v30, %v483_v7 }
 0x10a   :  { %550 = vst.msk [vmem:[%s919_s3 + $0x10] sm:$0xff] %vm547_vm1, %v545_v28  ;;  %v546_v33 = vmax.f32 %v540_v29, 0.0 }
 0x10b   :  { %548 = vst.msk [vmem:[%s919_s3] sm:$0xff] %vm547_vm1, %v543_v31  ;;  %v544_v34 = vmax.f32 %v532_v32, 0.0 }
 0x10c   :  { %551 = vst.msk [vmem:[%s919_s3 + $0x18] sm:$0xff] %vm547_vm1, %v546_v33 }
 0x10d   :  { %549 = vst.msk [vmem:[%s919_s3 + $0x8] sm:$0xff] %vm547_vm1, %v544_v34 }

// kernel: attention_forward.10
= control target key start
LH: loop header
LB: loop body
LE: loop exit
PB: predicated region body
PF: predicated region fallthrough
CT: control target
= control target key end

     0   :  { %v365_v1 = vmov 0.0   ;;  %vm366_vm0 = vmmov 0   ;;  %v367_v3 = vmov 0   ;;  %vm190_vm1 = vcmask 261120   ;;  %s466_s0 = inlined_call_operand.vmem [shape: bf16[288,32], index: 0, kind: input, shape index: {}]   ;;  %s467_s1 = inlined_call_operand.vmem [shape: bf16[16,288], index: 1, kind: input, shape index: {}]   ;;  %s468_s2 = inlined_call_operand.vmem [shape: f32[16,1], index: 2, kind: input, shape index: {}]   ;;  %s469_s3 = inlined_call_operand.vmem [shape: f32[16,32], index: 3, kind: output, shape index: {}]  }
   0x1   :  { %v343_v0 = vld [vmem:[%s466_s0 + $0x40] sm:$0xff]   ;;  %331 = vmatprep.subr.bf16.mxu1 %v365_v1  ;;  %335 = vmatprep.mubr.msk.bf16.mxu1 %vm366_vm0, %v365_v1  ;;  %v345_v4 = vld [vmem:[%s466_s0 + $0x48] sm:$0xff]   ;;  %v347_v6 = vld [vmem:[%s466_s0 + $0x50] sm:$0xff]  }
   0x2   :  { %v344_v2 = vld [vmem:[%s466_s0] sm:$0xff]   ;;  %342 = vset.pattern.permute.xlu0 %v367_v3  ;;  %306 = vmatprep.subr.bf16.mxu0 %v343_v0  ;;  %v346_v5 = vld [vmem:[%s466_s0 + $0x8] sm:$0xff]   ;;  %v348_v7 = vld [vmem:[%s466_s0 + $0x10] sm:$0xff]  }
   0x3   :  { %307 = vmatpush3.bf16.msra.mxu0 %v344_v2  ;;  %v349_v8 = vld [vmem:[%s466_s0 + $0x58] sm:$0xff]   ;;  %v351_v10 = vld [vmem:[%s466_s0 + $0x60] sm:$0xff]   ;;  %v353_v13 = vld [vmem:[%s466_s0 + $0x68] sm:$0xff]  }
   0x4   :  { %308 = vmatprep.subr.bf16.mxu0 %v345_v4  ;;  %v350_v9 = vld [vmem:[%s466_s0 + $0x18] sm:$0xff]   ;;  %v357_v11 = vld [vmem:[%s466_s0 + $0x80] sm:$0xff]   ;;  %v354_v14 = vld [vmem:[%s466_s0 + $0x28] sm:$0xff]  }
   0x5   :  { %v352_v12 = vld [vmem:[%s466_s0 + $0x20] sm:$0xff]   ;;  %332 = vmatpush3.bf16.msra.mxu1 %v357_v11  ;;  %v363_v16 = vld [vmem:[%s466_s0 + $0x88] sm:$0xff]   ;;  %v355_v17 = vld [vmem:[%s466_s0 + $0x70] sm:$0xff]  }
   0x6   :  { %333 = vmatprep.subr.bf16.mxu1 %v365_v1  ;;  %v362_v15 = vld [vmem:[%s467_s1 + $0x4] ss:$12 sps:$4 sm:$0xff]   ;;  %v364_v18 = vld [vmem:[%s467_s1 + $0x8] ss:$12 sps:$4 sm:$0xff]   ;;  %v358_v22 = vld [vmem:[%s466_s0 + $0x78] sm:$0xff]  }
   0x7   :  { %309 = vmatpush3.bf16.msra.mxu0 %v346_v5  ;;  %226 = vmatprep.mubr.bf16.mxu0 %v362_v15  ;;  %v55_v19 = vld [vmem:[%s468_s2] sm:$0xff]  ;;  %v56_v20 = vld [vmem:[%s468_s2 + $0x8] sm:$0xff]  ;;  %v356_v21 = vld [vmem:[%s466_s0 + $0x30] sm:$0xff]  }
   0x8   :  { %310 = vmatprep.subr.bf16.mxu0 %v347_v6  ;;  %59 = vperm.xlu0 %342, %v55_v19   ;;  %v359_v23 = vld [vmem:[%s466_s0 + $0x38] sm:$0xff]   ;;  %v360_v24 = vld [vmem:[%s467_s1] ss:$12 sps:$4 sm:$0xff]  }
   0x9   :  { %334 = vmatpush3.bf16.msra.mxu1 %v363_v16 }
   0xb   :  { %311 = vmatpush3.bf16.msra.mxu0 %v348_v7 }
   0xc   :  { %312 = vmatprep.subr.bf16.mxu0 %v349_v8  ;;  %336 = vmatmul.mubr.msk.bf16.vlgmr.msra.gmra.mrb[0].mxu1 %vm190_vm1, %v364_v18 }
   0xd   :  { %64 = vperm.xlu0 %342, %v56_v20  }
   0xf   :  { %313 = vmatpush3.bf16.msra.mxu0 %v350_v9 }
  0x10   :  { %314 = vmatprep.subr.bf16.mxu0 %v351_v10 }
  0x13   :  { %315 = vmatpush3.bf16.msra.mxu0 %v352_v12 }
  0x14   :  { %316 = vmatprep.subr.bf16.mxu0 %v353_v13 }
  0x17   :  { %317 = vmatpush3.bf16.msra.mxu0 %v354_v14 }
  0x18   :  { %318 = vmatprep.subr.bf16.mxu0 %v355_v17 }
  0x1b   :  { %319 = vmatpush3.bf16.msra.mxu0 %v356_v21 }
  0x1c   :  { %320 = vmatprep.subr.bf16.mxu0 %v358_v22 }
  0x1f   :  { %321 = vmatpush3.bf16.msra.mxu0 %v359_v23 }
  0x22   :  { %227 = vmatmul.mubr.bf16.vlgmr.msra.gmra.mrb[0].mxu0 %v360_v24 }
  0x87   :  { %v60_v29 = vpop.permute.xlu0 %59 }
  0x8c   :  { %v65_v37 = vpop.permute.xlu0 %64 }
  0xdf   :  { %v269_v25 = vpop.f32.mrb[0].mxu1 }
  0xe0   :  { %v337_v26 = vpop.f32.mrb[1].mxu1 }
  0xe1   :  { %v272_v27 = vpop.f32.mrb[2].mxu1 }
  0xe2   :  { %v338_v28 = vpop.f32.mrb[3].mxu1 }
  0xf5   :  { %v322_v30 = vpop.f32.mrb[0].mxu0 }
  0xf6   :  { %v323_v31 = vpop.f32.mrb[1].mxu0 }
  0xf7   :  { %v324_v32 = vadd.f32 %v323_v31, %v322_v30  ;;  %v325_v33 = vpop.f32.mrb[2].mxu0 }
  0xf8   :  { %v326_v34 = vpop.f32.mrb[3].mxu0 }
  0xf9   :  { %v229_v35 = vadd.f32 %v324_v32, %v60_v29  ;;  %v327_v36 = vadd.f32 %v326_v34, %v325_v33 }
  0xfb   :  { %v270_v38 = vadd.f32 %v269_v25, %v229_v35  ;;  %v232_v39 = vadd.f32 %v327_v36, %v65_v37 }
  0xfd   :  { %v276_v40 = vmax.f32 %v270_v38, 0.0  ;;  %v273_v41 = vadd.f32 %v272_v27, %v232_v39 }
  0xff   :  { %278 = vst.msk [vmem:[%s469_s3] sm:$0xff] %vm190_vm1, %v276_v40  ;;  %v277_v42 = vmax.f32 %v273_v41, 0.0 }
 0x101   :  { %279 = vst.msk [vmem:[%s469_s3 + $0x8] sm:$0xff] %vm190_vm1, %v277_v42 }

// kernel: attention_forward.11
= control target key start
LH: loop header
LB: loop body
LE: loop exit
PB: predicated region body
PF: predicated region fallthrough
CT: control target
= control target key end

     0   :  { %v222_v0 = vmov 0   ;;  %vm112_vm0 = vcmask 130048   ;;  %vm164_vm1 = vcmask 1042432   ;;  %v178_v24 = vlaneseq  ;;  %s295_s0 = inlined_call_operand.vmem [shape: bf16[144,128], index: 0, kind: input, shape index: {}]   ;;  %s296_s4 = inlined_call_operand.<no memory space> [shape: f32[1,1], index: 4, kind: input, shape index: {}]   ;;  %s297_s1 = inlined_call_operand.vmem [shape: bf16[3,144], index: 1, kind: input, shape index: {}]   ;;  %s298_s2 = inlined_call_operand.vmem [shape: f32[3,1], index: 2, kind: input, shape index: {}]   ;;  %s299_s3 = inlined_call_operand.vmem [shape: f32[3,1], index: 3, kind: input, shape index: {}]   ;;  %s300_s5 = inlined_call_operand.vmem [shape: f32[1,128], index: 5, kind: output, shape index: {}]  }
   0x1   :  { %116 = vmatprep.subr.bf16.mxu0 %v222_v0  ;;  %v209_v1 = vld [vmem:[%s295_s0] sm:$0xff]   ;;  %207 = vset.pattern.permute.xlu0 %v222_v0  ;;  %v10_v2 = vstv %s296_s4  ;;  %v210_v3 = vld [vmem:[%s295_s0 + $0x8] sm:$0xff]   ;;  %v211_v4 = vld [vmem:[%s295_s0 + $0x10] sm:$0xff]  }
   0x2   :  { %208 = vset.pattern.permute.xlu1 %v222_v0  ;;  %11 = vst [vmem:[#allocation2] sm:$0x1] %v10_v2  ;;  %117 = vmatpush1.bf16.msra.mxu0 %v209_v1  ;;  %v194_v5 = vld.sshfl [vmem:[%s297_s1] sm:$0x33 pattern:$0x76325410] }
   0x3   :  { %118 = vmatprep.subr.bf16.mxu0 %v222_v0  ;;  %v42_v6 = vld [vmem:[%s298_s2] sm:$0x7]  ;;  %v212_v7 = vld [vmem:[%s295_s0 + $0x18] sm:$0xff]   ;;  %v56_v8 = vcombine.high %v194_v5, %v194_v5  ;;  %v214_v12 = vld [vmem:[%s295_s0 + $0x28] sm:$0xff]   ;;  %v179_v28 = vshrl.u32 %v178_v24, 7 }
   0x4   :  { %45 = vperm.xlu0 %207, %v42_v6   ;;  %v157_v10 = vld [vmem:[%s299_s3] sm:$0x7]  ;;  %v215_v13 = vld [vmem:[%s295_s0 + $0x30] sm:$0xff]   ;;  %v216_v14 = vld [vmem:[%s295_s0 + $0x38] sm:$0xff]  }
   0x5   :  { %204 = vmatprep.mubr.msk.bf16.mxu0 %vm112_vm0, %v56_v8  ;;  %v213_v11 = vld [vmem:[%s295_s0 + $0x20] sm:$0xff]   ;;  %v180_v31 = vsub.s32 0, %v179_v28 }
   0x6   :  { %119 = vmatpush1.bf16.msra.mxu0 %v210_v3  ;;  %v217_v15 = vld [vmem:[%s295_s0 + $0x40] sm:$0xff]  }
   0x7   :  { %120 = vmatprep.subr.bf16.mxu0 %v222_v0 }
   0x8   :  { %160 = vperm.xlu0 %207, %v157_v10  }
   0x9   :  { %v172_v9 = vld [vmem:[#allocation2] sm:$0x1] }
   0xa   :  { %121 = vmatpush1.bf16.msra.mxu0 %v211_v4  ;;  %175 = vperm.xlu1 %208, %v172_v9  }
   0xb   :  { %122 = vmatprep.subr.bf16.mxu0 %v222_v0 }
   0xe   :  { %123 = vmatpush1.bf16.msra.mxu0 %v212_v7 }
   0xf   :  { %124 = vmatprep.subr.bf16.mxu0 %v222_v0 }
  0x12   :  { %125 = vmatpush1.bf16.msra.mxu0 %v213_v11 }
  0x13   :  { %126 = vmatprep.subr.bf16.mxu0 %v222_v0 }
  0x16   :  { %127 = vmatpush1.bf16.msra.mxu0 %v214_v12 }
  0x17   :  { %128 = vmatprep.subr.bf16.mxu0 %v222_v0 }
  0x1a   :  { %129 = vmatpush1.bf16.msra.mxu0 %v215_v13 }
  0x1b   :  { %130 = vmatprep.subr.bf16.mxu0 %v222_v0 }
  0x1e   :  { %131 = vmatpush1.bf16.msra.mxu0 %v216_v14 }
  0x1f   :  { %132 = vmatprep.subr.bf16.mxu0 %v222_v0 }
  0x22   :  { %133 = vmatpush1.bf16.msra.mxu0 %v217_v15 }
  0x25   :  { %149 = vmatmul.mubr.bf16.vlgmr.msra.gmra.mrb[0].mxu0 %v194_v5 }
  0x83   :  { %v46_v16 = vpop.permute.xlu0 %45 }
  0x87   :  { %v161_v23 = vpop.permute.xlu0 %160 }
  0x89   :  { %v176_v32 = vpop.permute.xlu1 %175 }
  0x8a   :  { %v181_v35 = vrot.slane %v176_v32, %v180_v31 }
  0xf8   :  { %v150_v17 = vpop.f32.mrb[0].mxu0 }
  0xf9   :  { %v151_v18 = vadd.f32 %v150_v17, %v46_v16  ;;  %v152_v19 = vpop.f32.mrb[1].mxu0 }
  0xfa   :  { %v153_v20 = vpop.f32.mrb[2].mxu0 }
  0xfb   :  { %v156_v21 = vmax.f32 %v151_v18, 0.0  ;;  %v154_v22 = vpop.f32.mrb[3].mxu0 }
  0xfd   :  { %v163_v25 = vmul.f32 %v161_v23, %v156_v21 }
  0xff   :  { %v165_v26 = vsel %vm164_vm1, %v163_v25, 0.0 }
 0x100   :  { %v166_v27 = vrot.slane %v165_v26, 4 }
 0x102   :  { %v167_v29 = vadd.f32 %v166_v27, %v165_v26 }
 0x104   :  { %v168_v30 = vrot.slane %v167_v29, 2 }
 0x106   :  { %v169_v33 = vadd.f32 %v168_v30, %v167_v29 }
 0x108   :  { %v170_v34 = vrot.slane %v169_v33, 1 }
 0x10a   :  { %v171_v36 = vadd.f32 %v170_v34, %v169_v33 }
 0x10c   :  { %v182_v37 = vadd.f32 %v181_v35, %v171_v36 }
 0x10e   :  { %v205_v38 = vmul.f32 -1.442695, %v182_v37 }
 0x110   :  { %218 = vpow2.f32 %v205_v38 }
 0x11a   :  { %v219_v39 = vpop.eup %218 }
 0x11b   :  { %v186_v40 = vadd.f32 1.0, %v219_v39 }
 0x11d   :  { %220 = vrcp.f32 %v186_v40 }
 0x127   :  { %v221_v41 = vpop.eup %220 }
 0x128   :  { %189 = vst [vmem:[%s300_s5] sm:$0x1] %v221_v41 }

</bundles_post_ra>
